<compile_context>
chip_gen: v5e
topology: v5e:2x2
jax: 0.10.0
libtpu: 0.0.40
codegen_flags: <defaults>
</compile_context>

<pallas_src>
import jax
import jax.numpy as jnp
from jax.experimental import pallas as pl
from jax.experimental.pallas import tpu as pltpu

_PAD = 8  # sublane-aligned guard rows around the a1 scratch (never read unmasked)


def bottleneck_kernel(x_ref, w1_ref, t1_ref, w2_ref, t2_ref, w3_ref, t3_ref,
                      o_ref, a1_ref):
    # x_ref:  (1, H, W, C)       full NHWC image (resident across the h axis)
    # w1_ref: (C, P)             conv1 1x1 weights, bn1 scale folded, compute dtype
    # t1_ref: (1, P)             bn1 shift (f32)
    # w2_ref: (9*P, P)           conv2 3x3 weights, (ky,kx,ci) row order, bn2 folded
    # t2_ref: (1, P)             bn2 shift (f32)
    # w3_ref: (P, C)             conv3 1x1 weights, bn3 scale folded
    # t3_ref: (1, C)             bn3 shift (f32)
    # o_ref:  (1, TH, W, C)      output rows for this tile
    # a1_ref: (2*_PAD + (TH+2)*W, P) VMEM scratch, stage-1 activation (flattened)
    h = pl.program_id(1)
    _, TH, W, C = o_ref.shape
    H = x_ref.shape[1]
    P = w1_ref.shape[1]
    cdtype = a1_ref.dtype
    row0 = pl.multiple_of(h * TH, TH)

    w1 = w1_ref[...]
    t1 = t1_ref[...]

    def conv1(rows):  # rows: (M, C) in compute dtype -> (M, P) f32, post bn1+relu
        y = jnp.dot(rows, w1, preferred_element_type=jnp.float32)
        return jnp.maximum(y + t1, 0.0)

    # ---- Stage 1: 1x1 conv + BN1 + ReLU, written into the a1 scratch --------
    # Guard rows (read only at positions that are masked off below).
    a1_ref[pl.ds(0, _PAD), :] = jnp.zeros((_PAD, P), cdtype)
    a1_ref[pl.ds(_PAD + (TH + 2) * W, _PAD), :] = jnp.zeros((_PAD, P), cdtype)

    # Centre rows [row0, row0+TH): one big dot, stored at logical rows [W, (TH+1)W).
    ctr = x_ref[0, pl.ds(row0, TH)].reshape(TH * W, C)
    a1_ref[pl.ds(_PAD + W, TH * W), :] = conv1(ctr).astype(cdtype)

    # Top halo row (image row row0-1); zero when the tile touches the top edge.
    top = x_ref[0, pl.ds(jnp.maximum(row0 - 1, 0), 1)].reshape(W, C)
    a_top = jnp.where(row0 == 0, 0.0, conv1(top))
    a1_ref[pl.ds(_PAD, W), :] = a_top.astype(cdtype)

    # Bottom halo row (image row row0+TH); zero at the bottom edge.
    bot = x_ref[0, pl.ds(jnp.minimum(row0 + TH, H - 1), 1)].reshape(W, C)
    a_bot = jnp.where(row0 + TH == H, 0.0, conv1(bot))
    a1_ref[pl.ds(_PAD + (TH + 1) * W, W), :] = a_bot.astype(cdtype)

    # ---- Stage 2: 3x3 conv as 9 accumulated dots over shifted row slices ----
    # a1_flat[j] = a1 of (tile-row R, col w) with j = (R+1)*W + w.  Term (dy,dx)
    # needs a1_flat[i + dy*W + dx - 1] (i = output flat index), masked to zero
    # at the left/right image border.  All slice offsets are static.
    col = jax.lax.broadcasted_iota(jnp.int32, (TH, W, P), 1).reshape(TH * W, P)
    zero = jnp.zeros((), cdtype)
    acc2 = jnp.zeros((TH * W, P), jnp.float32)
    for dy in range(3):
        for dx in range(3):
            start = _PAD + dy * W + dx - 1
            lhs = a1_ref[pl.ds(start, TH * W), :]
            if dx == 0:
                lhs = jnp.where(col == 0, zero, lhs)
            elif dx == 2:
                lhs = jnp.where(col == W - 1, zero, lhs)
            w2b = w2_ref[pl.ds((dy * 3 + dx) * P, P), :]
            acc2 = acc2 + jnp.dot(lhs, w2b, preferred_element_type=jnp.float32)
    a2 = jnp.maximum(acc2 + t2_ref[...], 0.0).astype(cdtype)

    # ---- Stage 3: 1x1 conv + BN3 + identity residual + ReLU -----------------
    y = jnp.dot(a2, w3_ref[...], preferred_element_type=jnp.float32)
    y = y + t3_ref[...]
    res = x_ref[0, pl.ds(row0, TH)].reshape(TH * W, C).astype(jnp.float32)
    y = jnp.maximum(y + res, 0.0)
    o_ref[0] = y.reshape(TH, W, C).astype(o_ref.dtype)


def _pick_tile_h(H, N, target=32):
    """Largest divisor of H <= target; keep >=2 parallel grid steps (v7x)."""
    th = min(H, target)
    while H % th:
        th -= 1
    if N * (H // th) < 2:
        for cand in range(th // 2, 0, -1):
            if H % cand == 0:
                return cand
    return th


def bottleneck_nhwc(x_nhwc, fp, tile_h=None):
    """Fused Bottleneck forward on NHWC input with pre-folded params."""
    N, H, W, C = x_nhwc.shape
    P = fp["w1m"].shape[1]
    Cexp = fp["w3m"].shape[1]
    assert C == Cexp, "identity residual requires inplanes == planes * expansion"
    if tile_h is None:
        tile_h = _pick_tile_h(H, N)
    tile_h = min(tile_h, H)
    assert H % tile_h == 0, "H must be divisible by tile_h"
    # TODO(synk): partial last tiles (H % tile_h != 0) are not supported.

    cdtype = x_nhwc.dtype
    esz = x_nhwc.dtype.itemsize
    # Weights feed the MXU in the compute (input) dtype; shifts stay f32.
    w1m = fp["w1m"].astype(cdtype)
    w2m = fp["w2m"].astype(cdtype)
    w3m = fp["w3m"].astype(cdtype)

    # Explicit VMEM budget: double-buffered x image + output tile, weights,
    # scratch, plus headroom for in-kernel f32 intermediates.
    scratch_rows = 2 * _PAD + (tile_h + 2) * W
    vmem = 2 * (H * W * C + tile_h * W * Cexp) * esz
    vmem += 2 * (C * P + 9 * P * P + P * Cexp + 2 * P + Cexp) * 4
    vmem += scratch_rows * P * esz
    vmem += 4 * tile_h * W * (P + Cexp) * 4        # f32 acc / epilogue headroom
    vmem_limit = int(min(100 * 2**20, max(32 * 2**20, 2 * vmem)))

    flops = 2 * N * H * W * (C * P + 9 * P * P + P * Cexp)
    bytes_accessed = (N * H * W * (C + Cexp)) * esz \
        + (C * P + 9 * P * P + P * Cexp) * esz + (2 * P + Cexp) * 4

    grid = (N, H // tile_h)
    return pl.pallas_call(
        bottleneck_kernel,
        out_shape=jax.ShapeDtypeStruct((N, H, W, Cexp), x_nhwc.dtype),
        grid_spec=pltpu.PrefetchScalarGridSpec(
            num_scalar_prefetch=0,
            grid=grid,
            in_specs=[
                # Full image stays resident across the h axis (one DMA per n).
                # TODO(synk): for very large feature maps on v7x (64 MiB VMEM),
                # switch to a (tile_h+2)-row halo block instead of full-image.
                pl.BlockSpec((1, H, W, C), lambda n, h: (n, 0, 0, 0)),
                pl.BlockSpec((C, P), lambda n, h: (0, 0)),
                pl.BlockSpec((1, P), lambda n, h: (0, 0)),
                pl.BlockSpec((9 * P, P), lambda n, h: (0, 0)),
                pl.BlockSpec((1, P), lambda n, h: (0, 0)),
                pl.BlockSpec((P, Cexp), lambda n, h: (0, 0)),
                pl.BlockSpec((1, Cexp), lambda n, h: (0, 0)),
            ],
            out_specs=pl.BlockSpec((1, tile_h, W, Cexp),
                                   lambda n, h: (n, h, 0, 0)),
            scratch_shapes=[pltpu.VMEM((scratch_rows, P), cdtype)],
        ),
        compiler_params=pltpu.CompilerParams(
            dimension_semantics=("parallel", "parallel"),
            vmem_limit_bytes=vmem_limit),
        cost_estimate=pl.CostEstimate(flops=flops, transcendentals=0,
                                      bytes_accessed=bytes_accessed),
    )(x_nhwc, w1m, fp["t1"], w2m, fp["t2"], w3m, fp["t3"])


def prepare_params(params, eps=1e-5):
    """Fold eval-mode BN into the conv weights (done once, outside the kernel)."""
    def fold(bn):
        s = bn["gamma"] / jnp.sqrt(bn["var"] + eps)
        t = bn["beta"] - bn["mean"] * s
        return s, t

    s1, t1 = fold(params["bn1"])
    s2, t2 = fold(params["bn2"])
    s3, t3 = fold(params["bn3"])
    P = params["w2"].shape[0]

    # conv1 (P, C, 1, 1) OIHW -> (C, P) matmul weights, bn1 scale folded.
    w1m = jnp.transpose(params["w1"][:, :, 0, 0]) * s1[None, :]
    # conv2 (P, P, 3, 3) OIHW -> (ky, kx, ci, o) -> (9*P, P), bn2 scale folded.
    w2m = jnp.transpose(params["w2"], (2, 3, 1, 0)).reshape(9 * P, P) * s2[None, :]
    # conv3 (4P, P, 1, 1) OIHW -> (P, 4P), bn3 scale folded.
    w3m = jnp.transpose(params["w3"][:, :, 0, 0]) * s3[None, :]

    return dict(w1m=w1m, t1=t1.reshape(1, -1),
                w2m=w2m, t2=t2.reshape(1, -1),
                w3m=w3m, t3=t3.reshape(1, -1))


def bottleneck_forward(x_nchw, params, tile_h=None):
    """Bottleneck forward, PyTorch NCHW in/out convention.

    NOTE: in a full ResNet the NCHW<->NHWC transposes and prepare_params()
    folding should be hoisted to the model boundary / init time (done once),
    keeping activations NHWC with C on the lane axis across blocks.
    """
    fp = prepare_params(params)
    x_nhwc = jnp.transpose(x_nchw, (0, 2, 3, 1))
    out = bottleneck_nhwc(x_nhwc, fp, tile_h=tile_h)
    return jnp.transpose(out, (0, 3, 1, 2))


def reference_forward(x, p, eps=1e-5):
    """Plain-JAX reference (eval-mode BN), NCHW."""
    def bn(y, b):
        s = b["gamma"] / jnp.sqrt(b["var"] + eps)
        t = b["beta"] - b["mean"] * s
        return y * s[None, :, None, None] + t[None, :, None, None]

    def conv(x, w, pad):
        return jax.lax.conv_general_dilated(
            x, w, (1, 1), ((pad, pad), (pad, pad)),
            dimension_numbers=("NCHW", "OIHW", "NCHW"))

    out = jnp.maximum(bn(conv(x, p["w1"], 0), p["bn1"]), 0.0)
    out = jnp.maximum(bn(conv(out, p["w2"], 1), p["bn2"]), 0.0)
    out = bn(conv(out, p["w3"], 0), p["bn3"])
    return jnp.maximum(out + x, 0.0)


def make_params(key, inplanes, planes, expansion=4):
    P, C, E = planes, inplanes, planes * expansion
    keys = jax.random.split(key, 15)

    def bn(kg, kb, km, kv, n):
        return dict(
            gamma=1.0 + 0.1 * jax.random.normal(kg, (n,), jnp.float32),
            beta=0.1 * jax.random.normal(kb, (n,), jnp.float32),
            mean=0.1 * jax.random.normal(km, (n,), jnp.float32),
            var=jnp.abs(jax.random.normal(kv, (n,), jnp.float32)) + 0.5,
        )

    return dict(
        w1=0.1 * jax.random.normal(keys[0], (P, C, 1, 1), jnp.float32),
        w2=0.1 * jax.random.normal(keys[1], (P, P, 3, 3), jnp.float32),
        w3=0.1 * jax.random.normal(keys[2], (E, P, 1, 1), jnp.float32),
        bn1=bn(keys[3], keys[4], keys[5], keys[6], P),
        bn2=bn(keys[7], keys[8], keys[9], keys[10], P),
        bn3=bn(keys[11], keys[12], keys[13], keys[14], E),
    )


if __name__ == "__main__":
    key = jax.random.PRNGKey(0)
    k_x, k_p = jax.random.split(key)

    # Bottleneck: planes=32, expansion=4 -> inplanes = 128 (identity residual,
    # downsample=None, stride=1). Output channels = 128 -> lane-dense stores.
    planes, expansion = 32, 4
    inplanes = planes * expansion
    N, H, W = 2, 16, 16

    x = jax.random.normal(k_x, (N, inplanes, H, W), jnp.float32)
    params = make_params(k_p, inplanes, planes, expansion)

    fwd = jax.jit(lambda xx, pp: bottleneck_forward(xx, pp))
    out = jax.block_until_ready(fwd(x, params))

    ref = reference_forward(x, params)
    assert out.shape == (N, inplanes, H, W)
    err = float(jnp.max(jnp.abs(out - ref)))
    assert jnp.allclose(out, ref, atol=1e-4, rtol=1e-4), f"mismatch, max err {err}"

    print("KERNEL_OK")
</pallas_src>

<mosaic_0001>
module attributes {stable_mosaic.version = 11 : i64} {
  func.func @bottleneck_kernel(%arg0: i32, %arg1: i32, %arg2: memref<1x16x16x128xf32, #tpu.memory_space<vmem>>, %arg3: memref<128x32xf32, #tpu.memory_space<vmem>>, %arg4: memref<1x32xf32, #tpu.memory_space<vmem>>, %arg5: memref<288x32xf32, #tpu.memory_space<vmem>>, %arg6: memref<1x32xf32, #tpu.memory_space<vmem>>, %arg7: memref<32x128xf32, #tpu.memory_space<vmem>>, %arg8: memref<1x128xf32, #tpu.memory_space<vmem>>, %arg9: memref<1x16x16x128xf32, #tpu.memory_space<vmem>>, %arg10: memref<304x32xf32, #tpu.memory_space<vmem>>) attributes {dimension_semantics = [#tpu.dimension_semantics<parallel>, #tpu.dimension_semantics<parallel>], iteration_bounds = array<i64: 2, 1>, scalar_prefetch = 0 : i64, scratch_operands = 1 : i64, tpu.core_type = #tpu.core_type<tc>, window_params = [{transform_indices = @transform_0, window_bounds = array<i64: 1, 16, 16, 128>}, {pipeline_mode = #tpu.pipeline_mode<synchronous>, transform_indices = @transform_1, window_bounds = array<i64: 128, 32>}, {pipeline_mode = #tpu.pipeline_mode<synchronous>, transform_indices = @transform_2, window_bounds = array<i64: 1, 32>}, {pipeline_mode = #tpu.pipeline_mode<synchronous>, transform_indices = @transform_3, window_bounds = array<i64: 288, 32>}, {pipeline_mode = #tpu.pipeline_mode<synchronous>, transform_indices = @transform_4, window_bounds = array<i64: 1, 32>}, {pipeline_mode = #tpu.pipeline_mode<synchronous>, transform_indices = @transform_5, window_bounds = array<i64: 32, 128>}, {pipeline_mode = #tpu.pipeline_mode<synchronous>, transform_indices = @transform_6, window_bounds = array<i64: 1, 128>}, {transform_indices = @transform_7, window_bounds = array<i64: 1, 16, 16, 128>}]} {
    %c16_i32 = arith.constant 16 : i32
    %0 = arith.muli %arg1, %c16_i32 : i32
    %1 = tpu.assume_multiple %0, 16 : i32
    %c0 = arith.constant 0 : index
    %c0_0 = arith.constant 0 : index
    %2 = vector.load %arg3[%c0, %c0_0] : memref<128x32xf32, #tpu.memory_space<vmem>>, vector<128x32xf32>
    %c0_1 = arith.constant 0 : index
    %c0_2 = arith.constant 0 : index
    %3 = vector.load %arg4[%c0_1, %c0_2] : memref<1x32xf32, #tpu.memory_space<vmem>>, vector<1x32xf32>
    %cst = arith.constant 0.000000e+00 : f32
    %4 = vector.broadcast %cst : f32 to vector<8x32xf32>
    %c0_3 = arith.constant 0 : index
    %c0_4 = arith.constant 0 : index
    %5 = vector.load %arg10[%c0_3, %c0_4] : memref<304x32xf32, #tpu.memory_space<vmem>>, vector<8x32xf32>
    tpu.vector_store %arg10[%c0_3, %c0_4], %4 {strides = array<i32>} : memref<304x32xf32, #tpu.memory_space<vmem>>, vector<8x32xf32>,
    %cst_5 = arith.constant 0.000000e+00 : f32
    %6 = vector.broadcast %cst_5 : f32 to vector<8x32xf32>
    %c296 = arith.constant 296 : index
    %c0_6 = arith.constant 0 : index
    %7 = vector.load %arg10[%c296, %c0_6] : memref<304x32xf32, #tpu.memory_space<vmem>>, vector<8x32xf32>
    tpu.vector_store %arg10[%c296, %c0_6], %6 {strides = array<i32>} : memref<304x32xf32, #tpu.memory_space<vmem>>, vector<8x32xf32>,
    %c0_7 = arith.constant 0 : index
    %8 = arith.index_cast %1 : i32 to index
    %c0_8 = arith.constant 0 : index
    %c0_9 = arith.constant 0 : index
    %9 = vector.load %arg2[%c0_7, %8, %c0_8, %c0_9] : memref<1x16x16x128xf32, #tpu.memory_space<vmem>>, vector<1x16x16x128xf32>
    %10 = vector.shape_cast %9 : vector<1x16x16x128xf32> to vector<16x16x128xf32>
    %11 = vector.shape_cast %10 : vector<16x16x128xf32> to vector<256x128xf32>
    %cst_10 = arith.constant dense<0.000000e+00> : vector<256x32xf32>
    %12 = tpu.matmul %11, %2, %cst_10 {dimension_numbers = #tpu.dot_dimension_numbers<[1], [0], [0], [1], [0, 0, 1, 1], [], []>} : vector<256x128xf32>, vector<128x32xf32>, vector<256x32xf32> -> vector<256x32xf32>
    %13 = vector.broadcast %3 : vector<1x32xf32> to vector<256x32xf32>
    %14 = arith.addf %12, %13 : vector<256x32xf32>
    %cst_11 = arith.constant 0.000000e+00 : f32
    %15 = vector.broadcast %cst_11 : f32 to vector<256x32xf32>
    %16 = arith.maximumf %14, %15 : vector<256x32xf32>
    %c24 = arith.constant 24 : index
    %c0_12 = arith.constant 0 : index
    %17 = vector.load %arg10[%c24, %c0_12] : memref<304x32xf32, #tpu.memory_space<vmem>>, vector<256x32xf32>
    tpu.vector_store %arg10[%c24, %c0_12], %16 {strides = array<i32>} : memref<304x32xf32, #tpu.memory_space<vmem>>, vector<256x32xf32>,
    %c1_i32 = arith.constant 1 : i32
    %18 = arith.subi %1, %c1_i32 : i32
    %c0_i32 = arith.constant 0 : i32
    %19 = arith.maxsi %18, %c0_i32 : i32
    %c0_13 = arith.constant 0 : index
    %20 = arith.index_cast %19 : i32 to index
    %c0_14 = arith.constant 0 : index
    %c0_15 = arith.constant 0 : index
    %21 = vector.load %arg2[%c0_13, %20, %c0_14, %c0_15] : memref<1x16x16x128xf32, #tpu.memory_space<vmem>>, vector<1x1x16x128xf32>
    %22 = vector.shape_cast %21 : vector<1x1x16x128xf32> to vector<1x16x128xf32>
    %23 = vector.shape_cast %22 : vector<1x16x128xf32> to vector<16x128xf32>
    %c0_i32_16 = arith.constant 0 : i32
    %24 = arith.cmpi eq, %1, %c0_i32_16 : i32
    %cst_17 = arith.constant dense<0.000000e+00> : vector<16x32xf32>
    %25 = tpu.matmul %23, %2, %cst_17 {dimension_numbers = #tpu.dot_dimension_numbers<[1], [0], [0], [1], [0, 0, 1, 1], [], []>} : vector<16x128xf32>, vector<128x32xf32>, vector<16x32xf32> -> vector<16x32xf32>
    %26 = vector.broadcast %3 : vector<1x32xf32> to vector<16x32xf32>
    %27 = arith.addf %25, %26 : vector<16x32xf32>
    %cst_18 = arith.constant 0.000000e+00 : f32
    %28 = vector.broadcast %cst_18 : f32 to vector<16x32xf32>
    %29 = arith.maximumf %27, %28 : vector<16x32xf32>
    %cst_19 = arith.constant 0.000000e+00 : f32
    %30 = vector.broadcast %cst_19 : f32 to vector<16x32xf32>
    %31 = arith.select %24, %30, %29 : vector<16x32xf32>
    %c8 = arith.constant 8 : index
    %c0_20 = arith.constant 0 : index
    %32 = vector.load %arg10[%c8, %c0_20] : memref<304x32xf32, #tpu.memory_space<vmem>>, vector<16x32xf32>
    tpu.vector_store %arg10[%c8, %c0_20], %31 {strides = array<i32>} : memref<304x32xf32, #tpu.memory_space<vmem>>, vector<16x32xf32>,
    %c16_i32_21 = arith.constant 16 : i32
    %33 = arith.addi %1, %c16_i32_21 : i32
    %c15_i32 = arith.constant 15 : i32
    %34 = arith.minsi %33, %c15_i32 : i32
    %c0_22 = arith.constant 0 : index
    %35 = arith.index_cast %34 : i32 to index
    %c0_23 = arith.constant 0 : index
    %c0_24 = arith.constant 0 : index
    %36 = vector.load %arg2[%c0_22, %35, %c0_23, %c0_24] : memref<1x16x16x128xf32, #tpu.memory_space<vmem>>, vector<1x1x16x128xf32>
    %37 = vector.shape_cast %36 : vector<1x1x16x128xf32> to vector<1x16x128xf32>
    %38 = vector.shape_cast %37 : vector<1x16x128xf32> to vector<16x128xf32>
    %c16_i32_25 = arith.constant 16 : i32
    %39 = arith.addi %1, %c16_i32_25 : i32
    %c16_i32_26 = arith.constant 16 : i32
    %40 = arith.cmpi eq, %39, %c16_i32_26 : i32
    %cst_27 = arith.constant dense<0.000000e+00> : vector<16x32xf32>
    %41 = tpu.matmul %38, %2, %cst_27 {dimension_numbers = #tpu.dot_dimension_numbers<[1], [0], [0], [1], [0, 0, 1, 1], [], []>} : vector<16x128xf32>, vector<128x32xf32>, vector<16x32xf32> -> vector<16x32xf32>
    %42 = vector.broadcast %3 : vector<1x32xf32> to vector<16x32xf32>
    %43 = arith.addf %41, %42 : vector<16x32xf32>
    %cst_28 = arith.constant 0.000000e+00 : f32
    %44 = vector.broadcast %cst_28 : f32 to vector<16x32xf32>
    %45 = arith.maximumf %43, %44 : vector<16x32xf32>
    %cst_29 = arith.constant 0.000000e+00 : f32
    %46 = vector.broadcast %cst_29 : f32 to vector<16x32xf32>
    %47 = arith.select %40, %46, %45 : vector<16x32xf32>
    %c280 = arith.constant 280 : index
    %c0_30 = arith.constant 0 : index
    %48 = vector.load %arg10[%c280, %c0_30] : memref<304x32xf32, #tpu.memory_space<vmem>>, vector<16x32xf32>
    tpu.vector_store %arg10[%c280, %c0_30], %47 {strides = array<i32>} : memref<304x32xf32, #tpu.memory_space<vmem>>, vector<16x32xf32>,
    %49 = tpu.iota {dimensions = array<i32: 1>} : vector<16x16x32xi32>
    %50 = vector.shape_cast %49 : vector<16x16x32xi32> to vector<256x32xi32>
    %cst_31 = arith.constant 0.000000e+00 : f32
    %51 = vector.broadcast %cst_31 : f32 to vector<256x32xf32>
    %c7 = arith.constant 7 : index
    %c0_32 = arith.constant 0 : index
    %52 = vector.load %arg10[%c7, %c0_32] : memref<304x32xf32, #tpu.memory_space<vmem>>, vector<256x32xf32>
    %c0_i32_33 = arith.constant 0 : i32
    %53 = vector.broadcast %c0_i32_33 : i32 to vector<256x32xi32>
    %54 = arith.cmpi eq, %50, %53 : vector<256x32xi32>
    %cst_34 = arith.constant 0.000000e+00 : f32
    %55 = vector.broadcast %cst_34 : f32 to vector<256x32xf32>
    %56 = arith.select %54, %55, %52 : vector<256x32xi1>, vector<256x32xf32>
    %c0_35 = arith.constant 0 : index
    %c0_36 = arith.constant 0 : index
    %57 = vector.load %arg5[%c0_35, %c0_36] : memref<288x32xf32, #tpu.memory_space<vmem>>, vector<32x32xf32>
    %cst_37 = arith.constant dense<0.000000e+00> : vector<256x32xf32>
    %58 = tpu.matmul %56, %57, %cst_37 {dimension_numbers = #tpu.dot_dimension_numbers<[1], [0], [0], [1], [0, 0, 1, 1], [], []>} : vector<256x32xf32>, vector<32x32xf32>, vector<256x32xf32> -> vector<256x32xf32>
    %59 = arith.addf %51, %58 : vector<256x32xf32>
    %c8_38 = arith.constant 8 : index
    %c0_39 = arith.constant 0 : index
    %60 = vector.load %arg10[%c8_38, %c0_39] : memref<304x32xf32, #tpu.memory_space<vmem>>, vector<256x32xf32>
    %c32 = arith.constant 32 : index
    %c0_40 = arith.constant 0 : index
    %61 = vector.load %arg5[%c32, %c0_40] : memref<288x32xf32, #tpu.memory_space<vmem>>, vector<32x32xf32>
    %cst_41 = arith.constant dense<0.000000e+00> : vector<256x32xf32>
    %62 = tpu.matmul %60, %61, %cst_41 {dimension_numbers = #tpu.dot_dimension_numbers<[1], [0], [0], [1], [0, 0, 1, 1], [], []>} : vector<256x32xf32>, vector<32x32xf32>, vector<256x32xf32> -> vector<256x32xf32>
    %63 = arith.addf %59, %62 : vector<256x32xf32>
    %c9 = arith.constant 9 : index
    %c0_42 = arith.constant 0 : index
    %64 = vector.load %arg10[%c9, %c0_42] : memref<304x32xf32, #tpu.memory_space<vmem>>, vector<256x32xf32>
    %c15_i32_43 = arith.constant 15 : i32
    %65 = vector.broadcast %c15_i32_43 : i32 to vector<256x32xi32>
    %66 = arith.cmpi eq, %50, %65 : vector<256x32xi32>
    %cst_44 = arith.constant 0.000000e+00 : f32
    %67 = vector.broadcast %cst_44 : f32 to vector<256x32xf32>
    %68 = arith.select %66, %67, %64 : vector<256x32xi1>, vector<256x32xf32>
    %c64 = arith.constant 64 : index
    %c0_45 = arith.constant 0 : index
    %69 = vector.load %arg5[%c64, %c0_45] : memref<288x32xf32, #tpu.memory_space<vmem>>, vector<32x32xf32>
    %cst_46 = arith.constant dense<0.000000e+00> : vector<256x32xf32>
    %70 = tpu.matmul %68, %69, %cst_46 {dimension_numbers = #tpu.dot_dimension_numbers<[1], [0], [0], [1], [0, 0, 1, 1], [], []>} : vector<256x32xf32>, vector<32x32xf32>, vector<256x32xf32> -> vector<256x32xf32>
    %71 = arith.addf %63, %70 : vector<256x32xf32>
    %c23 = arith.constant 23 : index
    %c0_47 = arith.constant 0 : index
    %72 = vector.load %arg10[%c23, %c0_47] : memref<304x32xf32, #tpu.memory_space<vmem>>, vector<256x32xf32>
    %c0_i32_48 = arith.constant 0 : i32
    %73 = vector.broadcast %c0_i32_48 : i32 to vector<256x32xi32>
    %74 = arith.cmpi eq, %50, %73 : vector<256x32xi32>
    %cst_49 = arith.constant 0.000000e+00 : f32
    %75 = vector.broadcast %cst_49 : f32 to vector<256x32xf32>
    %76 = arith.select %74, %75, %72 : vector<256x32xi1>, vector<256x32xf32>
    %c96 = arith.constant 96 : index
    %c0_50 = arith.constant 0 : index
    %77 = vector.load %arg5[%c96, %c0_50] : memref<288x32xf32, #tpu.memory_space<vmem>>, vector<32x32xf32>
    %cst_51 = arith.constant dense<0.000000e+00> : vector<256x32xf32>
    %78 = tpu.matmul %76, %77, %cst_51 {dimension_numbers = #tpu.dot_dimension_numbers<[1], [0], [0], [1], [0, 0, 1, 1], [], []>} : vector<256x32xf32>, vector<32x32xf32>, vector<256x32xf32> -> vector<256x32xf32>
    %79 = arith.addf %71, %78 : vector<256x32xf32>
    %c24_52 = arith.constant 24 : index
    %c0_53 = arith.constant 0 : index
    %80 = vector.load %arg10[%c24_52, %c0_53] : memref<304x32xf32, #tpu.memory_space<vmem>>, vector<256x32xf32>
    %c128 = arith.constant 128 : index
    %c0_54 = arith.constant 0 : index
    %81 = vector.load %arg5[%c128, %c0_54] : memref<288x32xf32, #tpu.memory_space<vmem>>, vector<32x32xf32>
    %cst_55 = arith.constant dense<0.000000e+00> : vector<256x32xf32>
    %82 = tpu.matmul %80, %81, %cst_55 {dimension_numbers = #tpu.dot_dimension_numbers<[1], [0], [0], [1], [0, 0, 1, 1], [], []>} : vector<256x32xf32>, vector<32x32xf32>, vector<256x32xf32> -> vector<256x32xf32>
    %83 = arith.addf %79, %82 : vector<256x32xf32>
    %c25 = arith.constant 25 : index
    %c0_56 = arith.constant 0 : index
    %84 = vector.load %arg10[%c25, %c0_56] : memref<304x32xf32, #tpu.memory_space<vmem>>, vector<256x32xf32>
    %c15_i32_57 = arith.constant 15 : i32
    %85 = vector.broadcast %c15_i32_57 : i32 to vector<256x32xi32>
    %86 = arith.cmpi eq, %50, %85 : vector<256x32xi32>
    %cst_58 = arith.constant 0.000000e+00 : f32
    %87 = vector.broadcast %cst_58 : f32 to vector<256x32xf32>
    %88 = arith.select %86, %87, %84 : vector<256x32xi1>, vector<256x32xf32>
    %c160 = arith.constant 160 : index
    %c0_59 = arith.constant 0 : index
    %89 = vector.load %arg5[%c160, %c0_59] : memref<288x32xf32, #tpu.memory_space<vmem>>, vector<32x32xf32>
    %cst_60 = arith.constant dense<0.000000e+00> : vector<256x32xf32>
    %90 = tpu.matmul %88, %89, %cst_60 {dimension_numbers = #tpu.dot_dimension_numbers<[1], [0], [0], [1], [0, 0, 1, 1], [], []>} : vector<256x32xf32>, vector<32x32xf32>, vector<256x32xf32> -> vector<256x32xf32>
    %91 = arith.addf %83, %90 : vector<256x32xf32>
    %c39 = arith.constant 39 : index
    %c0_61 = arith.constant 0 : index
    %92 = vector.load %arg10[%c39, %c0_61] : memref<304x32xf32, #tpu.memory_space<vmem>>, vector<256x32xf32>
    %c0_i32_62 = arith.constant 0 : i32
    %93 = vector.broadcast %c0_i32_62 : i32 to vector<256x32xi32>
    %94 = arith.cmpi eq, %50, %93 : vector<256x32xi32>
    %cst_63 = arith.constant 0.000000e+00 : f32
    %95 = vector.broadcast %cst_63 : f32 to vector<256x32xf32>
    %96 = arith.select %94, %95, %92 : vector<256x32xi1>, vector<256x32xf32>
    %c192 = arith.constant 192 : index
    %c0_64 = arith.constant 0 : index
    %97 = vector.load %arg5[%c192, %c0_64] : memref<288x32xf32, #tpu.memory_space<vmem>>, vector<32x32xf32>
    %cst_65 = arith.constant dense<0.000000e+00> : vector<256x32xf32>
    %98 = tpu.matmul %96, %97, %cst_65 {dimension_numbers = #tpu.dot_dimension_numbers<[1], [0], [0], [1], [0, 0, 1, 1], [], []>} : vector<256x32xf32>, vector<32x32xf32>, vector<256x32xf32> -> vector<256x32xf32>
    %99 = arith.addf %91, %98 : vector<256x32xf32>
    %c40 = arith.constant 40 : index
    %c0_66 = arith.constant 0 : index
    %100 = vector.load %arg10[%c40, %c0_66] : memref<304x32xf32, #tpu.memory_space<vmem>>, vector<256x32xf32>
    %c224 = arith.constant 224 : index
    %c0_67 = arith.constant 0 : index
    %101 = vector.load %arg5[%c224, %c0_67] : memref<288x32xf32, #tpu.memory_space<vmem>>, vector<32x32xf32>
    %cst_68 = arith.constant dense<0.000000e+00> : vector<256x32xf32>
    %102 = tpu.matmul %100, %101, %cst_68 {dimension_numbers = #tpu.dot_dimension_numbers<[1], [0], [0], [1], [0, 0, 1, 1], [], []>} : vector<256x32xf32>, vector<32x32xf32>, vector<256x32xf32> -> vector<256x32xf32>
    %103 = arith.addf %99, %102 : vector<256x32xf32>
    %c41 = arith.constant 41 : index
    %c0_69 = arith.constant 0 : index
    %104 = vector.load %arg10[%c41, %c0_69] : memref<304x32xf32, #tpu.memory_space<vmem>>, vector<256x32xf32>
    %c15_i32_70 = arith.constant 15 : i32
    %105 = vector.broadcast %c15_i32_70 : i32 to vector<256x32xi32>
    %106 = arith.cmpi eq, %50, %105 : vector<256x32xi32>
    %cst_71 = arith.constant 0.000000e+00 : f32
    %107 = vector.broadcast %cst_71 : f32 to vector<256x32xf32>
    %108 = arith.select %106, %107, %104 : vector<256x32xi1>, vector<256x32xf32>
    %c256 = arith.constant 256 : index
    %c0_72 = arith.constant 0 : index
    %109 = vector.load %arg5[%c256, %c0_72] : memref<288x32xf32, #tpu.memory_space<vmem>>, vector<32x32xf32>
    %cst_73 = arith.constant dense<0.000000e+00> : vector<256x32xf32>
    %110 = tpu.matmul %108, %109, %cst_73 {dimension_numbers = #tpu.dot_dimension_numbers<[1], [0], [0], [1], [0, 0, 1, 1], [], []>} : vector<256x32xf32>, vector<32x32xf32>, vector<256x32xf32> -> vector<256x32xf32>
    %111 = arith.addf %103, %110 : vector<256x32xf32>
    %c0_74 = arith.constant 0 : index
    %c0_75 = arith.constant 0 : index
    %112 = vector.load %arg6[%c0_74, %c0_75] : memref<1x32xf32, #tpu.memory_space<vmem>>, vector<1x32xf32>
    %113 = vector.broadcast %112 : vector<1x32xf32> to vector<256x32xf32>
    %114 = arith.addf %111, %113 : vector<256x32xf32>
    %cst_76 = arith.constant 0.000000e+00 : f32
    %115 = vector.broadcast %cst_76 : f32 to vector<256x32xf32>
    %116 = arith.maximumf %114, %115 : vector<256x32xf32>
    %c0_77 = arith.constant 0 : index
    %c0_78 = arith.constant 0 : index
    %117 = vector.load %arg7[%c0_77, %c0_78] : memref<32x128xf32, #tpu.memory_space<vmem>>, vector<32x128xf32>
    %cst_79 = arith.constant dense<0.000000e+00> : vector<256x128xf32>
    %118 = tpu.matmul %116, %117, %cst_79 {dimension_numbers = #tpu.dot_dimension_numbers<[1], [0], [0], [1], [0, 0, 1, 1], [], []>} : vector<256x32xf32>, vector<32x128xf32>, vector<256x128xf32> -> vector<256x128xf32>
    %c0_80 = arith.constant 0 : index
    %c0_81 = arith.constant 0 : index
    %119 = vector.load %arg8[%c0_80, %c0_81] : memref<1x128xf32, #tpu.memory_space<vmem>>, vector<1x128xf32>
    %120 = vector.broadcast %119 : vector<1x128xf32> to vector<256x128xf32>
    %121 = arith.addf %118, %120 : vector<256x128xf32>
    %c0_82 = arith.constant 0 : index
    %122 = arith.index_cast %1 : i32 to index
    %c0_83 = arith.constant 0 : index
    %c0_84 = arith.constant 0 : index
    %123 = vector.load %arg2[%c0_82, %122, %c0_83, %c0_84] : memref<1x16x16x128xf32, #tpu.memory_space<vmem>>, vector<1x16x16x128xf32>
    %124 = vector.shape_cast %123 : vector<1x16x16x128xf32> to vector<16x16x128xf32>
    %125 = vector.shape_cast %124 : vector<16x16x128xf32> to vector<256x128xf32>
    %126 = arith.addf %121, %125 : vector<256x128xf32>
    %cst_85 = arith.constant 0.000000e+00 : f32
    %127 = vector.broadcast %cst_85 : f32 to vector<256x128xf32>
    %128 = arith.maximumf %126, %127 : vector<256x128xf32>
    %129 = vector.shape_cast %128 : vector<256x128xf32> to vector<16x16x128xf32>
    %c0_86 = arith.constant 0 : index
    %c0_87 = arith.constant 0 : index
    %c0_88 = arith.constant 0 : index
    %c0_89 = arith.constant 0 : index
    %130 = vector.load %arg9[%c0_86, %c0_87, %c0_88, %c0_89] : memref<1x16x16x128xf32, #tpu.memory_space<vmem>>, vector<1x16x16x128xf32>
    %131 = vector.shape_cast %130 : vector<1x16x16x128xf32> to vector<16x16x128xf32>
    %132 = vector.shape_cast %129 : vector<16x16x128xf32> to vector<1x16x16x128xf32>
    tpu.vector_store %arg9[%c0_86, %c0_87, %c0_88, %c0_89], %132 {strides = array<i32>} : memref<1x16x16x128xf32, #tpu.memory_space<vmem>>, vector<1x16x16x128xf32>,
    return
  }
  func.func @transform_0(%arg0: i32, %arg1: i32) -> (i32, i32, i32, i32) {
    %c0_i32 = arith.constant 0 : i32
    %c0_i32_0 = arith.constant 0 : i32
    %c0_i32_1 = arith.constant 0 : i32
    %c0_i32_2 = arith.constant 0 : i32
    return %arg0, %c0_i32, %c0_i32_0, %c0_i32_1 : i32, i32, i32, i32
  }
  func.func @transform_1(%arg0: i32, %arg1: i32) -> (i32, i32) {
    %c0_i32 = arith.constant 0 : i32
    %c0_i32_0 = arith.constant 0 : i32
    %c0_i32_1 = arith.constant 0 : i32
    return %c0_i32, %c0_i32_0 : i32, i32
  }
  func.func @transform_2(%arg0: i32, %arg1: i32) -> (i32, i32) {
    %c0_i32 = arith.constant 0 : i32
    %c0_i32_0 = arith.constant 0 : i32
    %c0_i32_1 = arith.constant 0 : i32
    return %c0_i32, %c0_i32_0 : i32, i32
  }
  func.func @transform_3(%arg0: i32, %arg1: i32) -> (i32, i32) {
    %c0_i32 = arith.constant 0 : i32
    %c0_i32_0 = arith.constant 0 : i32
    %c0_i32_1 = arith.constant 0 : i32
    return %c0_i32, %c0_i32_0 : i32, i32
  }
  func.func @transform_4(%arg0: i32, %arg1: i32) -> (i32, i32) {
    %c0_i32 = arith.constant 0 : i32
    %c0_i32_0 = arith.constant 0 : i32
    %c0_i32_1 = arith.constant 0 : i32
    return %c0_i32, %c0_i32_0 : i32, i32
  }
  func.func @transform_5(%arg0: i32, %arg1: i32) -> (i32, i32) {
    %c0_i32 = arith.constant 0 : i32
    %c0_i32_0 = arith.constant 0 : i32
    %c0_i32_1 = arith.constant 0 : i32
    return %c0_i32, %c0_i32_0 : i32, i32
  }
  func.func @transform_6(%arg0: i32, %arg1: i32) -> (i32, i32) {
    %c0_i32 = arith.constant 0 : i32
    %c0_i32_0 = arith.constant 0 : i32
    %c0_i32_1 = arith.constant 0 : i32
    return %c0_i32, %c0_i32_0 : i32, i32
  }
  func.func @transform_7(%arg0: i32, %arg1: i32) -> (i32, i32, i32, i32) {
    %c0_i32 = arith.constant 0 : i32
    %c0_i32_0 = arith.constant 0 : i32
    %c0_i32_1 = arith.constant 0 : i32
    return %arg0, %arg1, %c0_i32, %c0_i32_0 : i32, i32, i32, i32
  }
}

</mosaic_0001>

<bundles_post_ra>
// kernel: _lambda_.1
= control target key start
LH: loop header
LB: loop body
LE: loop exit
PB: predicated region body
PF: predicated region fallthrough
CT: control target
= control target key end

     0   :  { %12 = vsyncpa [#allocation4], 0  ;;  %s6118_s0 = inlined_call_operand.vmem [shape: f32[2,16,16,128], index: 0, kind: input, shape index: {}]   ;;  %s6119_s1 = inlined_call_operand.vmem [shape: f32[128,32], index: 1, kind: input, shape index: {}]   ;;  %s6120_s2 = inlined_call_operand.vmem [shape: f32[1,32], index: 2, kind: input, shape index: {}]   ;;  %s6121_s3 = inlined_call_operand.vmem [shape: f32[288,32], index: 3, kind: input, shape index: {}]   ;;  %s6122_s4 = inlined_call_operand.vmem [shape: f32[1,32], index: 4, kind: input, shape index: {}]   ;;  %s6123_s5 = inlined_call_operand.vmem [shape: f32[32,128], index: 5, kind: input, shape index: {}]   ;;  %s6124_s6 = inlined_call_operand.vmem [shape: f32[1,128], index: 6, kind: input, shape index: {}]   ;;  %s6125_s7 = inlined_call_operand.hbm [shape: f32[2,16,16,128], index: 7, kind: output, shape index: {}]  }
   0x1   :  { %14 = vsyncpa [#allocation4 + $0x1], 0  ;;  %s4292_s24 = smov 0   ;;  %s4294_s25 = smov 0  }
   0x2   :  { %s4296_s26 = smov 0   ;;  %s4298_s27 = smov 0  }
   0x3   :  { %s4300_s28 = smov 0   ;;  %s4302_s29 = smov 0  }
   0x4 LB: > { %s3746_s30 = sadd.s32 4294967295, %s4247_s29   ;;  %s3747_s8 = sadd.s32 4294967294, %s4247_s29   ;;  %s4247_s29 = sphi %s4302_s29, %s20_s29   ;;  %s4243_s28 = sphi %s4300_s28, %s6252_s28   ;;  %s4239_s27 = sphi %s4298_s27, %s6251_s27   ;;  %s4235_s26 = sphi %s4296_s26, %s6250_s26   ;;  %s4231_s25 = sphi %s4294_s25, %s6249_s25   ;;  %s4227_s24 = sphi %s4292_s24, %s6248_s24  }
   0x5   : > { %s32_s9 = sadd.s32 1, %s4243_s28  ;;  %s193_s10 = sadd.s32 1, %s4235_s26 }
   0x6   : > { %p34_p0 = scmp.ge.s32.totalorder %s32_s9, 2  ;;  %p203_p1 = scmp.ne.s32.totalorder %s4235_s26, %s4231_s25 }
   0x7   : > { %p204_p2 = scmp.eq.s32.totalorder %s3746_s30, 1  ;;  %p209_p3 = scmp.ne.s32.totalorder %s4231_s25, %s4227_s24 }
   0x8   : > { %s6254_s9 = smov (%p34_p0, %s32_s9), 0  ;;  %p210_p5 = scmp.eq.s32.totalorder %s3747_s8, 1 }
   0x9   : > { %p4332_p4 = por %p204_p2, %p203_p1  ;;  %s188_s12 = ssub.s32 %s4243_s28, %s6254_s9 }
   0xa   : > { %p3750_p6 = scmp.ge.s32.totalorder %s4247_s29, 1  ;;  %p191_p7 = scmp.eq.s32.totalorder %s188_s12, 0 }
   0xb   : > { %p4339_p8 = por %p210_p5, %p209_p3  ;;  %p254_p9 = scmp.lt.s32.totalorder %s4247_s29, 3 }
   0xc   : > { %s4345_s14 = scalar_select %p191_p7, %s4235_s26, %s193_s10  }
   0xd   : > { %p255_p10 = pnand %p3750_p6, %p254_p9 }
   0xf   : > { %258 = sbr.rel (%p255_p10) target bundleno = 1214 (0x4be), region = 48 }
  0x14   : > { %v4350_v0 = vld [vmem:[%s6119_s1 + $0x78] sm:$0xff]  ;;  %v4355_v1 = vld [vmem:[%s6119_s1 + $0x70] sm:$0xff]  ;;  %v4362_v2 = vld [vmem:[%s6119_s1 + $0x68] sm:$0xff]  ;;  %p286_p11 = scmp.lt.s32.totalorder %s4239_s27, 1  ;;  %vm310_vm0 = vcmask 261120   ;;  %v4249_v38 = vmov 0.0   ;;  %v607_v41 = vlaneseq }
  0x15   : > { %350 = vmatpush.msra.mxu0 %v4350_v0  ;;  %4083 = vmatpush.msra.mxu2 %v4350_v0  ;;  %v4370_v3 = vld [vmem:[%s6119_s1 + $0x60] sm:$0xff]  ;;  %v4378_v4 = vld [vmem:[%s6119_s1 + $0x58] sm:$0xff]  ;;  %v303_v5 = vld [vmem:[%s6119_s1 + $0x50] sm:$0xff]  ;;  %565 = vst.msk [vmem:[#allocation2 + $0x8] sm:$0xff] %vm310_vm0, %v4249_v38  ;;  %s283_s15 = sand.u32 1, %s4231_s25   ;;  %s4082_s20 = sshll.u32 %s4239_s27, 8 }
  0x16   : > { %535 = vmatpush.msra.mxu1 %v4350_v0  ;;  %v302_v6 = vld [vmem:[%s6119_s1 + $0x48] sm:$0xff]  ;;  %v301_v7 = vld [vmem:[%s6119_s1 + $0x40] sm:$0xff]  ;;  %v300_v8 = vld [vmem:[%s6119_s1 + $0x38] sm:$0xff]  ;;  %s287_s30 = scalar_select %p286_p11, %s4239_s27, 1  ;;  %311 = vst.msk [vmem:[#allocation2] sm:$0xff] %vm310_vm0, %v4249_v38  ;;  %v4475_v43 = vshrl.u32 %v607_v41, 7 }
  0x17   : > { %351 = vmatpush.msra.mxu0 %v4355_v1  ;;  %4084 = vmatpush.msra.mxu2 %v4355_v1  ;;  %v299_v9 = vld [vmem:[%s6119_s1 + $0x30] sm:$0xff]  ;;  %v298_v10 = vld [vmem:[%s6119_s1 + $0x28] sm:$0xff]  ;;  %v297_v11 = vld [vmem:[%s6119_s1 + $0x20] sm:$0xff]  ;;  %312 = vst.msk [vmem:[#allocation2 + $0x128] sm:$0xff] %vm310_vm0, %v4249_v38  ;;  %s3649_s27 = scalar_lea.sflag [#allocation4], %s283_s15  ;;  %s4189_s19 = scalar_lea.hbm %s6125_s7, 512 }
  0x18   : > { %536 = vmatpush.msra.mxu1 %v4355_v1  ;;  %v296_v12 = vld [vmem:[%s6119_s1 + $0x18] sm:$0xff]  ;;  %s4081_s16 = sshll.u32 %s287_s30, 8  ;;  %v295_v13 = vld [vmem:[%s6119_s1 + $0x10] sm:$0xff]  ;;  %v294_v14 = vld [vmem:[%s6119_s1 + $0x8] sm:$0xff]  ;;  %566 = vst.msk [vmem:[#allocation2 + $0x10] sm:$0xff] %vm310_vm0, %v4249_v38  ;;  %vm642_vm1 = vcmp.eq.s32.totalorder %v4475_v43, 0  ;;  %s3663_s30 = scalar_lea.hbm %s6125_s7, %s4082_s20 }
  0x19   : > { %352 = vmatpush.msra.mxu0 %v4362_v2  ;;  %4085 = vmatpush.msra.mxu2 %v4362_v2  ;;  %s4422_s23 = scalar_lea.vmem %s6118_s0, %s4081_s16  ;;  %v293_v15 = vld [vmem:[%s6119_s1] sm:$0xff]  ;;  %v715_v34 = vld [vmem:[%s6121_s3 + $0x38] sm:$0xff]  ;;  %v714_v36 = vld [vmem:[%s6121_s3 + $0x30] sm:$0xff]  ;;  %605 = vst.msk [vmem:[#allocation2 + $0x118] sm:$0xff] %vm310_vm0, %v4249_v38  ;;  %s3751_s16 = sshll.u32 %s283_s15, 8 }
  0x1a   : > { %537 = vmatpush.msra.mxu1 %v4362_v2  ;;  %v315_v16 = vld [vmem:[%s4422_s23] sm:$0xff]  ;;  %v316_v17 = vld [vmem:[%s4422_s23 + $0x8] sm:$0xff]  ;;  %v317_v18 = vld [vmem:[%s4422_s23 + $0x10] sm:$0xff]  ;;  %4099 = vmatpush.msra.mxu3 %v715_v34  ;;  %606 = vst.msk [vmem:[#allocation2 + $0x120] sm:$0xff] %vm310_vm0, %v4249_v38  ;;  %s5912_s17 = scalar_lea.vmem [#allocation3], %s3751_s16  ;;  %s3666_s10 = sshll.u32 %s3663_s30, 4  ;;  %s3667_s10 = int_to_ptr.hbm [resolvable:$true] %s3666_s10 }
  0x1b   : > { %353 = vmatpush.msra.mxu0 %v4370_v3  ;;  %4086 = vmatpush.msra.mxu2 %v4370_v3  ;;  %v340_v19 = vld [vmem:[%s4422_s23 + $0xc8] sm:$0xff]  ;;  %v318_v20 = vld [vmem:[%s4422_s23 + $0x18] sm:$0xff]  ;;  %v341_v21 = vld [vmem:[%s4422_s23 + $0xd0] sm:$0xff]  ;;  %6132 = vst [vmem:[#allocation6_spill] sm:$0xff] %v4475_v43  ;;  %s3664_s8 = sshll.u32 %s5912_s17, 4  ;;  %s4183_s12 = sshra.s32 %s3667_s10, 4  ;;  %s3665_s8 = int_to_ptr.vmem [resolvable:$true] %s3664_s8  ;;  %s4184_s12 = int_to_ptr.hbm [resolvable:$true] %s4183_s12 }
  0x1c   : > { %538 = vmatpush.msra.mxu1 %v4370_v3  ;;  %v319_v22 = vld [vmem:[%s4422_s23 + $0x20] sm:$0xff]  ;;  %v342_v23 = vld [vmem:[%s4422_s23 + $0xd8] sm:$0xff]  ;;  %v320_v24 = vld [vmem:[%s4422_s23 + $0x28] sm:$0xff]  ;;  %4100 = vmatpush.msra.mxu3 %v714_v36  ;;  %s4185_s16 = scalar_lea.hbm %s4184_s12, 256  ;;  %p4190_p1 = scmp.lt.s32.totalorder %s4184_s12, %s6125_s7 }
  0x1d   : > { %354 = vmatpush.msra.mxu0 %v4378_v4  ;;  %4087 = vmatpush.msra.mxu2 %v4378_v4  ;;  %v343_v25 = vld [vmem:[%s4422_s23 + $0xe0] sm:$0xff]  ;;  %v321_v26 = vld [vmem:[%s4422_s23 + $0x30] sm:$0xff]  ;;  %v344_v27 = vld [vmem:[%s4422_s23 + $0xe8] sm:$0xff]  ;;  %p4186_p12 = scmp.ne.s32.totalorder %s4184_s12, %s4185_s16  ;;  %p4191_p2 = scmp.lt.s32.totalorder %s4189_s19, %s4185_s16 }
  0x1e   : > { %539 = vmatpush.msra.mxu1 %v4378_v4  ;;  %v322_v28 = vld [vmem:[%s4422_s23 + $0x38] sm:$0xff]  ;;  %v345_v29 = vld [vmem:[%s4422_s23 + $0xf0] sm:$0xff]  ;;  %v323_v30 = vld [vmem:[%s4422_s23 + $0x40] sm:$0xff] }
  0x1f   : > { %355 = vmatpush.msra.mxu0 %v303_v5  ;;  %4088 = vmatpush.msra.mxu2 %v303_v5  ;;  %v346_v31 = vld [vmem:[%s4422_s23 + $0xf8] sm:$0xff]  ;;  %v324_v32 = vld [vmem:[%s4422_s23 + $0x48] sm:$0xff]  ;;  %v325_v33 = vld [vmem:[%s4422_s23 + $0x50] sm:$0xff]  ;;  %p4187_p13 = pnand %p4186_p12, %p4332_p4  ;;  %p4192_p3 = por %p4191_p2, %p4190_p1 }
  0x20   : > { %540 = vmatpush.msra.mxu1 %v303_v5  ;;  %v679_v35 = vld [vmem:[%s6121_s3 + $0x18] sm:$0xff]  ;;  %v678_v37 = vld [vmem:[%s6121_s3 + $0x10] sm:$0xff]  ;;  %v713_v39 = vld [vmem:[%s6121_s3 + $0x28] sm:$0xff] }
  0x21   : > { %356 = vmatpush.msra.mxu0 %v302_v6  ;;  %4089 = vmatpush.msra.mxu2 %v302_v6  ;;  %v326_v40 = vld [vmem:[%s4422_s23 + $0x58] sm:$0xff]  ;;  %v677_v42 = vld [vmem:[%s6121_s3 + $0x8] sm:$0xff]  ;;  %v712_v44 = vld [vmem:[%s6121_s3 + $0x20] sm:$0xff]  ;;  %p4188_p0 = pneg %p4187_p13 }
  0x22   : > { %541 = vmatpush.msra.mxu1 %v302_v6  ;;  %4101 = vmatpush.msra.mxu3 %v713_v39  ;;  %v676_v45 = vld [vmem:[%s6121_s3] sm:$0xff]  ;;  %v680_v46 = vld [vmem:[#allocation2 + $0x8] sm:$0xff]  ;;  %v681_v50 = vld [vmem:[#allocation2 + $0x10] sm:$0xff] }
  0x23   : > { %357 = vmatpush.msra.mxu0 %v301_v7  ;;  %4090 = vmatpush.msra.mxu2 %v301_v7  ;;  %v610_v47 = vld [vmem:[#allocation2 + $0x7] sm:$0xff]  ;;  %v611_v51 = vld [vmem:[#allocation2 + $0xf] sm:$0xff]  ;;  %v330_v54 = vld [vmem:[%s4422_s23 + $0x78] sm:$0xff]  ;;  %p4193_p5 = pnand %p4192_p3, %p4188_p0 }
  0x24   : > { %542 = vmatpush.msra.mxu1 %v301_v7  ;;  %4102 = vmatpush.msra.mxu3 %v712_v44  ;;  %v644_v48 = vsel %vm642_vm1, 0.0, %v610_v47  ;;  %v327_v49 = vld [vmem:[%s4422_s23 + $0x60] sm:$0xff]  ;;  %v328_v52 = vld [vmem:[%s4422_s23 + $0x68] sm:$0xff]  ;;  %v329_v53 = vld [vmem:[%s4422_s23 + $0x70] sm:$0xff] }
  0x25   : > { %358 = vmatpush.msra.mxu0 %v300_v8  ;;  %4091 = vmatpush.msra.mxu2 %v300_v8  ;;  %v4497_v55 = vld [vmem:[%s6120_s2] ss:$0 sm:$0xff]  ;;  %v1512_v61 = vld [vmem:[%s6121_s3 + $0x78] sm:$0xff]  ;;  %v332_v63 = vld [vmem:[%s4422_s23 + $0x88] sm:$0xff] }
  0x26   : > { %543 = vmatpush.msra.mxu1 %v300_v8  ;;  %v331_v57 = vld [vmem:[%s4422_s23 + $0x80] sm:$0xff]  ;;  %1621 = vmatpush.msrb.mxu3 %v1512_v61  ;;  %v337_v47 = vld [vmem:[%s4422_s23 + $0xb0] sm:$0xff] }
  0x27   : > { %359 = vmatpush.msra.mxu0 %v299_v9  ;;  %4092 = vmatpush.msra.mxu2 %v299_v9  ;;  %v1786_v38 = vld [vmem:[%s6121_s3 + $0x80] sm:$0xff] }
  0x28   : > { %544 = vmatpush.msra.mxu1 %v299_v9 }
  0x29   : > { %360 = vmatpush.msra.mxu0 %v298_v10  ;;  %4093 = vmatpush.msra.mxu2 %v298_v10 }
  0x2a   : > { %545 = vmatpush.msra.mxu1 %v298_v10 }
  0x2b   : > { %361 = vmatpush.msra.mxu0 %v297_v11  ;;  %4094 = vmatpush.msra.mxu2 %v297_v11 }
  0x2c   : > { %546 = vmatpush.msra.mxu1 %v297_v11 }
  0x2d   : > { %362 = vmatpush.msra.mxu0 %v296_v12  ;;  %4095 = vmatpush.msra.mxu2 %v296_v12 }
  0x2e   : > { %547 = vmatpush.msra.mxu1 %v296_v12 }
  0x2f   : > { %363 = vmatpush.msra.mxu0 %v295_v13  ;;  %4096 = vmatpush.msra.mxu2 %v295_v13 }
  0x30   : > { %548 = vmatpush.msra.mxu1 %v295_v13 }
  0x31   : > { %364 = vmatpush.msra.mxu0 %v294_v14  ;;  %4097 = vmatpush.msra.mxu2 %v294_v14 }
  0x32   : > { %549 = vmatpush.msra.mxu1 %v294_v14 }
  0x33   : > { %365 = vmatpush.msra.mxu0 %v293_v15  ;;  %4098 = vmatpush.msra.mxu2 %v293_v15 }
  0x34   : > { %366 = vmatmul.f32.vlgmr.msra.gmra.mxu0 %v315_v16  ;;  %550 = vmatpush.msra.mxu1 %v293_v15 }
  0x35   : > { %575 = vmatpush.msrb.mxu2 %v4350_v0  ;;  %551 = vmatmul.f32.vlgmr.msra.gmra.mxu1 %v315_v16 }
  0x36   : > { %441 = vmatmul.f32.vlgmr.msra.gmra.mxu2 %v340_v19  ;;  %1033 = vmatpush.msrb.mxu1 %v679_v35 }
  0x37   : > { %576 = vmatpush.msrb.mxu2 %v4355_v1 }
  0x38   : > { %1034 = vmatpush.msrb.mxu1 %v678_v37 }
  0x39   : > { %577 = vmatpush.msrb.mxu2 %v4362_v2 }
  0x3a   : > { %1035 = vmatpush.msrb.mxu1 %v677_v42 }
  0x3b   : > { %578 = vmatpush.msrb.mxu2 %v4370_v3 }
  0x3c   : > { %369 = vmatmul.f32.gmra.mxu0 %v316_v17  ;;  %1036 = vmatpush.msrb.mxu1 %v676_v45 }
  0x3d   : > { %579 = vmatpush.msrb.mxu2 %v4378_v4  ;;  %554 = vmatmul.f32.gmra.mxu1 %v316_v17 }
  0x3e   : > { %444 = vmatmul.f32.gmra.mxu2 %v341_v21 }
  0x3f   : > { %580 = vmatpush.msrb.mxu2 %v303_v5 }
  0x41   : > { %581 = vmatpush.msrb.mxu2 %v302_v6 }
  0x43   : > { %582 = vmatpush.msrb.mxu2 %v301_v7  ;;  %v333_v7 = vld [vmem:[%s4422_s23 + $0x90] sm:$0xff] }
  0x44   : > { %372 = vmatmul.f32.gmra.mxu0 %v317_v18 }
  0x45   : > { %583 = vmatpush.msrb.mxu2 %v300_v8  ;;  %3788 = vmatmul.msk.f32.vlgmr.msrb.gmra.mxu1 %vm310_vm0, %v644_v48 }
  0x46   : > { %447 = vmatmul.f32.gmra.mxu2 %v342_v23  ;;  %v335_v23 = vld [vmem:[%s4422_s23 + $0xa0] sm:$0xff] }
  0x47   : > { %584 = vmatpush.msrb.mxu2 %v299_v9 }
  0x49   : > { %585 = vmatpush.msrb.mxu2 %v298_v10 }
  0x4b   : > { %586 = vmatpush.msrb.mxu2 %v297_v11 }
  0x4c   : > { %375 = vmatmul.f32.gmra.mxu0 %v318_v20 }
  0x4d   : > { %587 = vmatpush.msrb.mxu2 %v296_v12  ;;  %3789 = vmatmul.msk.f32.gmra.mxu1 %vm310_vm0, %v611_v51 }
  0x4e   : > { %450 = vmatmul.f32.gmra.mxu2 %v343_v25 }
  0x4f   : > { %588 = vmatpush.msrb.mxu2 %v295_v13  ;;  %v334_v13 = vld [vmem:[%s4422_s23 + $0x98] sm:$0xff] }
  0x51   : > { %589 = vmatpush.msrb.mxu2 %v294_v14 }
  0x53   : > { %590 = vmatpush.msrb.mxu2 %v293_v15 }
  0x54   : > { %378 = vmatmul.f32.gmra.mxu0 %v319_v22 }
  0x55   : > { %824 = vmatpush.msra.mxu2 %v715_v34 }
  0x56   : > { %453 = vmatmul.f32.gmra.mxu2 %v344_v27  ;;  %v1789_v27 = vld [vmem:[%s6121_s3 + $0x98] sm:$0xff] }
  0x57   : > { %825 = vmatpush.msra.mxu2 %v714_v36  ;;  %1898 = vmatpush.msrb.mxu0 %v1789_v27 }
  0x59   : > { %826 = vmatpush.msra.mxu2 %v713_v39 }
  0x5b   : > { %827 = vmatpush.msra.mxu2 %v712_v44 }
  0x5c   : > { %381 = vmatmul.f32.gmra.mxu0 %v320_v24 }
  0x5e   : > { %456 = vmatmul.f32.gmra.mxu2 %v345_v29 }
  0x64   : > { %384 = vmatmul.f32.gmra.mxu0 %v321_v26 }
  0x66   : > { %459 = vmatmul.f32.gmra.mxu2 %v346_v31 }
  0x6c   : > { %387 = vmatmul.f32.gmra.mxu0 %v322_v28 }
  0x6e   : > { %591 = vmatmul.f32.vlgmr.msrb.gmra.mxu2 %v345_v29 }
  0x6f   : > { %4103 = vmatpush.msrb.mxu2 %v679_v35  ;;  %v336_v35 = vld [vmem:[%s4422_s23 + $0xa8] sm:$0xff] }
  0x71   : > { %4104 = vmatpush.msrb.mxu2 %v678_v37 }
  0x73   : > { %4105 = vmatpush.msrb.mxu2 %v677_v42 }
  0x74   : > { %390 = vmatmul.f32.gmra.mxu0 %v323_v30 }
  0x75   : > { %4106 = vmatpush.msrb.mxu2 %v676_v45 }
  0x76   : > { %594 = vmatmul.f32.gmra.mxu2 %v346_v31  ;;  %v1788_v31 = vld [vmem:[%s6121_s3 + $0x90] sm:$0xff] }
  0x77   : > { %1899 = vmatpush.msrb.mxu0 %v1788_v31 }
  0x7c   : > { %393 = vmatmul.f32.gmra.mxu0 %v324_v32 }
  0x7e   : > { %3756 = vmatmul.msk.f32.vlgmr.msra.gmra.mxu2 %vm310_vm0, %v680_v46 }
  0x84   : > { %396 = vmatmul.f32.gmra.mxu0 %v325_v33  ;;  %v1787_v33 = vld [vmem:[%s6121_s3 + $0x88] sm:$0xff] }
  0x85   : > { %1900 = vmatpush.msrb.mxu0 %v1787_v33 }
  0x86   : > { %3757 = vmatmul.msk.f32.gmra.mxu2 %vm310_vm0, %v681_v50 }
  0x87   : > { %1901 = vmatpush.msrb.mxu0 %v1786_v38 }
  0x8c   : > { %399 = vmatmul.f32.gmra.mxu0 %v326_v40 }
  0x94   : > { %402 = vmatmul.f32.gmra.mxu0 %v327_v49 }
  0x9c   : > { %405 = vmatmul.f32.gmra.mxu0 %v328_v52 }
  0xa4   : > { %408 = vmatmul.f32.gmra.mxu0 %v329_v53 }
  0xac   : > { %411 = vmatmul.f32.gmra.mxu0 %v330_v54 }
  0xb1   : > { %v367_v56 = vpop.f32.mrf.mxu0 }
  0xb2   : > { %v368_v58 = vadd.f32 %v4497_v55, %v367_v56  ;;  %v552_v59 = vpop.f32.mrf.mxu1 }
  0xb4   : > { %v463_v60 = vmax.f32 %v368_v58, 0.0  ;;  %414 = vmatmul.f32.gmra.mxu0 %v331_v57  ;;  %v338_v57 = vld [vmem:[%s4422_s23 + $0xb8] sm:$0xff] }
  0xb6   : > { %495 = vst.msk [vmem:[#allocation2 + $0x18] sm:$0xff] %vm310_vm0, %v463_v60 }
  0xb9   : > { %v370_v62 = vpop.f32.mrf.mxu0  ;;  %v442_v14 = vpop.f32.mrf.mxu2 }
  0xba   : > { %v371_v0 = vadd.f32 %v4497_v55, %v370_v62  ;;  %v555_v1 = vpop.f32.mrf.mxu1  ;;  %v443_v20 = vadd.f32 %v4497_v55, %v442_v14 }
  0xbb   : > { %v1511_v1 = vld [vmem:[%s6121_s3 + $0x70] sm:$0xff] }
  0xbc   : > { %v464_v2 = vmax.f32 %v371_v0, 0.0  ;;  %417 = vmatmul.f32.gmra.mxu0 %v332_v63  ;;  %v488_v21 = vmax.f32 %v443_v20, 0.0  ;;  %1622 = vmatpush.msrb.mxu3 %v1511_v1 }
  0xbd   : > { %v4507_v3 = vld [vmem:[#allocation2 + $0x18] sm:$0xff] }
  0xbe   : > { %v612_v4 = vld [vmem:[#allocation2 + $0x17] sm:$0xff]  ;;  %496 = vst.msk [vmem:[#allocation2 + $0x20] sm:$0xff] %vm310_vm0, %v464_v2  ;;  %3758 = vmatmul.msk.f32.gmra.mxu2 %vm310_vm0, %v4507_v3 }
  0xbf   : > { %v4514_v5 = vsel %vm642_vm1, 0.0, %v612_v4  ;;  %520 = vst.msk [vmem:[#allocation2 + $0xe0] sm:$0xff] %vm310_vm0, %v488_v21 }
  0xc0   : > { %3790 = vmatmul.msk.f32.gmra.mxu1 %vm310_vm0, %v4514_v5 }
  0xc1   : > { %v373_v6 = vpop.f32.mrf.mxu0  ;;  %v445_v24 = vpop.f32.mrf.mxu2 }
  0xc2   : > { %v374_v8 = vadd.f32 %v4497_v55, %v373_v6  ;;  %v446_v30 = vadd.f32 %v4497_v55, %v445_v24  ;;  %v339_v6 = vld [vmem:[%s4422_s23 + $0xc0] sm:$0xff] }
  0xc4   : > { %v465_v9 = vmax.f32 %v374_v8, 0.0  ;;  %420 = vmatmul.f32.gmra.mxu0 %v333_v7  ;;  %v489_v32 = vmax.f32 %v446_v30, 0.0 }
  0xc5   : > { %v4520_v10 = vld [vmem:[#allocation2 + $0x20] sm:$0xff] }
  0xc6   : > { %v4522_v11 = vld [vmem:[#allocation2 + $0x1f] sm:$0xff]  ;;  %497 = vst.msk [vmem:[#allocation2 + $0x28] sm:$0xff] %vm310_vm0, %v465_v9  ;;  %3759 = vmatmul.msk.f32.gmra.mxu2 %vm310_vm0, %v4520_v10 }
  0xc7   : > { %521 = vst.msk [vmem:[#allocation2 + $0xe8] sm:$0xff] %vm310_vm0, %v489_v32 }
  0xc8   : > { %3791 = vmatmul.msk.f32.gmra.mxu1 %vm310_vm0, %v4522_v11 }
  0xc9   : > { %v376_v12 = vpop.f32.mrf.mxu0  ;;  %v448_v36 = vpop.f32.mrf.mxu2 }
  0xca   : > { %v377_v15 = vadd.f32 %v4497_v55, %v376_v12  ;;  %v449_v44 = vadd.f32 %v4497_v55, %v448_v36 }
  0xcc   : > { %v466_v16 = vmax.f32 %v377_v15, 0.0  ;;  %423 = vmatmul.f32.gmra.mxu0 %v334_v13  ;;  %v490_v45 = vmax.f32 %v449_v44, 0.0 }
  0xcd   : > { %v4531_v17 = vld [vmem:[#allocation2 + $0x28] sm:$0xff] }
  0xce   : > { %v614_v18 = vld [vmem:[#allocation2 + $0x27] sm:$0xff]  ;;  %498 = vst.msk [vmem:[#allocation2 + $0x30] sm:$0xff] %vm310_vm0, %v466_v16  ;;  %3760 = vmatmul.msk.f32.vlgmr.msra.gmra.mxu3 %vm310_vm0, %v4531_v17 }
  0xcf   : > { %v4538_v19 = vsel %vm642_vm1, 0.0, %v614_v18  ;;  %522 = vst.msk [vmem:[#allocation2 + $0xf0] sm:$0xff] %vm310_vm0, %v490_v45 }
  0xd0   : > { %3792 = vmatmul.msk.f32.gmra.mxu1 %vm310_vm0, %v4538_v19 }
  0xd1   : > { %v379_v22 = vpop.f32.mrf.mxu0  ;;  %v451_v48 = vpop.f32.mrf.mxu2 }
  0xd2   : > { %v380_v25 = vadd.f32 %v4497_v55, %v379_v22  ;;  %v452_v53 = vadd.f32 %v4497_v55, %v451_v48 }
  0xd4   : > { %v467_v26 = vmax.f32 %v380_v25, 0.0  ;;  %426 = vmatmul.f32.gmra.mxu0 %v335_v23  ;;  %v491_v54 = vmax.f32 %v452_v53, 0.0 }
  0xd5   : > { %v4549_v28 = vld [vmem:[#allocation2 + $0x30] sm:$0xff] }
  0xd6   : > { %v4551_v29 = vld [vmem:[#allocation2 + $0x2f] sm:$0xff]  ;;  %499 = vst.msk [vmem:[#allocation2 + $0x38] sm:$0xff] %vm310_vm0, %v467_v26  ;;  %3761 = vmatmul.msk.f32.gmra.mxu3 %vm310_vm0, %v4549_v28 }
  0xd7   : > { %523 = vst.msk [vmem:[#allocation2 + $0xf8] sm:$0xff] %vm310_vm0, %v491_v54 }
  0xd8   : > { %3793 = vmatmul.msk.f32.gmra.mxu1 %vm310_vm0, %v4551_v29 }
  0xd9   : > { %v382_v34 = vpop.f32.mrf.mxu0  ;;  %v454_v58 = vpop.f32.mrf.mxu2 }
  0xda   : > { %v383_v37 = vadd.f32 %v4497_v55, %v382_v34  ;;  %v455_v0 = vadd.f32 %v4497_v55, %v454_v58 }
  0xdc   : > { %v468_v39 = vmax.f32 %v383_v37, 0.0  ;;  %429 = vmatmul.f32.gmra.mxu0 %v336_v35  ;;  %v492_v2 = vmax.f32 %v455_v0, 0.0 }
  0xdd   : > { %v4571_v40 = vld [vmem:[#allocation2 + $0x38] sm:$0xff] }
  0xde   : > { %v616_v41 = vld [vmem:[#allocation2 + $0x37] sm:$0xff]  ;;  %500 = vst.msk [vmem:[#allocation2 + $0x40] sm:$0xff] %vm310_vm0, %v468_v39  ;;  %3762 = vmatmul.msk.f32.gmra.mxu3 %vm310_vm0, %v4571_v40 }
  0xdf   : > { %v4578_v42 = vsel %vm642_vm1, 0.0, %v616_v41  ;;  %524 = vst.msk [vmem:[#allocation2 + $0x100] sm:$0xff] %vm310_vm0, %v492_v2 }
  0xe0   : > { %3794 = vmatmul.msk.f32.gmra.mxu1 %vm310_vm0, %v4578_v42 }
  0xe1   : > { %v385_v46 = vpop.f32.mrf.mxu0  ;;  %v457_v7 = vpop.f32.mrf.mxu2 }
  0xe2   : > { %v386_v49 = vadd.f32 %v4497_v55, %v385_v46  ;;  %v458_v14 = vadd.f32 %v4497_v55, %v457_v7 }
  0xe4   : > { %v469_v50 = vmax.f32 %v386_v49, 0.0  ;;  %432 = vmatmul.f32.gmra.mxu0 %v337_v47  ;;  %v493_v15 = vmax.f32 %v458_v14, 0.0 }
  0xe5   : > { %v4586_v51 = vld [vmem:[#allocation2 + $0x40] sm:$0xff] }
  0xe6   : > { %v4588_v52 = vld [vmem:[#allocation2 + $0x3f] sm:$0xff]  ;;  %501 = vst.msk [vmem:[#allocation2 + $0x48] sm:$0xff] %vm310_vm0, %v469_v50  ;;  %3763 = vmatmul.msk.f32.gmra.mxu3 %vm310_vm0, %v4586_v51 }
  0xe7   : > { %525 = vst.msk [vmem:[#allocation2 + $0x108] sm:$0xff] %vm310_vm0, %v493_v15 }
  0xe8   : > { %3795 = vmatmul.msk.f32.gmra.mxu1 %vm310_vm0, %v4588_v52 }
  0xe9   : > { %v388_v56 = vpop.f32.mrf.mxu0  ;;  %v460_v18 = vpop.f32.mrf.mxu2 }
  0xea   : > { %v389_v59 = vadd.f32 %v4497_v55, %v388_v56  ;;  %v461_v25 = vadd.f32 %v4497_v55, %v460_v18 }
  0xec   : > { %v470_v60 = vmax.f32 %v389_v59, 0.0  ;;  %435 = vmatmul.f32.gmra.mxu0 %v338_v57  ;;  %v494_v26 = vmax.f32 %v461_v25, 0.0  ;;  %v1510_v59 = vld [vmem:[%s6121_s3 + $0x68] sm:$0xff]  ;;  %v2098_v25 = vld [vmem:[%s6121_s3 + $0xb8] sm:$0xff] }
  0xed   : > { %v4599_v61 = vld [vmem:[#allocation2 + $0x48] sm:$0xff]  ;;  %1623 = vmatpush.msrb.mxu3 %v1510_v59  ;;  %2207 = vmatpush.msra.mxu1 %v2098_v25 }
  0xee   : > { %v618_v62 = vld [vmem:[#allocation2 + $0x47] sm:$0xff]  ;;  %502 = vst.msk [vmem:[#allocation2 + $0x50] sm:$0xff] %vm310_vm0, %v470_v60  ;;  %3764 = vmatmul.msk.f32.gmra.mxu3 %vm310_vm0, %v4599_v61  ;;  %v4711_v60 = vpop.f32.mrf.mxu1 }
  0xef   : > { %v4606_v63 = vsel %vm642_vm1, 0.0, %v618_v62  ;;  %526 = vst.msk [vmem:[#allocation2 + $0x110] sm:$0xff] %vm310_vm0, %v494_v26  ;;  %v2097_v26 = vld [vmem:[%s6121_s3 + $0xb0] sm:$0xff] }
  0xf0   : > { %3796 = vmatmul.msk.f32.gmra.mxu1 %vm310_vm0, %v4606_v63 }
  0xf1   : > { %v391_v4 = vpop.f32.mrf.mxu0  ;;  %2208 = vmatpush.msra.mxu1 %v2097_v26 }
  0xf2   : > { %v392_v8 = vadd.f32 %v4497_v55, %v391_v4 }
  0xf4   : > { %v471_v9 = vmax.f32 %v392_v8, 0.0  ;;  %438 = vmatmul.f32.gmra.mxu0 %v339_v6 }
  0xf5   : > { %v4617_v12 = vld [vmem:[#allocation2 + $0x50] sm:$0xff] }
  0xf6   : > { %v4619_v13 = vld [vmem:[#allocation2 + $0x4f] sm:$0xff]  ;;  %503 = vst.msk [vmem:[#allocation2 + $0x58] sm:$0xff] %vm310_vm0, %v471_v9  ;;  %3765 = vmatmul.msk.f32.gmra.mxu3 %vm310_vm0, %v4617_v12  ;;  %v4728_v8 = vpop.f32.mrf.mxu1 }
  0xf8   : > { %3797 = vmatmul.msk.f32.gmra.mxu1 %vm310_vm0, %v4619_v13 }
  0xf9   : > { %v394_v16 = vpop.f32.mrf.mxu0 }
  0xfa   : > { %v395_v20 = vadd.f32 %v4497_v55, %v394_v16 }
  0xfc   : > { %v472_v21 = vmax.f32 %v395_v20, 0.0  ;;  %3884 = vmatmul.msk.f32.vlgmr.msrb.gmra.mxu0 %vm310_vm0, %v4507_v3  ;;  %v592_v3 = vpop.f32.mrf.mxu2 }
  0xfd   : > { %v4631_v22 = vld [vmem:[#allocation2 + $0x58] sm:$0xff]  ;;  %v2096_v3 = vld [vmem:[%s6121_s3 + $0xa8] sm:$0xff] }
  0xfe   : > { %v620_v23 = vld [vmem:[#allocation2 + $0x57] sm:$0xff]  ;;  %504 = vst.msk [vmem:[#allocation2 + $0x60] sm:$0xff] %vm310_vm0, %v472_v21  ;;  %3766 = vmatmul.msk.f32.gmra.mxu3 %vm310_vm0, %v4631_v22  ;;  %2209 = vmatpush.msra.mxu1 %v2096_v3 }
  0xff   : > { %v4638_v24 = vsel %vm642_vm1, 0.0, %v620_v23 }
 0x100   : > { %3798 = vmatmul.msk.f32.gmra.mxu1 %vm310_vm0, %v4638_v24 }
 0x101   : > { %v397_v27 = vpop.f32.mrf.mxu0 }
 0x102   : > { %v398_v30 = vadd.f32 %v4497_v55, %v397_v27 }
 0x104   : > { %v473_v31 = vmax.f32 %v398_v30, 0.0  ;;  %3885 = vmatmul.msk.f32.gmra.mxu0 %vm310_vm0, %v4520_v10  ;;  %v595_v35 = vpop.f32.mrf.mxu2 }
 0x105   : > { %v4647_v32 = vld [vmem:[#allocation2 + $0x60] sm:$0xff] }
 0x106   : > { %v4649_v33 = vld [vmem:[#allocation2 + $0x5f] sm:$0xff]  ;;  %505 = vst.msk [vmem:[#allocation2 + $0x68] sm:$0xff] %vm310_vm0, %v473_v31  ;;  %3767 = vmatmul.msk.f32.gmra.mxu3 %vm310_vm0, %v4647_v32 }
 0x108   : > { %3799 = vmatmul.msk.f32.gmra.mxu1 %vm310_vm0, %v4649_v33 }
 0x109   : > { %v400_v34 = vpop.f32.mrf.mxu0 }
 0x10a   : > { %v401_v36 = vadd.f32 %v4497_v55, %v400_v34 }
 0x10c   : > { %v474_v37 = vmax.f32 %v401_v36, 0.0  ;;  %3886 = vmatmul.msk.f32.gmra.mxu0 %vm310_vm0, %v4531_v17  ;;  %v2095_v36 = vld [vmem:[%s6121_s3 + $0xa0] sm:$0xff] }
 0x10d   : > { %v4659_v10 = vld [vmem:[#allocation2 + $0x68] sm:$0xff]  ;;  %2210 = vmatpush.msra.mxu1 %v2095_v36 }
 0x10e   : > { %v622_v38 = vld [vmem:[#allocation2 + $0x67] sm:$0xff]  ;;  %506 = vst.msk [vmem:[#allocation2 + $0x70] sm:$0xff] %vm310_vm0, %v474_v37  ;;  %3768 = vmatmul.msk.f32.gmra.mxu3 %vm310_vm0, %v4659_v10  ;;  %v1203_v37 = vld [vmem:[%s6121_s3 + $0x58] sm:$0xff] }
 0x10f   : > { %v4666_v39 = vsel %vm642_vm1, 0.0, %v622_v38  ;;  %1312 = vmatpush.msra.mxu2 %v1203_v37  ;;  %v4850_v37 = vld [vmem:[#allocation2 + $0x19] sm:$0xff] }
 0x110   : > { %3800 = vmatmul.msk.f32.gmra.mxu1 %vm310_vm0, %v4666_v39 }
 0x111   : > { %v403_v41 = vpop.f32.mrf.mxu0 }
 0x112   : > { %v404_v44 = vadd.f32 %v4497_v55, %v403_v41 }
 0x114   : > { %v475_v45 = vmax.f32 %v404_v44, 0.0  ;;  %3887 = vmatmul.msk.f32.gmra.mxu0 %vm310_vm0, %v4549_v28 }
 0x115   : > { %v4673_v17 = vld [vmem:[#allocation2 + $0x70] sm:$0xff] }
 0x116   : > { %v4675_v46 = vld [vmem:[#allocation2 + $0x6f] sm:$0xff]  ;;  %507 = vst.msk [vmem:[#allocation2 + $0x78] sm:$0xff] %vm310_vm0, %v475_v45  ;;  %3769 = vmatmul.msk.f32.gmra.mxu3 %vm310_vm0, %v4673_v17 }
 0x118   : > { %3801 = vmatmul.msk.f32.gmra.mxu1 %vm310_vm0, %v4675_v46 }
 0x119   : > { %v406_v47 = vpop.f32.mrf.mxu0 }
 0x11a   : > { %v407_v48 = vadd.f32 %v4497_v55, %v406_v47 }
 0x11c   : > { %v476_v49 = vmax.f32 %v407_v48, 0.0  ;;  %3888 = vmatmul.msk.f32.gmra.mxu0 %vm310_vm0, %v4571_v40 }
 0x11d   : > { %v4685_v28 = vld [vmem:[#allocation2 + $0x78] sm:$0xff] }
 0x11e   : > { %v624_v50 = vld [vmem:[#allocation2 + $0x77] sm:$0xff]  ;;  %508 = vst.msk [vmem:[#allocation2 + $0x80] sm:$0xff] %vm310_vm0, %v476_v49  ;;  %3770 = vmatmul.msk.f32.gmra.mxu3 %vm310_vm0, %v4685_v28 }
 0x11f   : > { %v4692_v53 = vsel %vm642_vm1, 0.0, %v624_v50 }
 0x120   : > { %3802 = vmatmul.msk.f32.gmra.mxu1 %vm310_vm0, %v4692_v53 }
 0x121   : > { %v409_v54 = vpop.f32.mrf.mxu0 }
 0x122   : > { %v410_v56 = vadd.f32 %v4497_v55, %v409_v54 }
 0x124   : > { %v477_v57 = vmax.f32 %v410_v56, 0.0  ;;  %3889 = vmatmul.msk.f32.gmra.mxu0 %vm310_vm0, %v4586_v51 }
 0x125   : > { %v4699_v40 = vld [vmem:[#allocation2 + $0x80] sm:$0xff] }
 0x126   : > { %v4701_v58 = vld [vmem:[#allocation2 + $0x7f] sm:$0xff]  ;;  %509 = vst.msk [vmem:[#allocation2 + $0x88] sm:$0xff] %vm310_vm0, %v477_v57  ;;  %3771 = vmatmul.msk.f32.gmra.mxu3 %vm310_vm0, %v4699_v40 }
 0x128   : > { %3803 = vmatmul.msk.f32.gmra.mxu1 %vm310_vm0, %v4701_v58 }
 0x129   : > { %v412_v51 = vpop.f32.mrf.mxu0 }
 0x12a   : > { %v413_v62 = vadd.f32 %v4497_v55, %v412_v51 }
 0x12c   : > { %v478_v0 = vmax.f32 %v413_v62, 0.0  ;;  %3890 = vmatmul.msk.f32.gmra.mxu0 %vm310_vm0, %v4599_v61 }
 0x12d   : > { %v4716_v1 = vld [vmem:[#allocation2 + $0x88] sm:$0xff] }
 0x12e   : > { %v626_v2 = vld [vmem:[#allocation2 + $0x87] sm:$0xff]  ;;  %510 = vst.msk [vmem:[#allocation2 + $0x90] sm:$0xff] %vm310_vm0, %v478_v0  ;;  %3772 = vmatmul.msk.f32.gmra.mxu3 %vm310_vm0, %v4716_v1 }
 0x12f   : > { %v4723_v4 = vsel %vm642_vm1, 0.0, %v626_v2 }
 0x130   : > { %3804 = vmatmul.msk.f32.gmra.mxu1 %vm310_vm0, %v4723_v4 }
 0x131   : > { %v415_v6 = vpop.f32.mrf.mxu0 }
 0x132   : > { %v416_v7 = vadd.f32 %v4497_v55, %v415_v6 }
 0x134   : > { %v479_v61 = vmax.f32 %v416_v7, 0.0  ;;  %3891 = vmatmul.msk.f32.gmra.mxu0 %vm310_vm0, %v4617_v12  ;;  %v1509_v7 = vld [vmem:[%s6121_s3 + $0x60] sm:$0xff] }
 0x135   : > { %v4732_v9 = vld [vmem:[#allocation2 + $0x90] sm:$0xff]  ;;  %1624 = vmatpush.msrb.mxu3 %v1509_v7 }
 0x136   : > { %v4734_v14 = vld [vmem:[#allocation2 + $0x8f] sm:$0xff]  ;;  %511 = vst.msk [vmem:[#allocation2 + $0x98] sm:$0xff] %vm310_vm0, %v479_v61  ;;  %3773 = vmatmul.msk.f32.gmra.mxu3 %vm310_vm0, %v4732_v9 }
 0x138   : > { %3805 = vmatmul.msk.f32.gmra.mxu1 %vm310_vm0, %v4734_v14 }
 0x139   : > { %v418_v15 = vpop.f32.mrf.mxu0 }
 0x13a   : > { %v419_v16 = vadd.f32 %v4497_v55, %v418_v15 }
 0x13c   : > { %v480_v18 = vmax.f32 %v419_v16, 0.0  ;;  %3892 = vmatmul.msk.f32.gmra.mxu0 %vm310_vm0, %v4631_v22 }
 0x13d   : > { %v4742_v20 = vpop.f32.mrf.mxu1  ;;  %v4746_v12 = vld [vmem:[#allocation2 + $0x98] sm:$0xff] }
 0x13e   : > { %v628_v21 = vld [vmem:[#allocation2 + $0x97] sm:$0xff]  ;;  %512 = vst.msk [vmem:[#allocation2 + $0xa0] sm:$0xff] %vm310_vm0, %v480_v18  ;;  %3774 = vmatmul.msk.f32.gmra.mxu3 %vm310_vm0, %v4746_v12 }
 0x13f   : > { %v4753_v23 = vsel %vm642_vm1, 0.0, %v628_v21 }
 0x140   : > { %3806 = vmatmul.msk.f32.gmra.mxu1 %vm310_vm0, %v4753_v23 }
 0x141   : > { %v421_v22 = vpop.f32.mrf.mxu0 }
 0x142   : > { %v422_v27 = vadd.f32 %v4497_v55, %v421_v22 }
 0x144   : > { %v481_v30 = vmax.f32 %v422_v27, 0.0  ;;  %3893 = vmatmul.msk.f32.gmra.mxu0 %vm310_vm0, %v4647_v32 }
 0x145   : > { %v4767_v31 = vpop.f32.mrf.mxu1  ;;  %v4771_v34 = vld [vmem:[#allocation2 + $0xa0] sm:$0xff] }
 0x146   : > { %v4773_v35 = vld [vmem:[#allocation2 + $0x9f] sm:$0xff]  ;;  %513 = vst.msk [vmem:[#allocation2 + $0xa8] sm:$0xff] %vm310_vm0, %v481_v30  ;;  %3775 = vmatmul.msk.f32.gmra.mxu3 %vm310_vm0, %v4771_v34 }
 0x148   : > { %3807 = vmatmul.msk.f32.gmra.mxu1 %vm310_vm0, %v4773_v35 }
 0x149   : > { %v424_v32 = vpop.f32.mrf.mxu0 }
 0x14a   : > { %v425_v38 = vadd.f32 %v4497_v55, %v424_v32 }
 0x14c   : > { %v482_v41 = vmax.f32 %v425_v38, 0.0  ;;  %3894 = vmatmul.msk.f32.gmra.mxu0 %vm310_vm0, %v4659_v10 }
 0x14d   : > { %v1050_v44 = vpop.f32.mrf.mxu1  ;;  %v4789_v45 = vld [vmem:[#allocation2 + $0xa8] sm:$0xff] }
 0x14e   : > { %v630_v47 = vld [vmem:[#allocation2 + $0xa7] sm:$0xff]  ;;  %514 = vst.msk [vmem:[#allocation2 + $0xb0] sm:$0xff] %vm310_vm0, %v482_v41  ;;  %3776 = vmatmul.msk.f32.gmra.mxu3 %vm310_vm0, %v4789_v45 }
 0x14f   : > { %v4796_v48 = vsel %vm642_vm1, 0.0, %v630_v47  ;;  %v1201_v47 = vld [vmem:[%s6121_s3 + $0x48] sm:$0xff] }
 0x150   : > { %3808 = vmatmul.msk.f32.gmra.mxu1 %vm310_vm0, %v4796_v48 }
 0x151   : > { %v427_v49 = vpop.f32.mrf.mxu0  ;;  %v841_v50 = vpop.f32.mrf.mxu3 }
 0x152   : > { %v428_v54 = vadd.f32 %v4497_v55, %v427_v49  ;;  %v4801_v10 = vadd.f32 %v1050_v44, %v841_v50  ;;  %v2032_v49 = vld [vmem:[#allocation2 + $0x21] sm:$0xff] }
 0x154   : > { %v483_v56 = vmax.f32 %v428_v54, 0.0  ;;  %3895 = vmatmul.msk.f32.gmra.mxu0 %vm310_vm0, %v4673_v17  ;;  %v1202_v17 = vld [vmem:[%s6121_s3 + $0x50] sm:$0xff] }
 0x155   : > { %v1053_v57 = vpop.f32.mrf.mxu1  ;;  %v4805_v59 = vld [vmem:[#allocation2 + $0xb0] sm:$0xff]  ;;  %1313 = vmatpush.msra.mxu2 %v1202_v17 }
 0x156   : > { %v4807_v51 = vld [vmem:[#allocation2 + $0xaf] sm:$0xff]  ;;  %515 = vst.msk [vmem:[#allocation2 + $0xb8] sm:$0xff] %vm310_vm0, %v483_v56  ;;  %3777 = vmatmul.msk.f32.gmra.mxu3 %vm310_vm0, %v4805_v59 }
 0x157   : > { %1314 = vmatpush.msra.mxu2 %v1201_v47 }
 0x158   : > { %3809 = vmatmul.msk.f32.gmra.mxu1 %vm310_vm0, %v4807_v51 }
 0x159   : > { %v430_v62 = vpop.f32.mrf.mxu0  ;;  %v844_v0 = vpop.f32.mrf.mxu3 }
 0x15a   : > { %v431_v2 = vadd.f32 %v4497_v55, %v430_v62  ;;  %v4815_v6 = vadd.f32 %v1053_v57, %v844_v0 }
 0x15c   : > { %v484_v61 = vmax.f32 %v431_v2, 0.0  ;;  %3896 = vmatmul.msk.f32.gmra.mxu0 %vm310_vm0, %v4685_v28 }
 0x15d   : > { %v1056_v15 = vpop.f32.mrf.mxu1  ;;  %v4825_v16 = vld [vmem:[#allocation2 + $0xb8] sm:$0xff] }
 0x15e   : > { %v632_v18 = vld [vmem:[#allocation2 + $0xb7] sm:$0xff]  ;;  %516 = vst.msk [vmem:[#allocation2 + $0xc0] sm:$0xff] %vm310_vm0, %v484_v61  ;;  %3778 = vmatmul.msk.f32.gmra.mxu3 %vm310_vm0, %v4825_v16 }
 0x15f   : > { %v4832_v21 = vsel %vm642_vm1, 0.0, %v632_v18 }
 0x160   : > { %3810 = vmatmul.msk.f32.gmra.mxu1 %vm310_vm0, %v4832_v21 }
 0x161   : > { %v433_v25 = vpop.f32.mrf.mxu0  ;;  %v847_v22 = vpop.f32.mrf.mxu3 }
 0x162   : > { %v434_v26 = vadd.f32 %v4497_v55, %v433_v25  ;;  %v4837_v28 = vadd.f32 %v1056_v15, %v847_v22  ;;  %v4895_v22 = vld [vmem:[#allocation2 + $0x29] sm:$0xff] }
 0x164   : > { %v485_v27 = vmax.f32 %v434_v26, 0.0  ;;  %3897 = vmatmul.msk.f32.gmra.mxu0 %vm310_vm0, %v4699_v40  ;;  %v4855_v40 = vadd.s32 8, %v4475_v43 }
 0x165   : > { %v1059_v3 = vpop.f32.mrf.mxu1  ;;  %v4841_v30 = vld [vmem:[#allocation2 + $0xc0] sm:$0xff] }
 0x166   : > { %v4843_v36 = vld [vmem:[#allocation2 + $0xbf] sm:$0xff]  ;;  %517 = vst.msk [vmem:[#allocation2 + $0xc8] sm:$0xff] %vm310_vm0, %v485_v27  ;;  %3779 = vmatmul.msk.f32.gmra.mxu3 %vm310_vm0, %v4841_v30  ;;  %vm1167_vm2 = vcmp.eq.s32.totalorder %v4855_v40, 15  ;;  %v2034_v27 = vld [vmem:[#allocation2 + $0x31] sm:$0xff] }
 0x167   : > { %3811 = vmatmul.msk.f32.vlgmr.msrb.gmra.mxu2 %vm310_vm0, %v4843_v36  ;;  %v4877_v0 = vsel %vm1167_vm2, 0.0, %v2032_v49  ;;  %v4920_v49 = vsel %vm1167_vm2, 0.0, %v2034_v27  ;;  %v4948_v27 = vld [vmem:[#allocation2 + $0xe8] sm:$0xff] }
 0x168   : > { %3916 = vmatmul.msk.f32.vlgmr.msra.gmra.mxu1 %vm310_vm0, %v4850_v37 }
 0x169   : > { %v436_v32 = vpop.f32.mrf.mxu0  ;;  %v850_v38 = vpop.f32.mrf.mxu3 }
 0x16a   : > { %v437_v41 = vadd.f32 %v4497_v55, %v436_v32  ;;  %v4858_v44 = vadd.f32 %v1059_v3, %v850_v38  ;;  %v1200_v32 = vld [vmem:[%s6121_s3 + $0x40] sm:$0xff] }
 0x16b   : > { %1315 = vmatpush.msra.mxu2 %v1200_v32 }
 0x16c   : > { %v486_v50 = vmax.f32 %v437_v41, 0.0  ;;  %3898 = vmatmul.msk.f32.gmra.mxu0 %vm310_vm0, %v4716_v1 }
 0x16d   : > { %v1062_v54 = vpop.f32.mrf.mxu1  ;;  %v4865_v56 = vld [vmem:[#allocation2 + $0xc8] sm:$0xff] }
 0x16e   : > { %v634_v57 = vld [vmem:[#allocation2 + $0xc7] sm:$0xff]  ;;  %518 = vst.msk [vmem:[#allocation2 + $0xd0] sm:$0xff] %vm310_vm0, %v486_v50  ;;  %3780 = vmatmul.msk.f32.gmra.mxu3 %vm310_vm0, %v4865_v56 }
 0x16f   : > { %v4873_v62 = vsel %vm642_vm1, 0.0, %v634_v57  ;;  %v4930_v57 = vld [vmem:[#allocation2 + $0xe0] sm:$0xff] }
 0x170   : > { %3812 = vmatmul.msk.f32.gmra.mxu2 %vm310_vm0, %v4873_v62  ;;  %3917 = vmatmul.msk.f32.gmra.mxu1 %vm310_vm0, %v4877_v0 }
 0x171   : > { %v439_v1 = vpop.f32.mrf.mxu0  ;;  %v853_v2 = vpop.f32.mrf.mxu3 }
 0x172   : > { %v440_v17 = vadd.f32 %v4497_v55, %v439_v1  ;;  %v4884_v7 = vadd.f32 %v1062_v54, %v853_v2 }
 0x174   : > { %v487_v61 = vmax.f32 %v440_v17, 0.0  ;;  %3899 = vmatmul.msk.f32.gmra.mxu0 %vm310_vm0, %v4732_v9  ;;  %v4938_v17 = vld [vmem:[#allocation2 + $0x39] sm:$0xff] }
 0x175   : > { %v1065_v15 = vpop.f32.mrf.mxu1  ;;  %v4888_v18 = vld [vmem:[#allocation2 + $0xd0] sm:$0xff] }
 0x176   : > { %v4890_v25 = vld [vmem:[#allocation2 + $0xcf] sm:$0xff]  ;;  %519 = vst.msk [vmem:[#allocation2 + $0xd8] sm:$0xff] %vm310_vm0, %v487_v61  ;;  %3781 = vmatmul.msk.f32.gmra.mxu3 %vm310_vm0, %v4888_v18 }
 0x178   : > { %3813 = vmatmul.msk.f32.gmra.mxu2 %vm310_vm0, %v4890_v25  ;;  %3918 = vmatmul.msk.f32.gmra.mxu1 %vm310_vm0, %v4895_v22 }
 0x179   : > { %v856_v55 = vpop.f32.mrf.mxu3  ;;  %v4901_v26 = vpop.f32.mrf.mxu0 }
 0x17a   : > { %6133 = vst [vmem:[#allocation7_spill] sm:$0xff] %v4901_v26  ;;  %v4903_v9 = vadd.f32 %v1065_v15, %v856_v55  ;;  %v4984_v26 = vld [vmem:[#allocation2 + $0x49] sm:$0xff] }
 0x17c   : > { %3900 = vmatmul.msk.f32.gmra.mxu0 %vm310_vm0, %v4746_v12 }
 0x17d   : > { %v1068_v3 = vpop.f32.mrf.mxu1  ;;  %v4910_v38 = vld [vmem:[#allocation2 + $0xd8] sm:$0xff] }
 0x17e   : > { %v636_v41 = vld [vmem:[#allocation2 + $0xd7] sm:$0xff]  ;;  %3782 = vmatmul.msk.f32.gmra.mxu3 %vm310_vm0, %v4910_v38  ;;  %v4936_v2 = vld [vmem:[#allocation2 + $0xdf] sm:$0xff] }
 0x17f   : > { %v4916_v47 = vsel %vm642_vm1, 0.0, %v636_v41 }
 0x180   : > { %3814 = vmatmul.msk.f32.gmra.mxu2 %vm310_vm0, %v4916_v47  ;;  %3919 = vmatmul.msk.f32.gmra.mxu1 %vm310_vm0, %v4920_v49 }
 0x181   : > { %v859_v12 = vpop.f32.mrf.mxu3  ;;  %v4926_v50 = vpop.f32.mrf.mxu0 }
 0x182   : > { %6134 = vst [vmem:[#allocation8_spill] sm:$0xff] %v4926_v50  ;;  %v4928_v54 = vadd.f32 %v1068_v3, %v859_v12  ;;  %v2036_v3 = vld [vmem:[#allocation2 + $0x41] sm:$0xff] }
 0x183   : > { %v4960_v12 = vsel %vm1167_vm2, 0.0, %v2036_v3  ;;  %v2684_v3 = vld [vmem:[%s6121_s3 + $0xf8] sm:$0xff] }
 0x184   : > { %6135 = vst [vmem:[#allocation9_spill] sm:$0xff] %v4928_v54  ;;  %3901 = vmatmul.msk.f32.gmra.mxu0 %vm310_vm0, %v4771_v34  ;;  %v638_v34 = vld [vmem:[#allocation2 + $0xe7] sm:$0xff]  ;;  %2793 = vmatpush.msra.mxu3 %v2684_v3 }
 0x185   : > { %v1071_v1 = vpop.f32.mrf.mxu1  ;;  %v4956_v41 = vsel %vm642_vm1, 0.0, %v638_v34 }
 0x186   : > { %3783 = vmatmul.msk.f32.gmra.mxu3 %vm310_vm0, %v4930_v57 }
 0x188   : > { %3815 = vmatmul.msk.f32.gmra.mxu2 %vm310_vm0, %v4936_v2  ;;  %3920 = vmatmul.msk.f32.gmra.mxu1 %vm310_vm0, %v4938_v17 }
 0x189   : > { %v862_v61 = vpop.f32.mrf.mxu3  ;;  %v4944_v15 = vpop.f32.mrf.mxu0 }
 0x18a   : > { %6136 = vst [vmem:[#allocation10_spill] sm:$0xff] %v4944_v15  ;;  %v4946_v55 = vadd.f32 %v1071_v1, %v862_v61  ;;  %v4976_v15 = vld [vmem:[#allocation2 + $0xf0] sm:$0xff] }
 0x18c   : > { %6137 = vst [vmem:[#allocation11_spill] sm:$0xff] %v4946_v55  ;;  %3902 = vmatmul.msk.f32.gmra.mxu0 %vm310_vm0, %v4789_v45  ;;  %v2407_v45 = vld [vmem:[%s6121_s3 + $0xd8] sm:$0xff] }
 0x18d   : > { %v1074_v32 = vpop.f32.mrf.mxu1  ;;  %2516 = vmatpush.msrb.mxu2 %v2407_v45  ;;  %v4982_v45 = vld [vmem:[#allocation2 + $0xef] sm:$0xff] }
 0x18e   : > { %3784 = vmatmul.msk.f32.gmra.mxu3 %vm310_vm0, %v4948_v27  ;;  %v2038_v55 = vld [vmem:[#allocation2 + $0x51] sm:$0xff] }
 0x190   : > { %3816 = vmatmul.msk.f32.gmra.mxu2 %vm310_vm0, %v4956_v41  ;;  %3921 = vmatmul.msk.f32.gmra.mxu1 %vm310_vm0, %v4960_v12 }
 0x191   : > { %v865_v1 = vpop.f32.mrf.mxu3  ;;  %v4969_v61 = vpop.f32.mrf.mxu0 }
 0x192   : > { %6138 = vst [vmem:[#allocation12_spill] sm:$0xff] %v4969_v61  ;;  %v4971_v34 = vadd.f32 %v1074_v32, %v865_v1  ;;  %v4997_v61 = vld [vmem:[#allocation2 + $0xf8] sm:$0xff] }
 0x194   : > { %6139 = vst [vmem:[#allocation13_spill] sm:$0xff] %v4971_v34  ;;  %3903 = vmatmul.msk.f32.gmra.mxu0 %vm310_vm0, %v4805_v59  ;;  %v2993_v59 = vld [vmem:[%s6121_s3 + $0x118] sm:$0xff] }
 0x195   : > { %v1077_v50 = vpop.f32.mrf.mxu1  ;;  %v640_v34 = vld [vmem:[#allocation2 + $0xf7] sm:$0xff]  ;;  %3102 = vmatpush.msra.mxu0 %v2993_v59 }
 0x196   : > { %3785 = vmatmul.msk.f32.gmra.mxu3 %vm310_vm0, %v4976_v15 }
 0x198   : > { %3817 = vmatmul.msk.f32.gmra.mxu2 %vm310_vm0, %v4982_v45  ;;  %3922 = vmatmul.msk.f32.gmra.mxu1 %vm310_vm0, %v4984_v26 }
 0x199   : > { %v868_v32 = vpop.f32.mrf.mxu3  ;;  %v4992_v3 = vpop.f32.mrf.mxu0 }
 0x19a   : > { %v4990_v1 = vadd.f32 %v1077_v50, %v868_v32  ;;  %6141 = vst [vmem:[#allocation15_spill] sm:$0xff] %v4992_v3  ;;  %v5005_v50 = vsel %vm642_vm1, 0.0, %v640_v34  ;;  %v5009_v32 = vsel %vm1167_vm2, 0.0, %v2038_v55  ;;  %v5025_v55 = vld [vmem:[#allocation2 + $0xff] sm:$0xff] }
 0x19b   : > { %6142 = vst [vmem:[#allocation16_spill] sm:$0xff] %v5005_v50  ;;  %v5027_v34 = vld [vmem:[#allocation2 + $0x59] sm:$0xff] }
 0x19c   : > { %6140 = vst [vmem:[#allocation14_spill] sm:$0xff] %v4990_v1  ;;  %3904 = vmatmul.msk.f32.gmra.mxu0 %vm310_vm0, %v4825_v16  ;;  %v5017_v16 = vld [vmem:[#allocation2 + $0x100] sm:$0xff] }
 0x19d   : > { %v1080_v54 = vpop.f32.mrf.mxu1  ;;  %6145 = vst [vmem:[#allocation19_spill] sm:$0xff] %v5025_v55 }
 0x19e   : > { %3786 = vmatmul.msk.f32.gmra.mxu3 %vm310_vm0, %v4997_v61 }
 0x1a0   : > { %3818 = vmatmul.msk.f32.gmra.mxu2 %vm310_vm0, %v5005_v50  ;;  %3923 = vmatmul.msk.f32.gmra.mxu1 %vm310_vm0, %v5009_v32 }
 0x1a1   : > { %v871_v59 = vpop.f32.mrf.mxu3  ;;  %v5019_v1 = vpop.f32.mrf.mxu0 }
 0x1a2   : > { %v5015_v3 = vadd.f32 %v1080_v54, %v871_v59  ;;  %6144 = vst [vmem:[#allocation18_spill] sm:$0xff] %v5019_v1  ;;  %v2040_v1 = vld [vmem:[#allocation2 + $0x61] sm:$0xff] }
 0x1a4   : > { %6143 = vst [vmem:[#allocation17_spill] sm:$0xff] %v5015_v3  ;;  %3905 = vmatmul.msk.f32.gmra.mxu0 %vm310_vm0, %v4841_v30  ;;  %v1134_v30 = vld [vmem:[#allocation2 + $0x9] sm:$0xff] }
 0x1a5   : > { %v1083_v43 = vpop.f32.mrf.mxu1 }
 0x1a6   : > { %3787 = vmatmul.msk.f32.gmra.mxu3 %vm310_vm0, %v5017_v16 }
 0x1a8   : > { %3819 = vmatmul.msk.f32.gmra.mxu2 %vm310_vm0, %v5025_v55  ;;  %3924 = vmatmul.msk.f32.gmra.mxu1 %vm310_vm0, %v5027_v34  ;;  %v5043_v55 = vsel %vm1167_vm2, 0.0, %v2040_v1  ;;  %v5056_v1 = vld [vmem:[#allocation2 + $0x69] sm:$0xff] }
 0x1a9   : > { %v874_v54 = vpop.f32.mrf.mxu3  ;;  %v5037_v50 = vpop.f32.mrf.mxu0 }
 0x1aa   : > { %v5033_v59 = vadd.f32 %v1083_v43, %v874_v54  ;;  %6147 = vst [vmem:[#allocation21_spill] sm:$0xff] %v5037_v50  ;;  %v2042_v50 = vld [vmem:[#allocation2 + $0x71] sm:$0xff] }
 0x1ac   : > { %6146 = vst [vmem:[#allocation20_spill] sm:$0xff] %v5033_v59  ;;  %3906 = vmatmul.msk.f32.gmra.mxu0 %vm310_vm0, %v4865_v56  ;;  %v1135_v59 = vld [vmem:[#allocation2 + $0x11] sm:$0xff] }
 0x1ad   : > { %v1086_v3 = vpop.f32.mrf.mxu1 }
 0x1ae   : > { %3852 = vmatmul.msk.f32.vlgmr.msrb.gmra.mxu3 %vm310_vm0, %v4514_v5  ;;  %v1169_v5 = vsel %vm1167_vm2, 0.0, %v1135_v59 }
 0x1b0   : > { %3820 = vmatmul.msk.f32.vlgmr.msra.gmra.mxu2 %vm310_vm0, %v1134_v30  ;;  %3925 = vmatmul.msk.f32.gmra.mxu1 %vm310_vm0, %v5043_v55 }
 0x1b1   : > { %v877_v43 = vpop.f32.mrf.mxu3 }
 0x1b2   : > { %v5048_v54 = vadd.f32 %v1086_v3, %v877_v43  ;;  %v5061_v3 = vpop.f32.mrf.mxu0 }
 0x1b3   : > { %6148 = vst [vmem:[#allocation22_spill] sm:$0xff] %v5061_v3 }
 0x1b4   : > { %3907 = vmatmul.msk.f32.gmra.mxu0 %vm310_vm0, %v4888_v18 }
 0x1b5   : > { %v1089_v56 = vpop.f32.mrf.mxu1 }
 0x1b6   : > { %3853 = vmatmul.msk.f32.gmra.mxu3 %vm310_vm0, %v4522_v11  ;;  %v5071_v11 = vsel %vm1167_vm2, 0.0, %v2042_v50 }
 0x1b8   : > { %3821 = vmatmul.msk.f32.gmra.mxu2 %vm310_vm0, %v1169_v5  ;;  %3926 = vmatmul.msk.f32.gmra.mxu1 %vm310_vm0, %v5056_v1 }
 0x1b9   : > { %v880_v30 = vpop.f32.mrf.mxu3 }
 0x1ba   : > { %v5063_v43 = vadd.f32 %v1089_v56, %v880_v30  ;;  %v5077_v56 = vpop.f32.mrf.mxu2  ;;  %v5079_v5 = vpop.f32.mrf.mxu0 }
 0x1bb   : > { %6149 = vst [vmem:[#allocation23_spill] sm:$0xff] %v5079_v5 }
 0x1bc   : > { %3908 = vmatmul.msk.f32.gmra.mxu0 %vm310_vm0, %v4910_v38 }
 0x1bd   : > { %v1092_v18 = vpop.f32.mrf.mxu1 }
 0x1be   : > { %3854 = vmatmul.msk.f32.gmra.mxu3 %vm310_vm0, %v4538_v19  ;;  %v5087_v19 = vld [vmem:[#allocation2 + $0x79] sm:$0xff] }
 0x1c0   : > { %3822 = vmatmul.msk.f32.gmra.mxu2 %vm310_vm0, %v4850_v37  ;;  %3927 = vmatmul.msk.f32.gmra.mxu1 %vm310_vm0, %v5071_v11 }
 0x1c1   : > { %v883_v59 = vpop.f32.mrf.mxu3 }
 0x1c2   : > { %v5081_v30 = vadd.f32 %v1092_v18, %v883_v59  ;;  %v2044_v18 = vld [vmem:[#allocation2 + $0x81] sm:$0xff]  ;;  %v5095_v59 = vpop.f32.mrf.mxu2  ;;  %v5097_v5 = vpop.f32.mrf.mxu0 }
 0x1c3   : > { %6150 = vst [vmem:[#allocation24_spill] sm:$0xff] %v5097_v5  ;;  %v5127_v5 = vld [vmem:[#allocation2 + $0x89] sm:$0xff] }
 0x1c4   : > { %3909 = vmatmul.msk.f32.gmra.mxu0 %vm310_vm0, %v4930_v57  ;;  %v2406_v57 = vld [vmem:[%s6121_s3 + $0xd0] sm:$0xff] }
 0x1c5   : > { %v1095_v38 = vpop.f32.mrf.mxu1  ;;  %2517 = vmatpush.msrb.mxu2 %v2406_v57 }
 0x1c6   : > { %3855 = vmatmul.msk.f32.gmra.mxu3 %vm310_vm0, %v4551_v29 }
 0x1c8   : > { %3823 = vmatmul.msk.f32.gmra.mxu2 %vm310_vm0, %v4877_v0  ;;  %3928 = vmatmul.msk.f32.gmra.mxu1 %vm310_vm0, %v5087_v19  ;;  %v5105_v0 = vsel %vm1167_vm2, 0.0, %v2044_v18 }
 0x1c9   : > { %v886_v37 = vpop.f32.mrf.mxu3 }
 0x1ca   : > { %v5093_v50 = vadd.f32 %v1095_v38, %v886_v37  ;;  %v5121_v37 = vpop.f32.mrf.mxu2  ;;  %v5123_v18 = vpop.f32.mrf.mxu0 }
 0x1cb   : > { %6151 = vst [vmem:[#allocation25_spill] sm:$0xff] %v5123_v18  ;;  %v2990_v18 = vld [vmem:[%s6121_s3 + $0x100] sm:$0xff] }
 0x1cc   : > { %3910 = vmatmul.msk.f32.gmra.mxu0 %vm310_vm0, %v4948_v27 }
 0x1cd   : > { %v1098_v29 = vpop.f32.mrf.mxu1 }
 0x1ce   : > { %3856 = vmatmul.msk.f32.gmra.mxu3 %vm310_vm0, %v4578_v42  ;;  %v2683_v42 = vld [vmem:[%s6121_s3 + $0xf0] sm:$0xff] }
 0x1cf   : > { %2794 = vmatpush.msra.mxu3 %v2683_v42  ;;  %v2046_v42 = vld [vmem:[#allocation2 + $0x91] sm:$0xff] }
 0x1d0   : > { %3824 = vmatmul.msk.f32.gmra.mxu2 %vm310_vm0, %v4895_v22  ;;  %3929 = vmatmul.msk.f32.gmra.mxu1 %vm310_vm0, %v5105_v0 }
 0x1d1   : > { %v889_v27 = vpop.f32.mrf.mxu3 }
 0x1d2   : > { %v5114_v38 = vadd.f32 %v1098_v29, %v889_v27  ;;  %v2991_v27 = vld [vmem:[%s6121_s3 + $0x108] sm:$0xff] }
 0x1d4   : > { %3911 = vmatmul.msk.f32.gmra.mxu0 %vm310_vm0, %v4976_v15  ;;  %v2992_v15 = vld [vmem:[%s6121_s3 + $0x110] sm:$0xff] }
 0x1d5   : > { %v1101_v57 = vpop.f32.mrf.mxu1  ;;  %3103 = vmatpush.msra.mxu0 %v2992_v15  ;;  %v5150_v15 = vsel %vm1167_vm2, 0.0, %v2046_v42 }
 0x1d6   : > { %3857 = vmatmul.msk.f32.gmra.mxu3 %vm310_vm0, %v4588_v52 }
 0x1d7   : > { %3104 = vmatpush.msra.mxu0 %v2991_v27 }
 0x1d8   : > { %3825 = vmatmul.msk.f32.gmra.mxu2 %vm310_vm0, %v4920_v49  ;;  %3930 = vmatmul.msk.f32.gmra.mxu1 %vm310_vm0, %v5127_v5 }
 0x1d9   : > { %v892_v29 = vpop.f32.mrf.mxu3  ;;  %3105 = vmatpush.msra.mxu0 %v2990_v18 }
 0x1da   : > { %v5139_v52 = vadd.f32 %v1101_v57, %v892_v29  ;;  %v5156_v57 = vpop.f32.mrf.mxu2  ;;  %v5158_v29 = vpop.f32.mrf.mxu0 }
 0x1db   : > { %6152 = vst [vmem:[#allocation26_spill] sm:$0xff] %v5158_v29 }
 0x1dc   : > { %3912 = vmatmul.msk.f32.gmra.mxu0 %vm310_vm0, %v4997_v61 }
 0x1dd   : > { %v1104_v27 = vpop.f32.mrf.mxu1 }
 0x1de   : > { %3858 = vmatmul.msk.f32.gmra.mxu3 %vm310_vm0, %v4606_v63  ;;  %v5166_v63 = vld [vmem:[#allocation2 + $0x99] sm:$0xff] }
 0x1e0   : > { %3826 = vmatmul.msk.f32.gmra.mxu2 %vm310_vm0, %v4938_v17  ;;  %3931 = vmatmul.msk.f32.gmra.mxu1 %vm310_vm0, %v5150_v15 }
 0x1e1   : > { %v895_v61 = vpop.f32.mrf.mxu3 }
 0x1e2   : > { %v5160_v18 = vadd.f32 %v1104_v27, %v895_v61  ;;  %v5172_v3 = vpop.f32.mrf.mxu0  ;;  %v1784_v61 = vld [vmem:[#allocation2 + $0x108] sm:$0xff] }
 0x1e3   : > { %6154 = vst [vmem:[#allocation28_spill] sm:$0xff] %v5172_v3  ;;  %v1785_v3 = vld [vmem:[#allocation2 + $0x110] sm:$0xff] }
 0x1e4   : > { %6153 = vst [vmem:[#allocation27_spill] sm:$0xff] %v5160_v18  ;;  %3913 = vmatmul.msk.f32.gmra.mxu0 %vm310_vm0, %v5017_v16  ;;  %v2048_v18 = vld [vmem:[#allocation2 + $0xa1] sm:$0xff] }
 0x1e6   : > { %3859 = vmatmul.msk.f32.gmra.mxu3 %vm310_vm0, %v4619_v13  ;;  %v5181_v13 = vsel %vm1167_vm2, 0.0, %v2048_v18 }
 0x1e8   : > { %3827 = vmatmul.msk.f32.gmra.mxu2 %vm310_vm0, %v4960_v12  ;;  %3932 = vmatmul.msk.f32.gmra.mxu1 %vm310_vm0, %v5166_v63 }
 0x1e9   : > { %v898_v42 = vpop.f32.mrf.mxu3 }
 0x1ea   : > { %v1107_v29 = vpop.f32.mrf.mxu2 }
 0x1eb   : > { %v5174_v27 = vadd.f32 %v1107_v29, %v898_v42 }
 0x1ec   : > { %3914 = vmatmul.msk.f32.gmra.mxu0 %vm310_vm0, %v1784_v61 }
 0x1ed   : > { %6155 = vst [vmem:[#allocation29_spill] sm:$0xff] %v5174_v27  ;;  %v5189_v27 = vpop.f32.mrf.mxu0 }
 0x1ee   : > { %3860 = vmatmul.msk.f32.gmra.mxu3 %vm310_vm0, %v4638_v24  ;;  %6156 = vst [vmem:[#allocation30_spill] sm:$0xff] %v5189_v27  ;;  %v5194_v24 = vld [vmem:[#allocation2 + $0xa9] sm:$0xff] }
 0x1f0   : > { %3828 = vmatmul.msk.f32.gmra.mxu2 %vm310_vm0, %v4984_v26  ;;  %3933 = vmatmul.msk.f32.gmra.mxu1 %vm310_vm0, %v5181_v13 }
 0x1f1   : > { %v901_v16 = vpop.f32.mrf.mxu3 }
 0x1f3   : > { %v1110_v29 = vpop.f32.mrf.mxu2 }
 0x1f4   : > { %v5187_v42 = vadd.f32 %v1110_v29, %v901_v16  ;;  %3915 = vmatmul.msk.f32.gmra.mxu0 %vm310_vm0, %v1785_v3  ;;  %v2050_v29 = vld [vmem:[#allocation2 + $0xb1] sm:$0xff] }
 0x1f5   : > { %v5204_v3 = vpop.f32.mrf.mxu0 }
 0x1f6   : > { %3861 = vmatmul.msk.f32.gmra.mxu3 %vm310_vm0, %v4649_v33  ;;  %6157 = vst [vmem:[#allocation31_spill] sm:$0xff] %v5204_v3  ;;  %v5210_v33 = vsel %vm1167_vm2, 0.0, %v2050_v29 }
 0x1f8   : > { %3829 = vmatmul.msk.f32.gmra.mxu2 %vm310_vm0, %v5009_v32  ;;  %3934 = vmatmul.msk.f32.gmra.mxu1 %vm310_vm0, %v5194_v24 }
 0x1f9   : > { %v904_v18 = vpop.f32.mrf.mxu3 }
 0x1fb   : > { %v1113_v61 = vpop.f32.mrf.mxu2 }
 0x1fc   : > { %v5200_v16 = vadd.f32 %v1113_v61, %v904_v18  ;;  %4012 = vmatmul.msk.f32.vlgmr.msra.gmra.mxu0 %vm310_vm0, %v4895_v22 }
 0x1fd   : > { %v5228_v22 = vpop.f32.mrf.mxu0 }
 0x1fe   : > { %3862 = vmatmul.msk.f32.gmra.mxu3 %vm310_vm0, %v4666_v39  ;;  %v5222_v39 = vld [vmem:[#allocation2 + $0xb9] sm:$0xff]  ;;  %6158 = vst [vmem:[#allocation32_spill] sm:$0xff] %v5228_v22  ;;  %v5258_v22 = vld [vmem:[#allocation2 + $0xc9] sm:$0xff] }
 0x200   : > { %3830 = vmatmul.msk.f32.gmra.mxu2 %vm310_vm0, %v5027_v34  ;;  %3935 = vmatmul.msk.f32.gmra.mxu1 %vm310_vm0, %v5210_v33 }
 0x201   : > { %v907_v18 = vpop.f32.mrf.mxu3 }
 0x203   : > { %v1116_v61 = vpop.f32.mrf.mxu2 }
 0x204   : > { %v5216_v27 = vadd.f32 %v1116_v61, %v907_v18  ;;  %4013 = vmatmul.msk.f32.gmra.mxu0 %vm310_vm0, %v4920_v49  ;;  %v2052_v61 = vld [vmem:[#allocation2 + $0xc1] sm:$0xff] }
 0x205   : > { %v2405_v49 = vld [vmem:[%s6121_s3 + $0xc8] sm:$0xff] }
 0x206   : > { %3863 = vmatmul.msk.f32.gmra.mxu3 %vm310_vm0, %v4675_v46  ;;  %v5238_v46 = vsel %vm1167_vm2, 0.0, %v2052_v61  ;;  %2518 = vmatpush.msrb.mxu2 %v2405_v49  ;;  %v5264_v49 = vpop.f32.mrf.mxu1 }
 0x207   : > { %6161 = vst [vmem:[#allocation35_spill] sm:$0xff] %v5264_v49 }
 0x208   : > { %3831 = vmatmul.msk.f32.gmra.mxu2 %vm310_vm0, %v5043_v55  ;;  %3936 = vmatmul.msk.f32.gmra.mxu1 %vm310_vm0, %v5222_v39 }
 0x209   : > { %v910_v29 = vpop.f32.mrf.mxu3 }
 0x20b   : > { %v1119_v3 = vpop.f32.mrf.mxu2 }
 0x20c   : > { %v5230_v18 = vadd.f32 %v1119_v3, %v910_v29  ;;  %4014 = vmatmul.msk.f32.gmra.mxu0 %vm310_vm0, %v4938_v17  ;;  %v5247_v17 = vpop.f32.mrf.mxu0 }
 0x20d   : > { %6159 = vst [vmem:[#allocation33_spill] sm:$0xff] %v5247_v17 }
 0x20e   : > { %3864 = vmatmul.msk.f32.gmra.mxu3 %vm310_vm0, %v4692_v53  ;;  %v2682_v53 = vld [vmem:[%s6121_s3 + $0xe8] sm:$0xff] }
 0x20f   : > { %2795 = vmatpush.msra.mxu3 %v2682_v53  ;;  %v2054_v53 = vld [vmem:[#allocation2 + $0xd1] sm:$0xff] }
 0x210   : > { %3832 = vmatmul.msk.f32.gmra.mxu2 %vm310_vm0, %v5056_v1  ;;  %3937 = vmatmul.msk.f32.gmra.mxu1 %vm310_vm0, %v5238_v46 }
 0x211   : > { %v913_v3 = vpop.f32.mrf.mxu3 }
 0x213   : > { %v1122_v29 = vpop.f32.mrf.mxu2 }
 0x214   : > { %v5252_v61 = vadd.f32 %v1122_v29, %v913_v3  ;;  %4015 = vmatmul.msk.f32.gmra.mxu0 %vm310_vm0, %v4960_v12  ;;  %v5279_v12 = vsel %vm1167_vm2, 0.0, %v2054_v53  ;;  %v5295_v53 = vld [vmem:[#allocation2 + $0xd9] sm:$0xff] }
 0x216   : > { %6160 = vst [vmem:[#allocation34_spill] sm:$0xff] %v5252_v61  ;;  %3865 = vmatmul.msk.f32.gmra.mxu3 %vm310_vm0, %v4701_v58  ;;  %v5268_v61 = vpop.f32.mrf.mxu0  ;;  %v3306_v58 = vld [vmem:[%s6123_s5 + $0x18] sm:$0xff] }
 0x217   : > { %6162 = vst [vmem:[#allocation36_spill] sm:$0xff] %v5268_v61  ;;  %3419 = vmatpush.msrb.mxu1 %v3306_v58 }
 0x218   : > { %3833 = vmatmul.msk.f32.gmra.mxu2 %vm310_vm0, %v5071_v11  ;;  %3938 = vmatmul.msk.f32.gmra.mxu1 %vm310_vm0, %v5258_v22 }
 0x219   : > { %v916_v17 = vpop.f32.mrf.mxu3 }
 0x21b   : > { %v1125_v3 = vpop.f32.mrf.mxu2 }
 0x21c   : > { %v5266_v29 = vadd.f32 %v1125_v3, %v916_v17  ;;  %4016 = vmatmul.msk.f32.gmra.mxu0 %vm310_vm0, %v4984_v26  ;;  %v5285_v3 = vpop.f32.mrf.mxu1 }
 0x21d   : > { %6163 = vst [vmem:[#allocation37_spill] sm:$0xff] %v5285_v3 }
 0x21e   : > { %3866 = vmatmul.msk.f32.gmra.mxu3 %vm310_vm0, %v4723_v4  ;;  %v5291_v4 = vpop.f32.mrf.mxu0 }
 0x21f   : > { %6164 = vst [vmem:[#allocation38_spill] sm:$0xff] %v5291_v4 }
 0x220   : > { %3834 = vmatmul.msk.f32.gmra.mxu2 %vm310_vm0, %v5087_v19  ;;  %3939 = vmatmul.msk.f32.gmra.mxu1 %vm310_vm0, %v5279_v12 }
 0x221   : > { %v919_v17 = vpop.f32.mrf.mxu3 }
 0x223   : > { %v1128_v26 = vpop.f32.mrf.mxu2 }
 0x224   : > { %v5287_v61 = vadd.f32 %v1128_v26, %v919_v17  ;;  %4017 = vmatmul.msk.f32.gmra.mxu0 %vm310_vm0, %v5009_v32  ;;  %v2056_v26 = vld [vmem:[#allocation2 + $0xe1] sm:$0xff]  ;;  %v5305_v32 = vpop.f32.mrf.mxu1 }
 0x225   : > { %6165 = vst [vmem:[#allocation39_spill] sm:$0xff] %v5305_v32 }
 0x226   : > { %3867 = vmatmul.msk.f32.gmra.mxu3 %vm310_vm0, %v4734_v14  ;;  %v5311_v14 = vsel %vm1167_vm2, 0.0, %v2056_v26  ;;  %v5327_v26 = vld [vmem:[#allocation2 + $0xe9] sm:$0xff] }
 0x228   : > { %3835 = vmatmul.msk.f32.gmra.mxu2 %vm310_vm0, %v5105_v0  ;;  %3940 = vmatmul.msk.f32.gmra.mxu1 %vm310_vm0, %v5295_v53 }
 0x229   : > { %v922_v58 = vpop.f32.mrf.mxu3 }
 0x22b   : > { %v1131_v3 = vpop.f32.mrf.mxu2 }
 0x22c   : > { %v5301_v17 = vadd.f32 %v1131_v3, %v922_v58  ;;  %4018 = vmatmul.msk.f32.gmra.mxu0 %vm310_vm0, %v5027_v34  ;;  %v5317_v3 = vpop.f32.mrf.mxu0  ;;  %v1039_v34 = vadd.f32 %v4711_v60, %v5077_v56  ;;  %v5329_v49 = vpop.f32.mrf.mxu1  ;;  %v1042_v60 = vadd.f32 %v4728_v8, %v5095_v59  ;;  %v1045_v8 = vadd.f32 %v4742_v20, %v5121_v37 }
 0x22d   : > { %v1048_v20 = vadd.f32 %v4767_v31, %v5156_v57  ;;  %v2404_v31 = vld [vmem:[%s6121_s3 + $0xc0] sm:$0xff] }
 0x22e   : > { %3868 = vmatmul.msk.f32.gmra.mxu3 %vm310_vm0, %v4753_v23  ;;  %2519 = vmatpush.msrb.mxu2 %v2404_v31 }
 0x230   : > { %3836 = vmatmul.msk.f32.gmra.mxu2 %vm310_vm0, %v5127_v5  ;;  %3941 = vmatmul.msk.f32.gmra.mxu1 %vm310_vm0, %v5311_v14 }
 0x231   : > { %v1626_v58 = vpop.f32.mrf.mxu3 }
 0x233   : > { %v1317_v4 = vpop.f32.mrf.mxu2 }
 0x234   : > { %v1413_v32 = vadd.f32 %v1317_v4, %v1039_v34  ;;  %4019 = vmatmul.msk.f32.gmra.mxu0 %vm310_vm0, %v5043_v55  ;;  %v5337_v55 = vpop.f32.mrf.mxu0  ;;  %v2058_v34 = vld [vmem:[#allocation2 + $0xf1] sm:$0xff]  ;;  %v5355_v59 = vpop.f32.mrf.mxu1 }
 0x235   : > { %6166 = vst [vmem:[#allocation40_spill] sm:$0xff] %v5337_v55  ;;  %v2358_v55 = vld [vmem:[#allocation2 + $0xb7] sm:$0xff] }
 0x236   : > { %v5323_v23 = vadd.f32 %v1626_v58, %v1413_v32  ;;  %3869 = vmatmul.msk.f32.gmra.mxu3 %vm310_vm0, %v4773_v35  ;;  %v5347_v58 = vsel %vm1167_vm2, 0.0, %v2058_v34 }
 0x238   : > { %3837 = vmatmul.msk.f32.gmra.mxu2 %vm310_vm0, %v5150_v15  ;;  %3942 = vmatmul.msk.f32.gmra.mxu1 %vm310_vm0, %v5327_v26 }
 0x239   : > { %v1629_v56 = vpop.f32.mrf.mxu3 }
 0x23b   : > { %v1320_v4 = vpop.f32.mrf.mxu2 }
 0x23c   : > { %v1414_v32 = vadd.f32 %v1320_v4, %v1042_v60  ;;  %4020 = vmatmul.msk.f32.gmra.mxu0 %vm310_vm0, %v5056_v1  ;;  %v5357_v4 = vpop.f32.mrf.mxu0 }
 0x23d   : > { %6167 = vst [vmem:[#allocation41_spill] sm:$0xff] %v5357_v4 }
 0x23e   : > { %v5341_v35 = vadd.f32 %v1629_v56, %v1414_v32  ;;  %3870 = vmatmul.msk.f32.gmra.mxu3 %vm310_vm0, %v4796_v48  ;;  %v5365_v32 = vld [vmem:[#allocation2 + $0xf9] sm:$0xff] }
 0x240   : > { %3838 = vmatmul.msk.f32.gmra.mxu2 %vm310_vm0, %v5166_v63  ;;  %3943 = vmatmul.msk.f32.gmra.mxu1 %vm310_vm0, %v5347_v58 }
 0x241   : > { %v1632_v1 = vpop.f32.mrf.mxu3 }
 0x243   : > { %v1323_v60 = vpop.f32.mrf.mxu2 }
 0x244   : > { %v1415_v56 = vadd.f32 %v1323_v60, %v1045_v8  ;;  %4021 = vmatmul.msk.f32.gmra.mxu0 %vm310_vm0, %v5071_v11  ;;  %v5373_v8 = vpop.f32.mrf.mxu1  ;;  %v5379_v60 = vpop.f32.mrf.mxu0 }
 0x245   : > { %6168 = vst [vmem:[#allocation42_spill] sm:$0xff] %v5379_v60  ;;  %v2657_v60 = vld [vmem:[#allocation2 + $0x68] sm:$0xff] }
 0x246   : > { %v5361_v48 = vadd.f32 %v1632_v1, %v1415_v56  ;;  %3871 = vmatmul.msk.f32.gmra.mxu3 %vm310_vm0, %v4807_v51  ;;  %v2060_v1 = vld [vmem:[#allocation2 + $0x101] sm:$0xff] }
 0x247   : > { %v5385_v56 = vsel %vm1167_vm2, 0.0, %v2060_v1 }
 0x248   : > { %3839 = vmatmul.msk.f32.gmra.mxu2 %vm310_vm0, %v5181_v13  ;;  %3944 = vmatmul.msk.f32.gmra.mxu1 %vm310_vm0, %v5365_v32 }
 0x249   : > { %v1635_v37 = vpop.f32.mrf.mxu3 }
 0x24b   : > { %v1326_v34 = vpop.f32.mrf.mxu2 }
 0x24c   : > { %v1416_v11 = vadd.f32 %v1326_v34, %v1048_v20  ;;  %4022 = vmatmul.msk.f32.gmra.mxu0 %vm310_vm0, %v5087_v19 }
 0x24e   : > { %v5377_v51 = vadd.f32 %v1635_v37, %v1416_v11  ;;  %3872 = vmatmul.msk.f32.gmra.mxu3 %vm310_vm0, %v4832_v21  ;;  %v2681_v21 = vld [vmem:[%s6121_s3 + $0xe0] sm:$0xff]  ;;  %v5400_v37 = vpop.f32.mrf.mxu1  ;;  %v5406_v11 = vld [vmem:[#allocation2 + $0x109] sm:$0xff] }
 0x24f   : > { %2796 = vmatpush.msra.mxu3 %v2681_v21 }
 0x250   : > { %3840 = vmatmul.msk.f32.gmra.mxu2 %vm310_vm0, %v5194_v24  ;;  %3945 = vmatmul.msk.f32.gmra.mxu1 %vm310_vm0, %v5385_v56 }
 0x251   : > { %v1638_v19 = vpop.f32.mrf.mxu3 }
 0x253   : > { %v1329_v57 = vpop.f32.mrf.mxu2 }
 0x254   : > { %v1417_v20 = vadd.f32 %v1329_v57, %v4801_v10  ;;  %4023 = vmatmul.msk.f32.gmra.mxu0 %vm310_vm0, %v5105_v0  ;;  %v5412_v10 = vpop.f32.mrf.mxu0  ;;  %v2062_v57 = vld [vmem:[#allocation2 + $0x111] sm:$0xff] }
 0x255   : > { %6169 = vst [vmem:[#allocation43_spill] sm:$0xff] %v5412_v10  ;;  %v5426_v21 = vsel %vm1167_vm2, 0.0, %v2062_v57 }
 0x256   : > { %v5402_v34 = vadd.f32 %v1638_v19, %v1417_v20  ;;  %3873 = vmatmul.msk.f32.gmra.mxu3 %vm310_vm0, %v4843_v36  ;;  %v3305_v36 = vld [vmem:[%s6123_s5 + $0x10] sm:$0xff]  ;;  %v5428_v20 = vpop.f32.mrf.mxu1 }
 0x257   : > { %3420 = vmatpush.msrb.mxu1 %v3305_v36 }
 0x258   : > { %3841 = vmatmul.msk.f32.gmra.mxu2 %vm310_vm0, %v5210_v33  ;;  %3946 = vmatmul.msk.f32.gmra.mxu1 %vm310_vm0, %v5406_v11 }
 0x259   : > { %v1641_v1 = vpop.f32.mrf.mxu3 }
 0x25b   : > { %v1332_v31 = vpop.f32.mrf.mxu2 }
 0x25c   : > { %v1418_v0 = vadd.f32 %v1332_v31, %v4815_v6  ;;  %4024 = vmatmul.msk.f32.gmra.mxu0 %vm310_vm0, %v5127_v5  ;;  %v5434_v5 = vpop.f32.mrf.mxu0 }
 0x25d   : > { %6170 = vst [vmem:[#allocation44_spill] sm:$0xff] %v5434_v5 }
 0x25e   : > { %v5417_v19 = vadd.f32 %v1641_v1, %v1418_v0  ;;  %3874 = vmatmul.msk.f32.gmra.mxu3 %vm310_vm0, %v4873_v62 }
 0x260   : > { %3842 = vmatmul.msk.f32.gmra.mxu2 %vm310_vm0, %v5222_v39  ;;  %3947 = vmatmul.msk.f32.gmra.mxu1 %vm310_vm0, %v5426_v21 }
 0x261   : > { %v1644_v6 = vpop.f32.mrf.mxu3 }
 0x263   : > { %v1335_v1 = vpop.f32.mrf.mxu2 }
 0x264   : > { %v1419_v31 = vadd.f32 %v1335_v1, %v4837_v28  ;;  %4025 = vmatmul.msk.f32.gmra.mxu0 %vm310_vm0, %v5150_v15  ;;  %v5446_v10 = vpop.f32.mrf.mxu0 }
 0x265   : > { %6171 = vst [vmem:[#allocation45_spill] sm:$0xff] %v5446_v10  ;;  %v6191_v10 = vld [vmem:[#allocation29_spill] sm:$0xff] }
 0x266   : > { %v5439_v62 = vadd.f32 %v1644_v6, %v1419_v31  ;;  %3875 = vmatmul.msk.f32.gmra.mxu3 %vm310_vm0, %v4890_v25 }
 0x268   : > { %3843 = vmatmul.msk.f32.gmra.mxu2 %vm310_vm0, %v5238_v46 }
 0x269   : > { %v1647_v0 = vpop.f32.mrf.mxu3 }
 0x26b   : > { %v1338_v57 = vpop.f32.mrf.mxu2 }
 0x26c   : > { %v1420_v36 = vadd.f32 %v1338_v57, %v4858_v44  ;;  %4026 = vmatmul.msk.f32.gmra.mxu0 %vm310_vm0, %v5166_v63  ;;  %v5461_v1 = vpop.f32.mrf.mxu0  ;;  %v6174_v57 = vld [vmem:[#allocation9_spill] sm:$0xff] }
 0x26d   : > { %6172 = vst [vmem:[#allocation46_spill] sm:$0xff] %v5461_v1 }
 0x26e   : > { %v5450_v28 = vadd.f32 %v1647_v0, %v1420_v36  ;;  %3876 = vmatmul.msk.f32.gmra.mxu3 %vm310_vm0, %v4916_v47 }
 0x270   : > { %3844 = vmatmul.msk.f32.gmra.mxu2 %vm310_vm0, %v5258_v22 }
 0x271   : > { %v1650_v25 = vpop.f32.mrf.mxu3 }
 0x273   : > { %v1341_v15 = vpop.f32.mrf.mxu2 }
 0x274   : > { %v1421_v6 = vadd.f32 %v1341_v15, %v4884_v7  ;;  %4027 = vmatmul.msk.f32.gmra.mxu0 %vm310_vm0, %v5181_v13  ;;  %v5476_v13 = vpop.f32.mrf.mxu0  ;;  %v6176_v15 = vld [vmem:[#allocation11_spill] sm:$0xff] }
 0x275   : > { %6173 = vst [vmem:[#allocation47_spill] sm:$0xff] %v5476_v13 }
 0x276   : > { %v5459_v44 = vadd.f32 %v1650_v25, %v1421_v6  ;;  %3877 = vmatmul.msk.f32.gmra.mxu3 %vm310_vm0, %v4936_v2 }
 0x278   : > { %3845 = vmatmul.msk.f32.gmra.mxu2 %vm310_vm0, %v5279_v12 }
 0x279   : > { %v1653_v47 = vpop.f32.mrf.mxu3 }
 0x27b   : > { %v1344_v63 = vpop.f32.mrf.mxu2 }
 0x27c   : > { %v1422_v31 = vadd.f32 %v1344_v63, %v4903_v9  ;;  %4028 = vmatmul.msk.f32.gmra.mxu0 %vm310_vm0, %v5194_v24  ;;  %v5487_v24 = vpop.f32.mrf.mxu0 }
 0x27d   : > { %6175 = vst [vmem:[#allocation9_spill] sm:$0xff] %v5487_v24 }
 0x27e   : > { %v5470_v7 = vadd.f32 %v1653_v47, %v1422_v31  ;;  %3878 = vmatmul.msk.f32.gmra.mxu3 %vm310_vm0, %v4956_v41  ;;  %v6178_v31 = vld [vmem:[#allocation13_spill] sm:$0xff] }
 0x280   : > { %3846 = vmatmul.msk.f32.gmra.mxu2 %vm310_vm0, %v5295_v53 }
 0x281   : > { %v1656_v2 = vpop.f32.mrf.mxu3 }
 0x283   : > { %v1347_v0 = vpop.f32.mrf.mxu2 }
 0x284   : > { %v1423_v36 = vadd.f32 %v1347_v0, %v6174_v57  ;;  %4029 = vmatmul.msk.f32.gmra.mxu0 %vm310_vm0, %v5210_v33  ;;  %v6177_v33 = vld [vmem:[#allocation16_spill] sm:$0xff]  ;;  %v5499_v0 = vpop.f32.mrf.mxu0 }
 0x285   : > { %6179 = vst [vmem:[#allocation11_spill] sm:$0xff] %v5499_v0 }
 0x286   : > { %v5481_v9 = vadd.f32 %v1656_v2, %v1423_v36  ;;  %3879 = vmatmul.msk.f32.gmra.mxu3 %vm310_vm0, %v4982_v45 }
 0x288   : > { %3847 = vmatmul.msk.f32.gmra.mxu2 %vm310_vm0, %v5311_v14 }
 0x289   : > { %v1659_v41 = vpop.f32.mrf.mxu3 }
 0x28b   : > { %v1350_v25 = vpop.f32.mrf.mxu2 }
 0x28c   : > { %v1424_v6 = vadd.f32 %v1350_v25, %v6176_v15  ;;  %4030 = vmatmul.msk.f32.gmra.mxu0 %vm310_vm0, %v5222_v39  ;;  %v6180_v39 = vld [vmem:[#allocation19_spill] sm:$0xff]  ;;  %v1475_v25 = vld [vmem:[#allocation2 + $0x107] sm:$0xff]  ;;  %v6181_v15 = vld [vmem:[#allocation14_spill] sm:$0xff] }
 0x28e   : > { %v5492_v47 = vadd.f32 %v1659_v41, %v1424_v6  ;;  %3880 = vmatmul.msk.f32.gmra.mxu3 %vm310_vm0, %v6177_v33 }
 0x290   : > { %3848 = vmatmul.msk.f32.gmra.mxu2 %vm310_vm0, %v5327_v26 }
 0x291   : > { %v1662_v45 = vpop.f32.mrf.mxu3 }
 0x293   : > { %v1353_v63 = vpop.f32.mrf.mxu2 }
 0x294   : > { %v1425_v2 = vadd.f32 %v1353_v63, %v6178_v31  ;;  %4031 = vmatmul.msk.f32.gmra.mxu0 %vm310_vm0, %v5238_v46  ;;  %v5516_v46 = vsel %vm642_vm1, 0.0, %v1475_v25  ;;  %v5521_v31 = vpop.f32.mrf.mxu0  ;;  %v5532_v25 = vld [vmem:[#allocation2 + $0x10f] sm:$0xff]  ;;  %v6220_v63 = vld [vmem:[#allocation32_spill] sm:$0xff] }
 0x295   : > { %6183 = vst [vmem:[#allocation16_spill] sm:$0xff] %v5521_v31  ;;  %v6186_v31 = vld [vmem:[#allocation20_spill] sm:$0xff] }
 0x296   : > { %v5503_v57 = vadd.f32 %v1662_v45, %v1425_v2  ;;  %3881 = vmatmul.msk.f32.gmra.mxu3 %vm310_vm0, %v6180_v39  ;;  %v3304_v45 = vld [vmem:[%s6123_s5 + $0x8] sm:$0xff] }
 0x297   : > { %3421 = vmatpush.msrb.mxu1 %v3304_v45  ;;  %v6184_v39 = vld [vmem:[#allocation17_spill] sm:$0xff] }
 0x298   : > { %3849 = vmatmul.msk.f32.gmra.mxu2 %vm310_vm0, %v5347_v58 }
 0x299   : > { %v1665_v36 = vpop.f32.mrf.mxu3 }
 0x29b   : > { %v1356_v41 = vpop.f32.mrf.mxu2 }
 0x29c   : > { %v1426_v6 = vadd.f32 %v1356_v41, %v6181_v15  ;;  %4032 = vmatmul.msk.f32.gmra.mxu0 %vm310_vm0, %v5258_v22  ;;  %v5538_v15 = vpop.f32.mrf.mxu0 }
 0x29d   : > { %6185 = vst [vmem:[#allocation13_spill] sm:$0xff] %v5538_v15 }
 0x29e   : > { %v5512_v33 = vadd.f32 %v1665_v36, %v1426_v6  ;;  %3882 = vmatmul.msk.f32.gmra.mxu3 %vm310_vm0, %v5516_v46 }
 0x2a0   : > { %3850 = vmatmul.msk.f32.gmra.mxu2 %vm310_vm0, %v5365_v32 }
 0x2a1   : > { %v1668_v22 = vpop.f32.mrf.mxu3 }
 0x2a3   : > { %v1359_v2 = vpop.f32.mrf.mxu2 }
 0x2a4   : > { %v1427_v36 = vadd.f32 %v1359_v2, %v6184_v39  ;;  %4033 = vmatmul.msk.f32.gmra.mxu0 %vm310_vm0, %v5279_v12  ;;  %v2340_v2 = vld [vmem:[#allocation2 + $0x27] sm:$0xff]  ;;  %v5549_v15 = vpop.f32.mrf.mxu0 }
 0x2a5   : > { %v2372_v39 = vsel %vm642_vm1, 0.0, %v2340_v2 }
 0x2a6   : > { %v5530_v41 = vadd.f32 %v1668_v22, %v1427_v36  ;;  %3883 = vmatmul.msk.f32.gmra.mxu3 %vm310_vm0, %v5532_v25  ;;  %v2649_v22 = vld [vmem:[#allocation2 + $0x28] sm:$0xff] }
 0x2a8   : > { %3851 = vmatmul.msk.f32.gmra.mxu2 %vm310_vm0, %v5385_v56 }
 0x2a9   : > { %v1671_v6 = vpop.f32.mrf.mxu3 }
 0x2ab   : > { %v1362_v45 = vpop.f32.mrf.mxu2 }
 0x2ac   : > { %v1428_v0 = vadd.f32 %v1362_v45, %v6186_v31  ;;  %4034 = vmatmul.msk.f32.gmra.mxu0 %vm310_vm0, %v5295_v53  ;;  %v5559_v13 = vpop.f32.mrf.mxu0 }
 0x2ae   : > { %v5543_v12 = vadd.f32 %v1671_v6, %v1428_v0  ;;  %3980 = vmatmul.msk.f32.vlgmr.msra.gmra.mxu3 %vm310_vm0, %v2649_v22  ;;  %v2650_v0 = vld [vmem:[#allocation2 + $0x30] sm:$0xff] }
 0x2af   : > { %v2341_v6 = vld [vmem:[#allocation2 + $0x2f] sm:$0xff] }
 0x2b0   : > { %3948 = vmatmul.msk.f32.vlgmr.msrb.gmra.mxu2 %vm310_vm0, %v2372_v39  ;;  %v2342_v39 = vld [vmem:[#allocation2 + $0x37] sm:$0xff] }
 0x2b1   : > { %v1674_v36 = vpop.f32.mrf.mxu3 }
 0x2b3   : > { %v1365_v24 = vpop.f32.mrf.mxu2 }
 0x2b4   : > { %v1429_v31 = vadd.f32 %v1365_v24, %v5048_v54  ;;  %4035 = vmatmul.msk.f32.gmra.mxu0 %vm310_vm0, %v5311_v14  ;;  %v2651_v14 = vld [vmem:[#allocation2 + $0x38] sm:$0xff]  ;;  %v2374_v24 = vsel %vm642_vm1, 0.0, %v2342_v39 }
 0x2b6   : > { %v5554_v53 = vadd.f32 %v1674_v36, %v1429_v31  ;;  %3981 = vmatmul.msk.f32.gmra.mxu3 %vm310_vm0, %v2650_v0 }
 0x2b8   : > { %3949 = vmatmul.msk.f32.gmra.mxu2 %vm310_vm0, %v2341_v6  ;;  %v5574_v6 = vpop.f32.mrf.mxu0 }
 0x2b9   : > { %v1677_v45 = vpop.f32.mrf.mxu3 }
 0x2bb   : > { %v1368_v2 = vpop.f32.mrf.mxu2 }
 0x2bc   : > { %v1430_v22 = vadd.f32 %v1368_v2, %v5063_v43  ;;  %4036 = vmatmul.msk.f32.gmra.mxu0 %vm310_vm0, %v5327_v26  ;;  %v2652_v26 = vld [vmem:[#allocation2 + $0x40] sm:$0xff] }
 0x2be   : > { %v5563_v54 = vadd.f32 %v1677_v45, %v1430_v22  ;;  %3982 = vmatmul.msk.f32.gmra.mxu3 %vm310_vm0, %v2651_v14  ;;  %v2343_v45 = vld [vmem:[#allocation2 + $0x3f] sm:$0xff]  ;;  %v2344_v14 = vld [vmem:[#allocation2 + $0x47] sm:$0xff] }
 0x2c0   : > { %3950 = vmatmul.msk.f32.gmra.mxu2 %vm310_vm0, %v2374_v24  ;;  %v5579_v24 = vpop.f32.mrf.mxu1 }
 0x2c1   : > { %v1680_v36 = vpop.f32.mrf.mxu3 }
 0x2c3   : > { %v1371_v31 = vpop.f32.mrf.mxu2 }
 0x2c4   : > { %v1431_v43 = vadd.f32 %v1371_v31, %v5081_v30  ;;  %4037 = vmatmul.msk.f32.gmra.mxu0 %vm310_vm0, %v5347_v58  ;;  %v2653_v58 = vld [vmem:[#allocation2 + $0x48] sm:$0xff]  ;;  %v5589_v31 = vpop.f32.mrf.mxu0 }
 0x2c6   : > { %v5572_v0 = vadd.f32 %v1680_v36, %v1431_v43  ;;  %3983 = vmatmul.msk.f32.gmra.mxu3 %vm310_vm0, %v2652_v26  ;;  %v2376_v36 = vsel %vm642_vm1, 0.0, %v2344_v14 }
 0x2c8   : > { %3951 = vmatmul.msk.f32.gmra.mxu2 %vm310_vm0, %v2343_v45  ;;  %v2654_v45 = vld [vmem:[#allocation2 + $0x50] sm:$0xff] }
 0x2c9   : > { %v1683_v2 = vpop.f32.mrf.mxu3 }
 0x2cb   : > { %v1374_v22 = vpop.f32.mrf.mxu2 }
 0x2cc   : > { %v1432_v39 = vadd.f32 %v1374_v22, %v5093_v50  ;;  %4038 = vmatmul.msk.f32.gmra.mxu0 %vm310_vm0, %v5365_v32  ;;  %v2345_v22 = vld [vmem:[#allocation2 + $0x4f] sm:$0xff]  ;;  %v5600_v14 = vpop.f32.mrf.mxu0 }
 0x2ce   : > { %v5583_v30 = vadd.f32 %v1683_v2, %v1432_v39  ;;  %3984 = vmatmul.msk.f32.gmra.mxu3 %vm310_vm0, %v2653_v58  ;;  %v5596_v2 = vpop.f32.mrf.mxu1 }
 0x2d0   : > { %3952 = vmatmul.msk.f32.gmra.mxu2 %vm310_vm0, %v2376_v36 }
 0x2d1   : > { %v1686_v43 = vpop.f32.mrf.mxu3 }
 0x2d3   : > { %v1377_v50 = vpop.f32.mrf.mxu2 }
 0x2d4   : > { %v1433_v26 = vadd.f32 %v1377_v50, %v5114_v38  ;;  %4039 = vmatmul.msk.f32.gmra.mxu0 %vm310_vm0, %v5385_v56  ;;  %v2346_v38 = vld [vmem:[#allocation2 + $0x57] sm:$0xff]  ;;  %v3303_v50 = vld [vmem:[%s6123_s5] sm:$0xff] }
 0x2d5   : > { %3422 = vmatpush.msrb.mxu1 %v3303_v50 }
 0x2d6   : > { %v5594_v32 = vadd.f32 %v1686_v43, %v1433_v26  ;;  %3985 = vmatmul.msk.f32.gmra.mxu3 %vm310_vm0, %v2654_v45  ;;  %v2655_v43 = vld [vmem:[#allocation2 + $0x58] sm:$0xff]  ;;  %v2378_v26 = vsel %vm642_vm1, 0.0, %v2346_v38 }
 0x2d7   : > { %v2347_v38 = vld [vmem:[#allocation2 + $0x5f] sm:$0xff] }
 0x2d8   : > { %6187 = vst [vmem:[#allocation19_spill] sm:$0xff] %v5594_v32  ;;  %3953 = vmatmul.msk.f32.gmra.mxu2 %vm310_vm0, %v2345_v22 }
 0x2d9   : > { %v1689_v39 = vpop.f32.mrf.mxu3 }
 0x2db   : > { %v1380_v58 = vpop.f32.mrf.mxu2 }
 0x2dc   : > { %v1434_v36 = vadd.f32 %v1380_v58, %v5139_v52  ;;  %4040 = vmatmul.msk.f32.gmra.mxu0 %vm310_vm0, %v5406_v11  ;;  %v5614_v52 = vpop.f32.mrf.mxu1  ;;  %v6189_v11 = vld [vmem:[#allocation27_spill] sm:$0xff]  ;;  %v5617_v58 = vpop.f32.mrf.mxu0 }
 0x2de   : > { %v5605_v56 = vadd.f32 %v1689_v39, %v1434_v36  ;;  %3986 = vmatmul.msk.f32.gmra.mxu3 %vm310_vm0, %v2655_v43  ;;  %v2656_v43 = vld [vmem:[#allocation2 + $0x60] sm:$0xff] }
 0x2e0   : > { %6188 = vst [vmem:[#allocation14_spill] sm:$0xff] %v5605_v56  ;;  %3954 = vmatmul.msk.f32.gmra.mxu2 %vm310_vm0, %v2378_v26 }
 0x2e1   : > { %v1692_v45 = vpop.f32.mrf.mxu3 }
 0x2e3   : > { %v1383_v22 = vpop.f32.mrf.mxu2 }
 0x2e4   : > { %v1435_v39 = vadd.f32 %v1383_v22, %v6189_v11  ;;  %4041 = vmatmul.msk.f32.gmra.mxu0 %vm310_vm0, %v5426_v21  ;;  %v5625_v26 = vpop.f32.mrf.mxu1  ;;  %v2348_v22 = vld [vmem:[#allocation2 + $0x67] sm:$0xff] }
 0x2e5   : > { %v2380_v21 = vsel %vm642_vm1, 0.0, %v2348_v22  ;;  %v2350_v22 = vld [vmem:[#allocation2 + $0x77] sm:$0xff] }
 0x2e6   : > { %v5621_v36 = vadd.f32 %v1692_v45, %v1435_v39  ;;  %3987 = vmatmul.msk.f32.gmra.mxu3 %vm310_vm0, %v2656_v43 }
 0x2e8   : > { %6190 = vst [vmem:[#allocation6_spill] sm:$0xff] %v5621_v36  ;;  %3955 = vmatmul.msk.f32.gmra.mxu2 %vm310_vm0, %v2347_v38 }
 0x2e9   : > { %v1695_v50 = vpop.f32.mrf.mxu3 }
 0x2eb   : > { %v1386_v1 = vpop.f32.mrf.mxu2 }
 0x2ec   : > { %v1436_v5 = vadd.f32 %v1386_v1, %v6191_v10  ;;  %v5635_v38 = vpop.f32.mrf.mxu1  ;;  %v2658_v10 = vld [vmem:[#allocation2 + $0x70] sm:$0xff] }
 0x2ee   : > { %v5628_v11 = vadd.f32 %v1695_v50, %v1436_v5  ;;  %3988 = vmatmul.msk.f32.gmra.mxu3 %vm310_vm0, %v2657_v60  ;;  %v2349_v5 = vld [vmem:[#allocation2 + $0x6f] sm:$0xff] }
 0x2f0   : > { %6192 = vst [vmem:[#allocation17_spill] sm:$0xff] %v5628_v11  ;;  %3956 = vmatmul.msk.f32.gmra.mxu2 %vm310_vm0, %v2380_v21  ;;  %v2659_v11 = vld [vmem:[#allocation2 + $0x78] sm:$0xff] }
 0x2f1   : > { %v1698_v45 = vpop.f32.mrf.mxu3 }
 0x2f3   : > { %v1389_v39 = vpop.f32.mrf.mxu2 }
 0x2f4   : > { %v1437_v43 = vadd.f32 %v1389_v39, %v5187_v42  ;;  %v5644_v4 = vpop.f32.mrf.mxu1  ;;  %v2382_v42 = vsel %vm642_vm1, 0.0, %v2350_v22  ;;  %v2352_v22 = vld [vmem:[#allocation2 + $0x87] sm:$0xff] }
 0x2f6   : > { %v5637_v36 = vadd.f32 %v1698_v45, %v1437_v43  ;;  %3989 = vmatmul.msk.f32.gmra.mxu3 %vm310_vm0, %v2658_v10 }
 0x2f8   : > { %6193 = vst [vmem:[#allocation20_spill] sm:$0xff] %v5637_v36  ;;  %3957 = vmatmul.msk.f32.gmra.mxu2 %vm310_vm0, %v2349_v5  ;;  %v2351_v5 = vld [vmem:[#allocation2 + $0x7f] sm:$0xff] }
 0x2f9   : > { %v1701_v60 = vpop.f32.mrf.mxu3  ;;  %v2663_v36 = vld [vmem:[#allocation2 + $0x98] sm:$0xff] }
 0x2fb   : > { %v1392_v1 = vpop.f32.mrf.mxu2 }
 0x2fc   : > { %v1438_v50 = vadd.f32 %v1392_v1, %v5200_v16  ;;  %v2660_v16 = vld [vmem:[#allocation2 + $0x80] sm:$0xff] }
 0x2fe   : > { %v5642_v21 = vadd.f32 %v1701_v60, %v1438_v50  ;;  %3990 = vmatmul.msk.f32.gmra.mxu3 %vm310_vm0, %v2659_v11  ;;  %v5655_v60 = vpop.f32.mrf.mxu1 }
 0x300   : > { %6194 = vst [vmem:[#allocation27_spill] sm:$0xff] %v5642_v21  ;;  %3958 = vmatmul.msk.f32.gmra.mxu2 %vm310_vm0, %v2382_v42  ;;  %v2661_v21 = vld [vmem:[#allocation2 + $0x88] sm:$0xff] }
 0x301   : > { %v1704_v45 = vpop.f32.mrf.mxu3 }
 0x303   : > { %v1395_v39 = vpop.f32.mrf.mxu2 }
 0x304   : > { %v1439_v43 = vadd.f32 %v1395_v39, %v5216_v27  ;;  %v2384_v27 = vsel %vm642_vm1, 0.0, %v2352_v22  ;;  %v2354_v22 = vld [vmem:[#allocation2 + $0x97] sm:$0xff] }
 0x306   : > { %v5651_v10 = vadd.f32 %v1704_v45, %v1439_v43  ;;  %3991 = vmatmul.msk.f32.gmra.mxu3 %vm310_vm0, %v2660_v16  ;;  %v5664_v39 = vpop.f32.mrf.mxu1  ;;  %v6197_v16 = vld [vmem:[#allocation34_spill] sm:$0xff] }
 0x308   : > { %6195 = vst [vmem:[#allocation29_spill] sm:$0xff] %v5651_v10  ;;  %3959 = vmatmul.msk.f32.gmra.mxu2 %vm310_vm0, %v2351_v5 }
 0x309   : > { %v1707_v11 = vpop.f32.mrf.mxu3 }
 0x30b   : > { %v1398_v1 = vpop.f32.mrf.mxu2 }
 0x30c   : > { %v1440_v50 = vadd.f32 %v1398_v1, %v5230_v18  ;;  %v2662_v18 = vld [vmem:[#allocation2 + $0x90] sm:$0xff] }
 0x30e   : > { %v5658_v42 = vadd.f32 %v1707_v11, %v1440_v50  ;;  %3992 = vmatmul.msk.f32.gmra.mxu3 %vm310_vm0, %v2661_v21  ;;  %v2353_v11 = vld [vmem:[#allocation2 + $0x8f] sm:$0xff] }
 0x310   : > { %6196 = vst [vmem:[#allocation48_spill] sm:$0xff] %v5658_v42  ;;  %3960 = vmatmul.msk.f32.gmra.mxu2 %vm310_vm0, %v2384_v27  ;;  %v5672_v27 = vpop.f32.mrf.mxu1 }
 0x311   : > { %v1710_v45 = vpop.f32.mrf.mxu3 }
 0x313   : > { %v1401_v43 = vpop.f32.mrf.mxu2 }
 0x314   : > { %v1441_v5 = vadd.f32 %v1401_v43, %v6197_v16 }
 0x316   : > { %v5667_v10 = vadd.f32 %v1710_v45, %v1441_v5  ;;  %3993 = vmatmul.msk.f32.gmra.mxu3 %vm310_vm0, %v2662_v18  ;;  %v2386_v45 = vsel %vm642_vm1, 0.0, %v2354_v22  ;;  %v2356_v22 = vld [vmem:[#allocation2 + $0xa7] sm:$0xff] }
 0x318   : > { %6198 = vst [vmem:[#allocation34_spill] sm:$0xff] %v5667_v10  ;;  %3961 = vmatmul.msk.f32.gmra.mxu2 %vm310_vm0, %v2353_v11  ;;  %v5683_v11 = vpop.f32.mrf.mxu1 }
 0x319   : > { %v1713_v21 = vpop.f32.mrf.mxu3 }
 0x31b   : > { %v1404_v1 = vpop.f32.mrf.mxu2 }
 0x31c   : > { %v1442_v50 = vadd.f32 %v1404_v1, %v5266_v29  ;;  %v2664_v29 = vld [vmem:[#allocation2 + $0xa0] sm:$0xff] }
 0x31e   : > { %v5674_v42 = vadd.f32 %v1713_v21, %v1442_v50  ;;  %3994 = vmatmul.msk.f32.gmra.mxu3 %vm310_vm0, %v2663_v36  ;;  %v2355_v21 = vld [vmem:[#allocation2 + $0x9f] sm:$0xff] }
 0x320   : > { %6199 = vst [vmem:[#allocation49_spill] sm:$0xff] %v5674_v42  ;;  %3962 = vmatmul.msk.f32.gmra.mxu2 %vm310_vm0, %v2386_v45  ;;  %v2665_v42 = vld [vmem:[#allocation2 + $0xa8] sm:$0xff] }
 0x321   : > { %v1716_v43 = vpop.f32.mrf.mxu3 }
 0x323   : > { %v1407_v16 = vpop.f32.mrf.mxu2 }
 0x324   : > { %v1443_v5 = vadd.f32 %v1407_v16, %v5287_v61  ;;  %v6202_v61 = vld [vmem:[#allocation7_spill] sm:$0xff]  ;;  %v2388_v16 = vsel %vm642_vm1, 0.0, %v2356_v22  ;;  %v6204_v22 = vld [vmem:[#allocation8_spill] sm:$0xff] }
 0x326   : > { %v5681_v18 = vadd.f32 %v1716_v43, %v1443_v5  ;;  %3995 = vmatmul.msk.f32.gmra.mxu3 %vm310_vm0, %v2664_v29  ;;  %v1999_v43 = vadd.f32 %v6202_v61, %v5323_v23  ;;  %v5696_v5 = vpop.f32.mrf.mxu1  ;;  %v5704_v23 = vld [vmem:[%s6122_s4] ss:$0 sm:$0xff]  ;;  %v2000_v61 = vadd.f32 %v6204_v22, %v5341_v35 }
 0x328   : > { %6200 = vst [vmem:[#allocation50_spill] sm:$0xff] %v5681_v18  ;;  %3963 = vmatmul.msk.f32.gmra.mxu2 %vm310_vm0, %v2355_v21  ;;  %v6203_v21 = vld [vmem:[#allocation35_spill] sm:$0xff] }
 0x329   : > { %v1719_v36 = vpop.f32.mrf.mxu3  ;;  %v2308_v18 = vadd.f32 %v6203_v21, %v1999_v43 }
 0x32b   : > { %v1410_v1 = vpop.f32.mrf.mxu2 }
 0x32c   : > { %v1444_v50 = vadd.f32 %v1410_v1, %v5301_v17  ;;  %v5699_v1 = vpop.f32.mrf.mxu0 }
 0x32e   : > { %v5688_v45 = vadd.f32 %v1719_v36, %v1444_v50  ;;  %3996 = vmatmul.msk.f32.gmra.mxu3 %vm310_vm0, %v2665_v42  ;;  %v2666_v42 = vld [vmem:[#allocation2 + $0xb0] sm:$0xff] }
 0x330   : > { %6201 = vst [vmem:[#allocation51_spill] sm:$0xff] %v5688_v45  ;;  %3964 = vmatmul.msk.f32.gmra.mxu2 %vm310_vm0, %v2388_v16  ;;  %v2357_v16 = vld [vmem:[#allocation2 + $0xaf] sm:$0xff] }
 0x331   : > { %v2798_v29 = vpop.f32.mrf.mxu3 }
 0x333   : > { %v2521_v17 = vpop.f32.mrf.mxu2 }
 0x334   : > { %v2617_v36 = vadd.f32 %v2521_v17, %v2308_v18  ;;  %v5713_v17 = vpop.f32.mrf.mxu1  ;;  %v5715_v32 = vpop.f32.mrf.mxu0 }
 0x336   : > { %v2894_v50 = vadd.f32 %v2798_v29, %v2617_v36  ;;  %3997 = vmatmul.msk.f32.gmra.mxu3 %vm310_vm0, %v2666_v42  ;;  %v6205_v29 = vld [vmem:[#allocation37_spill] sm:$0xff]  ;;  %v2667_v42 = vld [vmem:[#allocation2 + $0xb8] sm:$0xff] }
 0x337   : > { %v2309_v21 = vadd.f32 %v6205_v29, %v2000_v61 }
 0x338   : > { %v3203_v45 = vadd.f32 %v5549_v15, %v2894_v50  ;;  %3965 = vmatmul.msk.f32.gmra.mxu2 %vm310_vm0, %v2357_v16  ;;  %v6206_v15 = vld [vmem:[#allocation10_spill] sm:$0xff] }
 0x339   : > { %v2801_v18 = vpop.f32.mrf.mxu3  ;;  %v2001_v50 = vadd.f32 %v6206_v15, %v5361_v48 }
 0x33a   : > { %v3239_v43 = vadd.f32 %v5704_v23, %v3203_v45  ;;  %v2390_v45 = vsel %vm642_vm1, 0.0, %v2358_v55  ;;  %v6208_v55 = vld [vmem:[#allocation12_spill] sm:$0xff] }
 0x33b   : > { %v2524_v36 = vpop.f32.mrf.mxu2 }
 0x33c   : > { %v3271_v10 = vmax.f32 %v3239_v43, 0.0  ;;  %v2618_v56 = vadd.f32 %v2524_v36, %v2309_v21  ;;  %v6207_v43 = vld [vmem:[#allocation39_spill] sm:$0xff]  ;;  %v5727_v21 = vpop.f32.mrf.mxu1  ;;  %v2668_v36 = vld [vmem:[#allocation2 + $0xc0] sm:$0xff] }
 0x33e   : > { %v2895_v35 = vadd.f32 %v2801_v18, %v2618_v56  ;;  %4044 = vmatmul.msk.f32.vlgmr.msrb.gmra.mxu1 %vm310_vm0, %v3271_v10  ;;  %3998 = vmatmul.msk.f32.gmra.mxu3 %vm310_vm0, %v2667_v42  ;;  %v2310_v56 = vadd.f32 %v6207_v43, %v2001_v50  ;;  %v2002_v42 = vadd.f32 %v6208_v55, %v5377_v51  ;;  %v2669_v51 = vld [vmem:[#allocation2 + $0xc8] sm:$0xff] }
 0x340   : > { %v3204_v22 = vadd.f32 %v5559_v13, %v2895_v35  ;;  %3966 = vmatmul.msk.f32.gmra.mxu2 %vm310_vm0, %v2390_v45  ;;  %v2359_v13 = vld [vmem:[#allocation2 + $0xbf] sm:$0xff]  ;;  %v5733_v35 = vpop.f32.mrf.mxu0 }
 0x341   : > { %v2804_v16 = vpop.f32.mrf.mxu3 }
 0x342   : > { %v3240_v61 = vadd.f32 %v5704_v23, %v3204_v22  ;;  %v2311_v22 = vadd.f32 %v5329_v49, %v2002_v42 }
 0x343   : > { %v2527_v18 = vpop.f32.mrf.mxu2 }
 0x344   : > { %v2619_v10 = vadd.f32 %v2527_v18, %v2310_v56  ;;  %v3272_v29 = vmax.f32 %v3240_v61, 0.0  ;;  %v2360_v56 = vld [vmem:[#allocation2 + $0xc7] sm:$0xff] }
 0x346   : > { %v2896_v48 = vadd.f32 %v2804_v16, %v2619_v10  ;;  %4045 = vmatmul.msk.f32.gmra.mxu1 %vm310_vm0, %v3272_v29  ;;  %3999 = vmatmul.msk.f32.gmra.mxu3 %vm310_vm0, %v2668_v36  ;;  %v6209_v10 = vld [vmem:[#allocation15_spill] sm:$0xff]  ;;  %v5742_v36 = vpop.f32.mrf.mxu1 }
 0x347   : > { %v2003_v29 = vadd.f32 %v6209_v10, %v5402_v34 }
 0x348   : > { %v3205_v15 = vadd.f32 %v5574_v6, %v2896_v48  ;;  %3967 = vmatmul.msk.f32.gmra.mxu2 %vm310_vm0, %v2359_v13  ;;  %v2392_v6 = vsel %vm642_vm1, 0.0, %v2360_v56  ;;  %v5749_v48 = vpop.f32.mrf.mxu0 }
 0x349   : > { %v2807_v45 = vpop.f32.mrf.mxu3  ;;  %v2312_v13 = vadd.f32 %v5355_v59, %v2003_v29 }
 0x34a   : > { %v3241_v50 = vadd.f32 %v5704_v23, %v3205_v15 }
 0x34b   : > { %v2530_v61 = vpop.f32.mrf.mxu2 }
 0x34c   : > { %v2620_v16 = vadd.f32 %v2530_v61, %v2311_v22  ;;  %v3273_v43 = vmax.f32 %v3241_v50, 0.0  ;;  %v2670_v22 = vld [vmem:[#allocation2 + $0xd0] sm:$0xff] }
 0x34d   : > { %v6210_v61 = vld [vmem:[#allocation18_spill] sm:$0xff] }
 0x34e   : > { %v2897_v18 = vadd.f32 %v2807_v45, %v2620_v16  ;;  %4046 = vmatmul.msk.f32.gmra.mxu1 %vm310_vm0, %v3273_v43  ;;  %4000 = vmatmul.msk.f32.gmra.mxu3 %vm310_vm0, %v2669_v51  ;;  %v2004_v16 = vadd.f32 %v6210_v61, %v5417_v19  ;;  %v5759_v56 = vpop.f32.mrf.mxu1  ;;  %v2362_v19 = vld [vmem:[#allocation2 + $0xd7] sm:$0xff] }
 0x350   : > { %v3206_v49 = vadd.f32 %v5589_v31, %v2897_v18  ;;  %3968 = vmatmul.msk.f32.gmra.mxu2 %vm310_vm0, %v2392_v6  ;;  %v2361_v31 = vld [vmem:[#allocation2 + $0xcf] sm:$0xff]  ;;  %v2313_v51 = vadd.f32 %v5373_v8, %v2004_v16  ;;  %v5763_v29 = vpop.f32.mrf.mxu0 }
 0x351   : > { %v2810_v42 = vpop.f32.mrf.mxu3 }
 0x352   : > { %v3242_v55 = vadd.f32 %v5704_v23, %v3206_v49 }
 0x353   : > { %v2533_v15 = vpop.f32.mrf.mxu2 }
 0x354   : > { %v2621_v34 = vadd.f32 %v2533_v15, %v2312_v13  ;;  %v3274_v50 = vmax.f32 %v3242_v55, 0.0  ;;  %v2394_v15 = vsel %vm642_vm1, 0.0, %v2362_v19 }
 0x356   : > { %v2898_v45 = vadd.f32 %v2810_v42, %v2621_v34  ;;  %4047 = vmatmul.msk.f32.gmra.mxu1 %vm310_vm0, %v3274_v50  ;;  %4001 = vmatmul.msk.f32.gmra.mxu3 %vm310_vm0, %v2670_v22  ;;  %v2671_v42 = vld [vmem:[#allocation2 + $0xd8] sm:$0xff]  ;;  %v5775_v22 = vpop.f32.mrf.mxu1 }
 0x358   : > { %v3207_v43 = vadd.f32 %v5600_v14, %v2898_v45  ;;  %3969 = vmatmul.msk.f32.gmra.mxu2 %vm310_vm0, %v2361_v31  ;;  %v6211_v14 = vld [vmem:[#allocation21_spill] sm:$0xff] }
 0x359   : > { %v2813_v18 = vpop.f32.mrf.mxu3  ;;  %v2005_v13 = vadd.f32 %v6211_v14, %v5439_v62  ;;  %v5777_v62 = vpop.f32.mrf.mxu0  ;;  %v2364_v14 = vld [vmem:[#allocation2 + $0xe7] sm:$0xff] }
 0x35a   : > { %v3243_v59 = vadd.f32 %v5704_v23, %v3207_v43 }
 0x35b   : > { %v2536_v10 = vpop.f32.mrf.mxu2  ;;  %v2314_v45 = vadd.f32 %v5400_v37, %v2005_v13 }
 0x35c   : > { %v2622_v6 = vadd.f32 %v2536_v10, %v2313_v51  ;;  %v3275_v49 = vmax.f32 %v3243_v59, 0.0  ;;  %v2672_v59 = vld [vmem:[#allocation2 + $0xe0] sm:$0xff] }
 0x35d   : > { %v2363_v51 = vld [vmem:[#allocation2 + $0xdf] sm:$0xff] }
 0x35e   : > { %v2899_v55 = vadd.f32 %v2813_v18, %v2622_v6  ;;  %4048 = vmatmul.msk.f32.gmra.mxu1 %vm310_vm0, %v3275_v49  ;;  %4002 = vmatmul.msk.f32.gmra.mxu3 %vm310_vm0, %v2671_v42  ;;  %v5787_v13 = vpop.f32.mrf.mxu1 }
 0x360   : > { %v3208_v8 = vadd.f32 %v5617_v58, %v2899_v55  ;;  %3970 = vmatmul.msk.f32.gmra.mxu2 %vm310_vm0, %v2394_v15  ;;  %v6212_v58 = vld [vmem:[#allocation22_spill] sm:$0xff] }
 0x361   : > { %v2816_v50 = vpop.f32.mrf.mxu3  ;;  %v2006_v18 = vadd.f32 %v6212_v58, %v5450_v28  ;;  %v2673_v28 = vld [vmem:[#allocation2 + $0xe8] sm:$0xff]  ;;  %v2674_v58 = vld [vmem:[#allocation2 + $0xf0] sm:$0xff] }
 0x362   : > { %v3244_v34 = vadd.f32 %v5704_v23, %v3208_v8  ;;  %v6213_v8 = vld [vmem:[#allocation23_spill] sm:$0xff] }
 0x363   : > { %v2539_v61 = vpop.f32.mrf.mxu2  ;;  %v2315_v49 = vadd.f32 %v5428_v20, %v2006_v18  ;;  %v6214_v18 = vld [vmem:[#allocation24_spill] sm:$0xff] }
 0x364   : > { %v2623_v16 = vadd.f32 %v2539_v61, %v2314_v45  ;;  %v3276_v31 = vmax.f32 %v3244_v34, 0.0  ;;  %v2396_v34 = vsel %vm642_vm1, 0.0, %v2364_v14 }
 0x366   : > { %v2900_v43 = vadd.f32 %v2816_v50, %v2623_v16  ;;  %4049 = vmatmul.msk.f32.gmra.mxu1 %vm310_vm0, %v3276_v31  ;;  %4003 = vmatmul.msk.f32.gmra.mxu3 %vm310_vm0, %v2672_v59  ;;  %v5795_v50 = vpop.f32.mrf.mxu0 }
 0x368   : > { %v3209_v10 = vadd.f32 %v5699_v1, %v2900_v43  ;;  %3971 = vmatmul.msk.f32.gmra.mxu2 %vm310_vm0, %v2363_v51  ;;  %v2007_v1 = vadd.f32 %v6213_v8, %v5459_v44  ;;  %v2008_v51 = vadd.f32 %v6214_v18, %v5470_v7  ;;  %v2366_v7 = vld [vmem:[#allocation2 + $0xf7] sm:$0xff]  ;;  %v6215_v8 = vld [vmem:[#allocation25_spill] sm:$0xff]  ;;  %v2367_v18 = vld [vmem:[#allocation2 + $0xff] sm:$0xff] }
 0x369   : > { %v2819_v6 = vpop.f32.mrf.mxu3 }
 0x36a   : > { %v3245_v37 = vadd.f32 %v5704_v23, %v3209_v10  ;;  %v2316_v16 = vadd.f32 %v5579_v24, %v2007_v1  ;;  %v5804_v10 = vpop.f32.mrf.mxu1  ;;  %v2398_v1 = vsel %vm642_vm1, 0.0, %v2366_v7  ;;  %v6217_v7 = vld [vmem:[#allocation28_spill] sm:$0xff] }
 0x36b   : > { %v2542_v19 = vpop.f32.mrf.mxu2 }
 0x36c   : > { %v2624_v55 = vadd.f32 %v2542_v19, %v2315_v49  ;;  %v3277_v42 = vmax.f32 %v3245_v37, 0.0  ;;  %v2317_v19 = vadd.f32 %v5596_v2, %v2008_v51 }
 0x36e   : > { %v2901_v15 = vadd.f32 %v2819_v6, %v2624_v55  ;;  %4050 = vmatmul.msk.f32.gmra.mxu1 %vm310_vm0, %v3277_v42  ;;  %4004 = vmatmul.msk.f32.gmra.mxu3 %vm310_vm0, %v2673_v28  ;;  %v5809_v24 = vpop.f32.mrf.mxu0  ;;  %v2675_v28 = vld [vmem:[#allocation2 + $0xf8] sm:$0xff] }
 0x370   : > { %v3210_v20 = vadd.f32 %v5715_v32, %v2901_v15  ;;  %3972 = vmatmul.msk.f32.gmra.mxu2 %vm310_vm0, %v2396_v34  ;;  %v2365_v32 = vld [vmem:[#allocation2 + $0xef] sm:$0xff] }
 0x371   : > { %v2822_v61 = vpop.f32.mrf.mxu3 }
 0x372   : > { %v3246_v45 = vadd.f32 %v5704_v23, %v3210_v20  ;;  %v5821_v2 = vpop.f32.mrf.mxu1 }
 0x373   : > { %v2545_v31 = vpop.f32.mrf.mxu2 }
 0x374   : > { %v2625_v43 = vadd.f32 %v2545_v31, %v2316_v16  ;;  %v3278_v59 = vmax.f32 %v3246_v45, 0.0 }
 0x376   : > { %v2902_v44 = vadd.f32 %v2822_v61, %v2625_v43  ;;  %4051 = vmatmul.msk.f32.gmra.mxu1 %vm310_vm0, %v3278_v59  ;;  %4005 = vmatmul.msk.f32.gmra.mxu3 %vm310_vm0, %v2674_v58  ;;  %v5825_v31 = vpop.f32.mrf.mxu0 }
 0x378   : > { %v3211_v37 = vadd.f32 %v5733_v35, %v2902_v44  ;;  %3973 = vmatmul.msk.f32.gmra.mxu2 %vm310_vm0, %v2365_v32  ;;  %v2009_v35 = vadd.f32 %v6215_v8, %v5481_v9  ;;  %v2676_v44 = vld [vmem:[#allocation2 + $0x100] sm:$0xff] }
 0x379   : > { %v2825_v49 = vpop.f32.mrf.mxu3 }
 0x37a   : > { %v3247_v6 = vadd.f32 %v5704_v23, %v3211_v37  ;;  %v2318_v61 = vadd.f32 %v5614_v52, %v2009_v35 }
 0x37b   : > { %v2548_v55 = vpop.f32.mrf.mxu2 }
 0x37c   : > { %v3279_v42 = vmax.f32 %v3247_v6, 0.0  ;;  %v2626_v14 = vadd.f32 %v2548_v55, %v2317_v19  ;;  %v5835_v6 = vpop.f32.mrf.mxu1 }
 0x37e   : > { %v2903_v15 = vadd.f32 %v2825_v49, %v2626_v14  ;;  %4052 = vmatmul.msk.f32.gmra.mxu1 %vm310_vm0, %v3279_v42  ;;  %4006 = vmatmul.msk.f32.gmra.mxu3 %vm310_vm0, %v2675_v28  ;;  %v2956_v42 = vld [vmem:[#allocation2 + $0x119] sm:$0xff] }
 0x37f   : > { %4042 = vmatmul.msk.f32.gmra.mxu0 %vm310_vm0, %v2956_v42 }
 0x380   : > { %v3212_v34 = vadd.f32 %v5749_v48, %v2903_v15  ;;  %3974 = vmatmul.msk.f32.gmra.mxu2 %vm310_vm0, %v2398_v1  ;;  %v6216_v48 = vld [vmem:[#allocation26_spill] sm:$0xff]  ;;  %v2011_v15 = vadd.f32 %v6217_v7, %v5503_v57  ;;  %v2680_v7 = vld [vmem:[#allocation2 + $0x120] sm:$0xff] }
 0x381   : > { %v2828_v45 = vpop.f32.mrf.mxu3  ;;  %v2010_v58 = vadd.f32 %v6216_v48, %v5492_v47  ;;  %v5838_v47 = vpop.f32.mrf.mxu0 }
 0x382   : > { %v3248_v20 = vadd.f32 %v5704_v23, %v3212_v34  ;;  %v2320_v35 = vadd.f32 %v5635_v38, %v2011_v15  ;;  %v2957_v34 = vld [vmem:[#allocation2 + $0x121] sm:$0xff] }
 0x383   : > { %v2551_v16 = vpop.f32.mrf.mxu2  ;;  %v2319_v37 = vadd.f32 %v5625_v26, %v2010_v58  ;;  %v2371_v15 = vld [vmem:[#allocation2 + $0x11f] sm:$0xff] }
 0x384   : > { %v3280_v9 = vmax.f32 %v3248_v20, 0.0  ;;  %v2627_v43 = vadd.f32 %v2551_v16, %v2318_v61  ;;  %v2989_v61 = vsel %vm1167_vm2, 0.0, %v2957_v34  ;;  %v5851_v57 = vpop.f32.mrf.mxu1  ;;  %v6218_v16 = vld [vmem:[#allocation30_spill] sm:$0xff] }
 0x386   : > { %v2904_v59 = vadd.f32 %v2828_v45, %v2627_v43  ;;  %4053 = vmatmul.msk.f32.gmra.mxu1 %vm310_vm0, %v3280_v9  ;;  %4007 = vmatmul.msk.f32.gmra.mxu3 %vm310_vm0, %v2676_v44  ;;  %v2012_v9 = vadd.f32 %v6218_v16, %v5512_v33  ;;  %v6219_v33 = vld [vmem:[#allocation31_spill] sm:$0xff] }
 0x387   : > { %4043 = vmatmul.msk.f32.gmra.mxu0 %vm310_vm0, %v2989_v61 }
 0x388   : > { %v3213_v51 = vadd.f32 %v5763_v29, %v2904_v59  ;;  %3975 = vmatmul.msk.f32.gmra.mxu2 %vm310_vm0, %v2367_v18  ;;  %v2677_v29 = vld [vmem:[#allocation2 + $0x108] sm:$0xff]  ;;  %v2321_v44 = vadd.f32 %v5644_v4, %v2012_v9 }
 0x389   : > { %v2831_v32 = vpop.f32.mrf.mxu3  ;;  %v3155_v38 = vpop.f32.mrf.mxu0 }
 0x38a   : > { %v3249_v52 = vadd.f32 %v5704_v23, %v3213_v51  ;;  %v2370_v51 = vld [vmem:[#allocation2 + $0x117] sm:$0xff] }
 0x38b   : > { %v2554_v49 = vpop.f32.mrf.mxu2 }
 0x38c   : > { %v3281_v19 = vmax.f32 %v3249_v52, 0.0  ;;  %v2628_v55 = vadd.f32 %v2554_v49, %v2319_v37  ;;  %v2679_v52 = vld [vmem:[#allocation2 + $0x118] sm:$0xff]  ;;  %v2013_v37 = vadd.f32 %v6219_v33, %v5530_v41 }
 0x38e   : > { %v2905_v14 = vadd.f32 %v2831_v32, %v2628_v55  ;;  %4054 = vmatmul.msk.f32.gmra.mxu1 %vm310_vm0, %v3281_v19  ;;  %4008 = vmatmul.msk.f32.gmra.mxu3 %vm310_vm0, %v2677_v29  ;;  %v2322_v42 = vadd.f32 %v5655_v60, %v2013_v37 }
 0x390   : > { %v3214_v26 = vadd.f32 %v5777_v62, %v2905_v14  ;;  %3976 = vmatmul.msk.f32.gmra.mxu2 %vm310_vm0, %v5516_v46  ;;  %v2678_v46 = vld [vmem:[#allocation2 + $0x110] sm:$0xff] }
 0x391   : > { %v2834_v8 = vpop.f32.mrf.mxu3  ;;  %v3158_v49 = vpop.f32.mrf.mxu0 }
 0x392   : > { %v3250_v28 = vadd.f32 %v5704_v23, %v3214_v26 }
 0x393   : > { %v2557_v1 = vpop.f32.mrf.mxu2 }
 0x394   : > { %v3282_v20 = vmax.f32 %v3250_v28, 0.0  ;;  %v2629_v45 = vadd.f32 %v2557_v1, %v2320_v35  ;;  %v2014_v28 = vadd.f32 %v6220_v63, %v5543_v12  ;;  %v6221_v12 = vld [vmem:[#allocation33_spill] sm:$0xff] }
 0x396   : > { %v2906_v62 = vadd.f32 %v2834_v8, %v2629_v45  ;;  %4055 = vmatmul.msk.f32.gmra.mxu1 %vm310_vm0, %v3282_v20  ;;  %4009 = vmatmul.msk.f32.gmra.mxu3 %vm310_vm0, %v2678_v46  ;;  %v2323_v1 = vadd.f32 %v5664_v39, %v2014_v28 }
 0x398   : > { %v3215_v43 = vadd.f32 %v5795_v50, %v2906_v62  ;;  %3977 = vmatmul.msk.f32.gmra.mxu2 %vm310_vm0, %v5532_v25  ;;  %v5866_v50 = vpop.f32.mrf.mxu1  ;;  %v2402_v25 = vsel %vm642_vm1, 0.0, %v2370_v51  ;;  %v5899_v51 = vld [vmem:[%s6124_s6] ss:$0 sm:$0xff] }
 0x399   : > { %v2837_v59 = vpop.f32.mrf.mxu3  ;;  %v3161_v20 = vpop.f32.mrf.mxu0 }
 0x39a   : > { %v3251_v40 = vadd.f32 %v5704_v23, %v3215_v43 }
 0x39b   : > { %v2560_v48 = vpop.f32.mrf.mxu2 }
 0x39c   : > { %v3283_v58 = vmax.f32 %v3251_v40, 0.0  ;;  %v2630_v18 = vadd.f32 %v2560_v48, %v2321_v44 }
 0x39e   : > { %v2907_v32 = vadd.f32 %v2837_v59, %v2630_v18  ;;  %4056 = vmatmul.msk.f32.gmra.mxu1 %vm310_vm0, %v3283_v58  ;;  %4010 = vmatmul.msk.f32.gmra.mxu3 %vm310_vm0, %v2679_v52 }
 0x3a0   : > { %v3216_v4 = vadd.f32 %v5809_v24, %v2907_v32  ;;  %3978 = vmatmul.msk.f32.gmra.mxu2 %vm310_vm0, %v2402_v25  ;;  %v5881_v8 = vpop.f32.mrf.mxu1  ;;  %v3520_v25 = vld [vmem:[%s4422_s23] sm:$0xff] }
 0x3a1   : > { %v2840_v55 = vpop.f32.mrf.mxu3  ;;  %v3164_v48 = vpop.f32.mrf.mxu0 }
 0x3a2   : > { %v3252_v19 = vadd.f32 %v5704_v23, %v3216_v4 }
 0x3a3   : > { %v2563_v14 = vpop.f32.mrf.mxu2 }
 0x3a4   : > { %v3284_v29 = vmax.f32 %v3252_v19, 0.0  ;;  %v2631_v41 = vadd.f32 %v2563_v14, %v2322_v42  ;;  %v6223_v42 = vld [vmem:[#allocation38_spill] sm:$0xff] }
 0x3a5   : > { %v2017_v14 = vadd.f32 %v6223_v42, %v5572_v0 }
 0x3a6   : > { %v2908_v26 = vadd.f32 %v2840_v55, %v2631_v41  ;;  %4057 = vmatmul.msk.f32.gmra.mxu1 %vm310_vm0, %v3284_v29  ;;  %4011 = vmatmul.msk.f32.gmra.mxu3 %vm310_vm0, %v2680_v7 }
 0x3a8   : > { %v3217_v24 = vadd.f32 %v5825_v31, %v2908_v26  ;;  %3979 = vmatmul.msk.f32.gmra.mxu2 %vm310_vm0, %v2371_v15  ;;  %v2015_v31 = vadd.f32 %v6221_v12, %v5554_v53  ;;  %v5891_v40 = vpop.f32.mrf.mxu1  ;;  %v6222_v53 = vld [vmem:[#allocation36_spill] sm:$0xff]  ;;  %v2326_v26 = vadd.f32 %v5696_v5, %v2017_v14 }
 0x3a9   : > { %v2843_v35 = vpop.f32.mrf.mxu3  ;;  %v2016_v18 = vadd.f32 %v6222_v53, %v5563_v54  ;;  %v3167_v29 = vpop.f32.mrf.mxu0 }
 0x3aa   : > { %v3253_v60 = vadd.f32 %v5704_v23, %v3217_v24  ;;  %v2324_v43 = vadd.f32 %v5672_v27, %v2015_v31  ;;  %v3521_v24 = vld [vmem:[%s4422_s23 + $0x8] sm:$0xff] }
 0x3ab   : > { %v2566_v34 = vpop.f32.mrf.mxu2  ;;  %v2325_v32 = vadd.f32 %v5683_v11, %v2016_v18 }
 0x3ac   : > { %v3285_v45 = vmax.f32 %v3253_v60, 0.0  ;;  %v2632_v61 = vadd.f32 %v2566_v34, %v2323_v1  ;;  %v2018_v34 = vadd.f32 %v5317_v3, %v5583_v30  ;;  %v6224_v30 = vld [vmem:[#allocation19_spill] sm:$0xff] }
 0x3ae   : > { %v2909_v62 = vadd.f32 %v2843_v35, %v2632_v61  ;;  %4058 = vmatmul.msk.f32.gmra.mxu1 %vm310_vm0, %v3285_v45  ;;  %v2327_v31 = vadd.f32 %v5713_v17, %v2018_v34 }
 0x3b0   : > { %v3218_v46 = vadd.f32 %v5838_v47, %v2909_v62 }
 0x3b1   : > { %v2846_v9 = vpop.f32.mrf.mxu3  ;;  %v3170_v62 = vpop.f32.mrf.mxu0 }
 0x3b2   : > { %v3254_v16 = vadd.f32 %v5704_v23, %v3218_v46 }
 0x3b3   : > { %v2569_v39 = vpop.f32.mrf.mxu2 }
 0x3b4   : > { %v3286_v59 = vmax.f32 %v3254_v16, 0.0  ;;  %v2633_v44 = vadd.f32 %v2569_v39, %v2324_v43 }
 0x3b6   : > { %v2910_v58 = vadd.f32 %v2846_v9, %v2633_v44  ;;  %4059 = vmatmul.msk.f32.gmra.mxu1 %vm310_vm0, %v3286_v59  ;;  %v3522_v9 = vld [vmem:[%s4422_s23 + $0x10] sm:$0xff] }
 0x3b8   : > { %v3219_v47 = vadd.f32 %v3155_v38, %v2910_v58 }
 0x3b9   : > { %v2849_v52 = vpop.f32.mrf.mxu3 }
 0x3ba   : > { %v3255_v27 = vadd.f32 %v5704_v23, %v3219_v47 }
 0x3bb   : > { %v2572_v33 = vpop.f32.mrf.mxu2  ;;  %v3424_v37 = vpop.f32.mrf.mxu1 }
 0x3bc   : > { %v3287_v4 = vmax.f32 %v3255_v27, 0.0  ;;  %v2634_v19 = vadd.f32 %v2572_v33, %v2325_v32  ;;  %v3425_v54 = vadd.f32 %v5899_v51, %v3424_v37  ;;  %v3523_v33 = vld [vmem:[%s4422_s23 + $0x18] sm:$0xff]  ;;  %v3173_v37 = vpop.f32.mrf.mxu0 }
 0x3be   : > { %v2911_v38 = vadd.f32 %v2849_v52, %v2634_v19  ;;  %v3552_v55 = vadd.f32 %v3520_v25, %v3425_v54  ;;  %4060 = vmatmul.msk.f32.gmra.mxu1 %vm310_vm0, %v3287_v4 }
 0x3c0   : > { %v3220_v41 = vadd.f32 %v3158_v49, %v2911_v38  ;;  %v3584_v11 = vmax.f32 %v3552_v55, 0.0  ;;  %v6227_v55 = vld [vmem:[#allocation41_spill] sm:$0xff] }
 0x3c1   : > { %v2852_v15 = vpop.f32.mrf.mxu3 }
 0x3c2   : > { %v3256_v7 = vadd.f32 %v5704_v23, %v3220_v41  ;;  %3616 = vst [vmem:[%s5912_s17] sm:$0xff] %v3584_v11 }
 0x3c3   : > { %v2575_v63 = vpop.f32.mrf.mxu2  ;;  %v3427_v28 = vpop.f32.mrf.mxu1 }
 0x3c4   : > { %v3288_v60 = vmax.f32 %v3256_v7, 0.0  ;;  %v2635_v35 = vadd.f32 %v2575_v63, %v2326_v26  ;;  %v3428_v0 = vadd.f32 %v5899_v51, %v3427_v28  ;;  %v3524_v63 = vld [vmem:[%s4422_s23 + $0x20] sm:$0xff] }
 0x3c6   : > { %v2912_v49 = vadd.f32 %v2852_v15, %v2635_v35  ;;  %v3553_v1 = vadd.f32 %v3521_v24, %v3428_v0  ;;  %4061 = vmatmul.msk.f32.gmra.mxu1 %vm310_vm0, %v3288_v60  ;;  %v3176_v35 = vpop.f32.mrf.mxu0 }
 0x3c8   : > { %v3221_v45 = vadd.f32 %v3161_v20, %v2912_v49  ;;  %v3585_v61 = vmax.f32 %v3553_v1, 0.0  ;;  %v6225_v20 = vld [vmem:[#allocation40_spill] sm:$0xff]  ;;  %v6229_v1 = vld [vmem:[#allocation42_spill] sm:$0xff] }
 0x3c9   : > { %v2855_v12 = vpop.f32.mrf.mxu3  ;;  %v2019_v58 = vadd.f32 %v6225_v20, %v6224_v30 }
 0x3ca   : > { %v3257_v5 = vadd.f32 %v5704_v23, %v3221_v45  ;;  %3617 = vst [vmem:[%s5912_s17 + $0x8] sm:$0xff] %v3585_v61 }
 0x3cb   : > { %v2578_v46 = vpop.f32.mrf.mxu2  ;;  %v3430_v16 = vpop.f32.mrf.mxu1  ;;  %v2328_v27 = vadd.f32 %v5727_v21, %v2019_v58 }
 0x3cc   : > { %v3289_v43 = vmax.f32 %v3257_v5, 0.0  ;;  %v2636_v39 = vadd.f32 %v2578_v46, %v2327_v31  ;;  %v3431_v59 = vadd.f32 %v5899_v51, %v3430_v16  ;;  %v3525_v16 = vld [vmem:[%s4422_s23 + $0x28] sm:$0xff] }
 0x3ce   : > { %v2913_v44 = vadd.f32 %v2855_v12, %v2636_v39  ;;  %v3554_v3 = vadd.f32 %v3522_v9, %v3431_v59  ;;  %4062 = vmatmul.msk.f32.gmra.mxu1 %vm310_vm0, %v3289_v43  ;;  %v3179_v20 = vpop.f32.mrf.mxu0 }
 0x3d0   : > { %v3222_v53 = vadd.f32 %v3164_v48, %v2913_v44  ;;  %v3586_v18 = vmax.f32 %v3554_v3, 0.0  ;;  %v6226_v48 = vld [vmem:[#allocation14_spill] sm:$0xff]  ;;  %v6231_v3 = vld [vmem:[#allocation43_spill] sm:$0xff] }
 0x3d1   : > { %v2858_v17 = vpop.f32.mrf.mxu3  ;;  %v2020_v42 = vadd.f32 %v6227_v55, %v6226_v48 }
 0x3d2   : > { %v3258_v47 = vadd.f32 %v5704_v23, %v3222_v53  ;;  %3618 = vst [vmem:[%s5912_s17 + $0x10] sm:$0xff] %v3586_v18 }
 0x3d3   : > { %v2581_v52 = vpop.f32.mrf.mxu2  ;;  %v3433_v32 = vpop.f32.mrf.mxu1  ;;  %v2329_v7 = vadd.f32 %v5742_v36, %v2020_v42 }
 0x3d4   : > { %v3290_v25 = vmax.f32 %v3258_v47, 0.0  ;;  %v2637_v4 = vadd.f32 %v2581_v52, %v2328_v27  ;;  %v3434_v19 = vadd.f32 %v5899_v51, %v3433_v32  ;;  %v3526_v52 = vld [vmem:[%s4422_s23 + $0x30] sm:$0xff] }
 0x3d6   : > { %v2914_v54 = vadd.f32 %v2858_v17, %v2637_v4  ;;  %v3555_v38 = vadd.f32 %v3523_v33, %v3434_v19  ;;  %4063 = vmatmul.msk.f32.gmra.mxu1 %vm310_vm0, %v3290_v25  ;;  %v3182_v42 = vpop.f32.mrf.mxu0 }
 0x3d8   : > { %v3223_v14 = vadd.f32 %v3167_v29, %v2914_v54  ;;  %v3587_v41 = vmax.f32 %v3555_v38, 0.0  ;;  %v6228_v29 = vld [vmem:[#allocation6_spill] sm:$0xff]  ;;  %v6233_v54 = vld [vmem:[#allocation44_spill] sm:$0xff] }
 0x3d9   : > { %v2861_v11 = vpop.f32.mrf.mxu3  ;;  %v2021_v34 = vadd.f32 %v6229_v1, %v6228_v29 }
 0x3da   : > { %v3259_v21 = vadd.f32 %v5704_v23, %v3223_v14  ;;  %3619 = vst [vmem:[%s5912_s17 + $0x18] sm:$0xff] %v3587_v41 }
 0x3db   : > { %v2584_v15 = vpop.f32.mrf.mxu2  ;;  %v3436_v26 = vpop.f32.mrf.mxu1  ;;  %v2330_v12 = vadd.f32 %v5759_v56, %v2021_v34 }
 0x3dc   : > { %v3291_v28 = vmax.f32 %v3259_v21, 0.0  ;;  %v2638_v24 = vadd.f32 %v2584_v15, %v2329_v7  ;;  %v3437_v60 = vadd.f32 %v5899_v51, %v3436_v26  ;;  %v3527_v7 = vld [vmem:[%s4422_s23 + $0x38] sm:$0xff] }
 0x3de   : > { %v2915_v0 = vadd.f32 %v2861_v11, %v2638_v24  ;;  %v3556_v49 = vadd.f32 %v3524_v63, %v3437_v60  ;;  %4064 = vmatmul.msk.f32.gmra.mxu1 %vm310_vm0, %v3291_v28  ;;  %v6234_v60 = vld [vmem:[#allocation27_spill] sm:$0xff] }
 0x3e0   : > { %v3224_v45 = vadd.f32 %v3170_v62, %v2915_v0  ;;  %v3588_v61 = vmax.f32 %v3556_v49, 0.0  ;;  %v6230_v62 = vld [vmem:[#allocation17_spill] sm:$0xff] }
 0x3e1   : > { %v2864_v5 = vpop.f32.mrf.mxu3  ;;  %v2022_v30 = vadd.f32 %v6231_v3, %v6230_v62 }
 0x3e2   : > { %v3260_v36 = vadd.f32 %v5704_v23, %v3224_v45  ;;  %3620 = vst [vmem:[%s5912_s17 + $0x20] sm:$0xff] %v3588_v61 }
 0x3e3   : > { %v2587_v31 = vpop.f32.mrf.mxu2  ;;  %v3439_v46 = vpop.f32.mrf.mxu1  ;;  %v2331_v47 = vadd.f32 %v5775_v22, %v2022_v30 }
 0x3e4   : > { %v3292_v9 = vmax.f32 %v3260_v36, 0.0  ;;  %v2639_v43 = vadd.f32 %v2587_v31, %v2330_v12  ;;  %v3440_v39 = vadd.f32 %v5899_v51, %v3439_v46  ;;  %v3528_v36 = vld [vmem:[%s4422_s23 + $0x40] sm:$0xff] }
 0x3e6   : > { %v2916_v59 = vadd.f32 %v2864_v5, %v2639_v43  ;;  %v3557_v44 = vadd.f32 %v3525_v16, %v3440_v39  ;;  %4065 = vmatmul.msk.f32.gmra.mxu1 %vm310_vm0, %v3292_v9  ;;  %v3185_v5 = vpop.f32.mrf.mxu0  ;;  %v6236_v43 = vld [vmem:[#allocation29_spill] sm:$0xff]  ;;  %v6237_v39 = vld [vmem:[#allocation46_spill] sm:$0xff] }
 0x3e8   : > { %v3225_v58 = vadd.f32 %v3173_v37, %v2916_v59  ;;  %v3589_v53 = vmax.f32 %v3557_v44, 0.0  ;;  %v6232_v37 = vld [vmem:[#allocation20_spill] sm:$0xff]  ;;  %v2025_v59 = vadd.f32 %v6237_v39, %v6236_v43 }
 0x3e9   : > { %v2867_v18 = vpop.f32.mrf.mxu3  ;;  %v2023_v38 = vadd.f32 %v6233_v54, %v6232_v37 }
 0x3ea   : > { %v3261_v56 = vadd.f32 %v5704_v23, %v3225_v58  ;;  %3621 = vst [vmem:[%s5912_s17 + $0x28] sm:$0xff] %v3589_v53  ;;  %v2334_v30 = vadd.f32 %v5821_v2, %v2025_v59  ;;  %v3529_v53 = vld [vmem:[%s4422_s23 + $0x48] sm:$0xff]  ;;  %v3532_v59 = vld [vmem:[%s4422_s23 + $0x60] sm:$0xff] }
 0x3eb   : > { %v2590_v17 = vpop.f32.mrf.mxu2  ;;  %v3442_v27 = vpop.f32.mrf.mxu1  ;;  %v2332_v41 = vadd.f32 %v5787_v13, %v2023_v38 }
 0x3ec   : > { %v3293_v32 = vmax.f32 %v3261_v56, 0.0  ;;  %v2640_v33 = vadd.f32 %v2590_v17, %v2331_v47  ;;  %v3443_v25 = vadd.f32 %v5899_v51, %v3442_v27 }
 0x3ee   : > { %v2917_v4 = vadd.f32 %v2867_v18, %v2640_v33  ;;  %v3558_v19 = vadd.f32 %v3526_v52, %v3443_v25  ;;  %4066 = vmatmul.msk.f32.gmra.mxu1 %vm310_vm0, %v3293_v32  ;;  %v3188_v17 = vpop.f32.mrf.mxu0  ;;  %v6238_v32 = vld [vmem:[#allocation48_spill] sm:$0xff]  ;;  %v6239_v33 = vld [vmem:[#allocation47_spill] sm:$0xff] }
 0x3ef   : > { %v2026_v25 = vadd.f32 %v6239_v33, %v6238_v32  ;;  %v3533_v33 = vld [vmem:[%s4422_s23 + $0x68] sm:$0xff] }
 0x3f0   : > { %v3226_v48 = vadd.f32 %v3176_v35, %v2917_v4  ;;  %v3590_v55 = vmax.f32 %v3558_v19, 0.0  ;;  %v6235_v35 = vld [vmem:[#allocation45_spill] sm:$0xff] }
 0x3f1   : > { %v2870_v14 = vpop.f32.mrf.mxu3  ;;  %v2024_v0 = vadd.f32 %v6235_v35, %v6234_v60  ;;  %v2335_v54 = vadd.f32 %v5835_v6, %v2026_v25 }
 0x3f2   : > { %v3262_v22 = vadd.f32 %v5704_v23, %v3226_v48  ;;  %3622 = vst [vmem:[%s5912_s17 + $0x30] sm:$0xff] %v3590_v55  ;;  %v3530_v55 = vld [vmem:[%s4422_s23 + $0x50] sm:$0xff] }
 0x3f3   : > { %v2593_v21 = vpop.f32.mrf.mxu2  ;;  %v3445_v11 = vpop.f32.mrf.mxu1  ;;  %v2333_v34 = vadd.f32 %v5804_v10, %v2024_v0 }
 0x3f4   : > { %v3294_v15 = vmax.f32 %v3262_v22, 0.0  ;;  %v2641_v26 = vadd.f32 %v2593_v21, %v2332_v41  ;;  %v3446_v63 = vadd.f32 %v5899_v51, %v3445_v11  ;;  %v6240_v11 = vld [vmem:[#allocation34_spill] sm:$0xff] }
 0x3f6   : > { %v2918_v28 = vadd.f32 %v2870_v14, %v2641_v26  ;;  %v3559_v24 = vadd.f32 %v3527_v7, %v3446_v63  ;;  %4067 = vmatmul.msk.f32.gmra.mxu1 %vm310_vm0, %v3294_v15  ;;  %v6241_v7 = vld [vmem:[#allocation9_spill] sm:$0xff]  ;;  %v3191_v26 = vpop.f32.mrf.mxu0 }
 0x3f7   : > { %v2027_v15 = vadd.f32 %v6241_v7, %v6240_v11  ;;  %v3534_v11 = vld [vmem:[%s4422_s23 + $0x70] sm:$0xff] }
 0x3f8   : > { %v3227_v49 = vadd.f32 %v3179_v20, %v2918_v28  ;;  %v3591_v29 = vmax.f32 %v3559_v24, 0.0 }
 0x3f9   : > { %v2873_v13 = vpop.f32.mrf.mxu3  ;;  %v2336_v60 = vadd.f32 %v5851_v57, %v2027_v15 }
 0x3fa   : > { %v3263_v1 = vadd.f32 %v5704_v23, %v3227_v49  ;;  %3623 = vst [vmem:[%s5912_s17 + $0x38] sm:$0xff] %v3591_v29  ;;  %v3531_v49 = vld [vmem:[%s4422_s23 + $0x58] sm:$0xff] }
 0x3fb   : > { %v2596_v45 = vpop.f32.mrf.mxu2  ;;  %v3448_v61 = vpop.f32.mrf.mxu1 }
 0x3fc   : > { %v3295_v12 = vmax.f32 %v3263_v1, 0.0  ;;  %v2642_v31 = vadd.f32 %v2596_v45, %v2333_v34  ;;  %v3449_v46 = vadd.f32 %v5899_v51, %v3448_v61  ;;  %v6242_v61 = vld [vmem:[#allocation49_spill] sm:$0xff] }
 0x3fe   : > { %v2919_v16 = vadd.f32 %v2873_v13, %v2642_v31  ;;  %v3560_v9 = vadd.f32 %v3528_v36, %v3449_v46  ;;  %4068 = vmatmul.msk.f32.gmra.mxu1 %vm310_vm0, %v3295_v12  ;;  %v6243_v36 = vld [vmem:[#allocation11_spill] sm:$0xff]  ;;  %v3194_v46 = vpop.f32.mrf.mxu0 }
 0x400   : > { %v3228_v44 = vadd.f32 %v3182_v42, %v2919_v16  ;;  %v3592_v62 = vmax.f32 %v3560_v9, 0.0 }
 0x401   : > { %v2876_v3 = vpop.f32.mrf.mxu3 }
 0x402   : > { %v3264_v10 = vadd.f32 %v5704_v23, %v3228_v44  ;;  %3624 = vst [vmem:[%s5912_s17 + $0x40] sm:$0xff] %v3592_v62 }
 0x403   : > { %v2599_v20 = vpop.f32.mrf.mxu2  ;;  %v3451_v58 = vpop.f32.mrf.mxu1 }
 0x404   : > { %v3296_v56 = vmax.f32 %v3264_v10, 0.0  ;;  %v2643_v18 = vadd.f32 %v2599_v20, %v2334_v30  ;;  %v3452_v47 = vadd.f32 %v5899_v51, %v3451_v58  ;;  %v6244_v20 = vld [vmem:[#allocation50_spill] sm:$0xff]  ;;  %v6245_v58 = vld [vmem:[#allocation16_spill] sm:$0xff] }
 0x406   : > { %v2920_v27 = vadd.f32 %v2876_v3, %v2643_v18  ;;  %v3561_v52 = vadd.f32 %v3529_v53, %v3452_v47  ;;  %4069 = vmatmul.msk.f32.gmra.mxu1 %vm310_vm0, %v3296_v56  ;;  %v2029_v53 = vadd.f32 %v6245_v58, %v6244_v20 }
 0x408   : > { %v3229_v4 = vadd.f32 %v3185_v5, %v2920_v27  ;;  %v3593_v19 = vmax.f32 %v3561_v52, 0.0  ;;  %v2028_v5 = vadd.f32 %v6243_v36, %v6242_v61  ;;  %v3197_v27 = vpop.f32.mrf.mxu0 }
 0x409   : > { %v2879_v37 = vpop.f32.mrf.mxu3 }
 0x40a   : > { %v3265_v2 = vadd.f32 %v5704_v23, %v3229_v4  ;;  %3625 = vst [vmem:[%s5912_s17 + $0x48] sm:$0xff] %v3593_v19  ;;  %v2337_v9 = vadd.f32 %v5866_v50, %v2028_v5  ;;  %v2338_v50 = vadd.f32 %v5881_v8, %v2029_v53  ;;  %v3540_v53 = vld [vmem:[%s4422_s23 + $0xa0] sm:$0xff] }
 0x40b   : > { %v2602_v38 = vpop.f32.mrf.mxu2  ;;  %v3454_v48 = vpop.f32.mrf.mxu1 }
 0x40c   : > { %v3297_v42 = vmax.f32 %v3265_v2, 0.0  ;;  %v2644_v22 = vadd.f32 %v2602_v38, %v2335_v54  ;;  %v3455_v14 = vadd.f32 %v5899_v51, %v3454_v48  ;;  %v6246_v54 = vld [vmem:[#allocation51_spill] sm:$0xff]  ;;  %v6247_v38 = vld [vmem:[#allocation13_spill] sm:$0xff] }
 0x40d   : > { %v2030_v48 = vadd.f32 %v6247_v38, %v6246_v54  ;;  %v3543_v54 = vld [vmem:[%s4422_s23 + $0xb8] sm:$0xff] }
 0x40e   : > { %v2921_v41 = vadd.f32 %v2879_v37, %v2644_v22  ;;  %v3562_v21 = vadd.f32 %v3530_v55, %v3455_v14  ;;  %4070 = vmatmul.msk.f32.gmra.mxu1 %vm310_vm0, %v3297_v42 }
 0x40f   : > { %v2339_v22 = vadd.f32 %v5891_v40, %v2030_v48  ;;  %v4168_v40 = vld [vmem:[%s6122_s4] ss:$0 sm:$0xff] }
 0x410   : > { %v3230_v63 = vadd.f32 %v3188_v17, %v2921_v41  ;;  %v3594_v28 = vmax.f32 %v3562_v21, 0.0 }
 0x411   : > { %v2882_v24 = vpop.f32.mrf.mxu3 }
 0x412   : > { %v3266_v6 = vadd.f32 %v5704_v23, %v3230_v63  ;;  %3626 = vst [vmem:[%s5912_s17 + $0x50] sm:$0xff] %v3594_v28  ;;  %v3200_v63 = vpop.f32.mrf.mxu0 }
 0x413   : > { %v2605_v35 = vpop.f32.mrf.mxu2  ;;  %v3457_v0 = vpop.f32.mrf.mxu1 }
 0x414   : > { %v3298_v29 = vmax.f32 %v3266_v6, 0.0  ;;  %v2645_v1 = vadd.f32 %v2605_v35, %v2336_v60  ;;  %v3458_v13 = vadd.f32 %v5899_v51, %v3457_v0  ;;  %v3535_v0 = vld [vmem:[%s4422_s23 + $0x78] sm:$0xff] }
 0x416   : > { %v2922_v34 = vadd.f32 %v2882_v24, %v2645_v1  ;;  %v3563_v45 = vadd.f32 %v3531_v49, %v3458_v13  ;;  %4071 = vmatmul.msk.f32.gmra.mxu1 %vm310_vm0, %v3298_v29 }
 0x418   : > { %v3231_v12 = vadd.f32 %v3191_v26, %v2922_v34  ;;  %v3595_v31 = vmax.f32 %v3563_v45, 0.0  ;;  %v3536_v45 = vld [vmem:[%s4422_s23 + $0x80] sm:$0xff] }
 0x419   : > { %v2885_v16 = vpop.f32.mrf.mxu3 }
 0x41a   : > { %v3267_v57 = vadd.f32 %v5704_v23, %v3231_v12  ;;  %3627 = vst [vmem:[%s5912_s17 + $0x58] sm:$0xff] %v3595_v31  ;;  %v3537_v31 = vld [vmem:[%s4422_s23 + $0x88] sm:$0xff] }
 0x41b   : > { %v2608_v43 = vpop.f32.mrf.mxu2  ;;  %v3460_v39 = vpop.f32.mrf.mxu1 }
 0x41c   : > { %v3299_v44 = vmax.f32 %v3267_v57, 0.0  ;;  %v2646_v62 = vadd.f32 %v2608_v43, %v2337_v9  ;;  %v3461_v10 = vadd.f32 %v5899_v51, %v3460_v39  ;;  %v3538_v43 = vld [vmem:[%s4422_s23 + $0x90] sm:$0xff] }
 0x41e   : > { %v2923_v3 = vadd.f32 %v2885_v16, %v2646_v62  ;;  %v3564_v30 = vadd.f32 %v3532_v59, %v3461_v10  ;;  %4072 = vmatmul.msk.f32.gmra.mxu1 %vm310_vm0, %v3299_v44  ;;  %v3539_v10 = vld [vmem:[%s4422_s23 + $0x98] sm:$0xff] }
 0x420   : > { %v3232_v56 = vadd.f32 %v3194_v46, %v2923_v3  ;;  %v3596_v18 = vmax.f32 %v3564_v30, 0.0 }
 0x421   : > { %v2888_v17 = vpop.f32.mrf.mxu3 }
 0x422   : > { %v3268_v47 = vadd.f32 %v5704_v23, %v3232_v56  ;;  %3628 = vst [vmem:[%s5912_s17 + $0x60] sm:$0xff] %v3596_v18 }
 0x423   : > { %v2611_v52 = vpop.f32.mrf.mxu2  ;;  %v3463_v32 = vpop.f32.mrf.mxu1 }
 0x424   : > { %v3300_v25 = vmax.f32 %v3268_v47, 0.0  ;;  %v2647_v4 = vadd.f32 %v2611_v52, %v2338_v50  ;;  %v3464_v19 = vadd.f32 %v5899_v51, %v3463_v32 }
 0x426   : > { %v3565_v2 = vadd.f32 %v3533_v33, %v3464_v19  ;;  %v2924_v37 = vadd.f32 %v2888_v17, %v2647_v4  ;;  %4073 = vmatmul.msk.f32.gmra.mxu1 %vm310_vm0, %v3300_v25  ;;  %v3541_v17 = vld [vmem:[%s4422_s23 + $0xa8] sm:$0xff]  ;;  %v3542_v25 = vld [vmem:[%s4422_s23 + $0xb0] sm:$0xff] }
 0x428   : > { %v3597_v55 = vmax.f32 %v3565_v2, 0.0  ;;  %v3233_v42 = vadd.f32 %v3197_v27, %v2924_v37 }
 0x429   : > { %v2891_v14 = vpop.f32.mrf.mxu3 }
 0x42a   : > { %3629 = vst [vmem:[%s5912_s17 + $0x68] sm:$0xff] %v3597_v55  ;;  %v3269_v8 = vadd.f32 %v5704_v23, %v3233_v42 }
 0x42b   : > { %v2614_v41 = vpop.f32.mrf.mxu2  ;;  %v3466_v21 = vpop.f32.mrf.mxu1 }
 0x42c   : > { %v3301_v7 = vmax.f32 %v3269_v8, 0.0  ;;  %v2648_v15 = vadd.f32 %v2614_v41, %v2339_v22  ;;  %v3467_v26 = vadd.f32 %v5899_v51, %v3466_v21  ;;  %v3544_v8 = vld [vmem:[%s4422_s23 + $0xc0] sm:$0xff] }
 0x42e   : > { %v3566_v28 = vadd.f32 %v3534_v11, %v3467_v26  ;;  %v2925_v6 = vadd.f32 %v2891_v14, %v2648_v15  ;;  %4074 = vmatmul.msk.f32.gmra.mxu1 %vm310_vm0, %v3301_v7  ;;  %v3545_v11 = vld [vmem:[%s4422_s23 + $0xc8] sm:$0xff] }
 0x430   : > { %v3598_v24 = vmax.f32 %v3566_v28, 0.0  ;;  %v3234_v23 = vadd.f32 %v3200_v63, %v2925_v6  ;;  %v3546_v28 = vld [vmem:[%s4422_s23 + $0xd0] sm:$0xff] }
 0x432   : > { %3630 = vst [vmem:[%s5912_s17 + $0x70] sm:$0xff] %v3598_v24  ;;  %v3270_v60 = vadd.f32 %v4168_v40, %v3234_v23 }
 0x433   : > { %v3469_v35 = vpop.f32.mrf.mxu1 }
 0x434   : > { %v3302_v49 = vmax.f32 %v3270_v60, 0.0  ;;  %v3470_v29 = vadd.f32 %v5899_v51, %v3469_v35  ;;  %v3547_v60 = vld [vmem:[%s4422_s23 + $0xd8] sm:$0xff] }
 0x436   : > { %v3567_v1 = vadd.f32 %v3535_v0, %v3470_v29  ;;  %4075 = vmatmul.msk.f32.gmra.mxu1 %vm310_vm0, %v3302_v49 }
 0x438   : > { %v3599_v13 = vmax.f32 %v3567_v1, 0.0  ;;  %v3548_v1 = vld [vmem:[%s4422_s23 + $0xe0] sm:$0xff] }
 0x43a   : > { %3631 = vst [vmem:[%s5912_s17 + $0x78] sm:$0xff] %v3599_v13 }
 0x43b   : > { %v3472_v34 = vpop.f32.mrf.mxu1 }
 0x43c   : > { %v3473_v61 = vadd.f32 %v5899_v51, %v3472_v34 }
 0x43e   : > { %v3568_v36 = vadd.f32 %v3536_v45, %v3473_v61 }
 0x440   : > { %v3600_v5 = vmax.f32 %v3568_v36, 0.0  ;;  %v3549_v36 = vld [vmem:[%s4422_s23 + $0xe8] sm:$0xff] }
 0x442   : > { %3632 = vst [vmem:[%s5912_s17 + $0x80] sm:$0xff] %v3600_v5 }
 0x443   : > { %v3475_v12 = vpop.f32.mrf.mxu1 }
 0x444   : > { %v3476_v46 = vadd.f32 %v5899_v51, %v3475_v12 }
 0x446   : > { %v3569_v57 = vadd.f32 %v3537_v31, %v3476_v46 }
 0x448   : > { %v3601_v16 = vmax.f32 %v3569_v57, 0.0  ;;  %v3550_v57 = vld [vmem:[%s4422_s23 + $0xf0] sm:$0xff] }
 0x44a   : > { %3633 = vst [vmem:[%s5912_s17 + $0x88] sm:$0xff] %v3601_v16 }
 0x44b   : > { %v3478_v9 = vpop.f32.mrf.mxu1 }
 0x44c   : > { %v3479_v39 = vadd.f32 %v5899_v51, %v3478_v9 }
 0x44e   : > { %v3570_v59 = vadd.f32 %v3538_v43, %v3479_v39 }
 0x450   : > { %v3602_v44 = vmax.f32 %v3570_v59, 0.0  ;;  %v3551_v59 = vld [vmem:[%s4422_s23 + $0xf8] sm:$0xff] }
 0x452   : > { %3634 = vst [vmem:[%s5912_s17 + $0x90] sm:$0xff] %v3602_v44 }
 0x453   : > { %v3481_v62 = vpop.f32.mrf.mxu1 }
 0x454   : > { %v3482_v3 = vadd.f32 %v5899_v51, %v3481_v62 }
 0x456   : > { %v3571_v30 = vadd.f32 %v3539_v10, %v3482_v3 }
 0x458   : > { %v3603_v20 = vmax.f32 %v3571_v30, 0.0 }
 0x45a   : > { %3635 = vst [vmem:[%s5912_s17 + $0x98] sm:$0xff] %v3603_v20 }
 0x45b   : > { %v3484_v58 = vpop.f32.mrf.mxu1 }
 0x45c   : > { %v3485_v56 = vadd.f32 %v5899_v51, %v3484_v58 }
 0x45e   : > { %v3572_v18 = vadd.f32 %v3540_v53, %v3485_v56 }
 0x460   : > { %v3604_v47 = vmax.f32 %v3572_v18, 0.0 }
 0x462   : > { %3636 = vst [vmem:[%s5912_s17 + $0xa0] sm:$0xff] %v3604_v47 }
 0x463   : > { %v3487_v50 = vpop.f32.mrf.mxu1 }
 0x464   : > { %v3488_v27 = vadd.f32 %v5899_v51, %v3487_v50 }
 0x466   : > { %v3573_v52 = vadd.f32 %v3541_v17, %v3488_v27 }
 0x468   : > { %v3605_v32 = vmax.f32 %v3573_v52, 0.0 }
 0x46a   : > { %3637 = vst [vmem:[%s5912_s17 + $0xa8] sm:$0xff] %v3605_v32 }
 0x46b   : > { %v3490_v33 = vpop.f32.mrf.mxu1 }
 0x46c   : > { %v3491_v4 = vadd.f32 %v5899_v51, %v3490_v33 }
 0x46e   : > { %v3574_v19 = vadd.f32 %v3542_v25, %v3491_v4 }
 0x470   : > { %v3606_v2 = vmax.f32 %v3574_v19, 0.0 }
 0x472   : > { %3638 = vst [vmem:[%s5912_s17 + $0xb0] sm:$0xff] %v3606_v2 }
 0x473   : > { %v3493_v37 = vpop.f32.mrf.mxu1 }
 0x474   : > { %v3494_v38 = vadd.f32 %v5899_v51, %v3493_v37 }
 0x476   : > { %v3575_v48 = vadd.f32 %v3543_v54, %v3494_v38 }
 0x478   : > { %v3607_v55 = vmax.f32 %v3575_v48, 0.0 }
 0x47a   : > { %3639 = vst [vmem:[%s5912_s17 + $0xb8] sm:$0xff] %v3607_v55 }
 0x47b   : > { %v3496_v42 = vpop.f32.mrf.mxu1 }
 0x47c   : > { %v3497_v22 = vadd.f32 %v5899_v51, %v3496_v42 }
 0x47e   : > { %v3576_v14 = vadd.f32 %v3544_v8, %v3497_v22 }
 0x480   : > { %v3608_v41 = vmax.f32 %v3576_v14, 0.0 }
 0x482   : > { %3640 = vst [vmem:[%s5912_s17 + $0xc0] sm:$0xff] %v3608_v41 }
 0x483   : > { %v3499_v21 = vpop.f32.mrf.mxu1 }
 0x484   : > { %v3500_v7 = vadd.f32 %v5899_v51, %v3499_v21 }
 0x486   : > { %v3577_v15 = vadd.f32 %v3545_v11, %v3500_v7 }
 0x488   : > { %v3609_v26 = vmax.f32 %v3577_v15, 0.0 }
 0x48a   : > { %3641 = vst [vmem:[%s5912_s17 + $0xc8] sm:$0xff] %v3609_v26 }
 0x48b   : > { %v3502_v63 = vpop.f32.mrf.mxu1 }
 0x48c   : > { %v3503_v6 = vadd.f32 %v5899_v51, %v3502_v63 }
 0x48e   : > { %v3578_v24 = vadd.f32 %v3546_v28, %v3503_v6 }
 0x490   : > { %v3610_v23 = vmax.f32 %v3578_v24, 0.0 }
 0x492   : > { %3642 = vst [vmem:[%s5912_s17 + $0xd0] sm:$0xff] %v3610_v23 }
 0x493   : > { %v3505_v40 = vpop.f32.mrf.mxu1 }
 0x494   : > { %v3506_v35 = vadd.f32 %v5899_v51, %v3505_v40 }
 0x496   : > { %v3579_v0 = vadd.f32 %v3547_v60, %v3506_v35 }
 0x498   : > { %v3611_v49 = vmax.f32 %v3579_v0, 0.0 }
 0x49a   : > { %3643 = vst [vmem:[%s5912_s17 + $0xd8] sm:$0xff] %v3611_v49 }
 0x49b   : > { %v3508_v29 = vpop.f32.mrf.mxu1 }
 0x49c   : > { %v3509_v13 = vadd.f32 %v5899_v51, %v3508_v29 }
 0x49e   : > { %v3580_v34 = vadd.f32 %v3548_v1, %v3509_v13 }
 0x4a0   : > { %v3612_v45 = vmax.f32 %v3580_v34, 0.0 }
 0x4a2   : > { %3644 = vst [vmem:[%s5912_s17 + $0xe0] sm:$0xff] %v3612_v45 }
 0x4a3   : > { %v3511_v61 = vpop.f32.mrf.mxu1 }
 0x4a4   : > { %v3512_v5 = vadd.f32 %v5899_v51, %v3511_v61 }
 0x4a6   : > { %v3581_v12 = vadd.f32 %v3549_v36, %v3512_v5 }
 0x4a8   : > { %v3613_v31 = vmax.f32 %v3581_v12, 0.0 }
 0x4aa   : > { %3645 = vst [vmem:[%s5912_s17 + $0xe8] sm:$0xff] %v3613_v31 }
 0x4ab   : > { %v3514_v46 = vpop.f32.mrf.mxu1 }
 0x4ac   : > { %v3515_v16 = vadd.f32 %v5899_v51, %v3514_v46 }
 0x4ae   : > { %v3582_v9 = vadd.f32 %v3550_v57, %v3515_v16 }
 0x4b0   : > { %v3614_v43 = vmax.f32 %v3582_v9, 0.0 }
 0x4b2   : > { %3646 = vst [vmem:[%s5912_s17 + $0xf0] sm:$0xff] %v3614_v43 }
 0x4b3   : > { %v3517_v39 = vpop.f32.mrf.mxu1 }
 0x4b4   : > { %v3518_v44 = vadd.f32 %v5899_v51, %v3517_v39 }
 0x4b6   : > { %v3583_v62 = vadd.f32 %v3551_v59, %v3518_v44 }
 0x4b8   : > { %v3615_v10 = vmax.f32 %v3583_v62, 0.0 }
 0x4ba   : > { %3647 = vst [vmem:[%s5912_s17 + $0xf8] sm:$0xff] %v3615_v10 }
 0x4bb   : > { %4196 = shalt.err (!%p4193_p5)
}
 0x4bc   : > { %s4250_s15 = smov 128   ;;  %s4251_s17 = smov 8  }
 0x4bd   : > { %4107 = dma.vmem_to_hbm [thread:$0]  (%p4332_p4), %s3665_s8, 4096, %s3667_s10, %s3649_s27, %s4250_s15, %s4250_s15, %s4251_s17  }
 0x4be PF: > { %p4113_p6 = scmp.ge.s32.totalorder %s4247_s29, 2  ;;  %s3681_s22 = sand.u32 1, %s4227_s24  }
 0x4bf   : > { %s3682_s30 = scalar_lea.sflag [#allocation4], %s3681_s22 }
 0x4c0   : > { %p4110_p7 = pnand %p4113_p6, %p4339_p8 }
 0x4c2   : > { %p4111_p9 = pneg %p4110_p7 }
 0x4c4   : > { %4222 = dma.done.wait (%p4111_p9), %s3682_s30, 4096  }
 0x4c5   : > { %4224 = vsyncadd (%p4111_p9), %s3682_s30, 4294963200  ;;  %s20_s29 = sadd.s32 1, %s4247_s29   ;;  %s6248_s24 = smov %s4231_s25 }
 0x4c6   : > { %p17_p10 = scmp.ge.s32.totalorder %s20_s29, 4   ;;  %s6249_s25 = smov %s4235_s26 }
 0x4c7   : > { %s6250_s26 = smov %s4345_s14  ;;  %s6251_s27 = smov %s4243_s28 }
 0x4c8   : > { %s6252_s28 = smov %s6254_s9  ;;  %19 = sbr.rel (!%p17_p10) target bundleno = 4 (0x4), region = 86 }
 0x4cd   :  { %3688 = vsyncpa [#allocation4], 1 }
 0x4ce   :  { %3690 = vsyncpa [#allocation4 + $0x1], 1 }

</bundles_post_ra>
